<compile_context>
chip_gen: v5e
topology: v5e:2x2
jax: 0.10.0
libtpu: 0.0.40
codegen_flags: <defaults>
</compile_context>

<pallas_src>
import math

import jax
import jax.numpy as jnp
from jax import lax
from jax.experimental import pallas as pl
from jax.experimental.pallas import tpu as pltpu

F32 = jnp.float32
NEG_SLOPE = 0.2                      # DGL GATv2Conv default leaky_relu slope
NEG_INF = -1e30
LIN_C = (1.0 + NEG_SLOPE) / 2.0      # leaky_relu(x) = LIN_C*x + ABS_C*|x|
ABS_C = (1.0 - NEG_SLOPE) / 2.0


# ---------------------------------------------------------------------------
# in-kernel building blocks (pure jnp on VMEM-resident values)
# ---------------------------------------------------------------------------
def _row_softmax(logits):
    m = jnp.max(logits, axis=-1, keepdims=True)
    p = jnp.exp(logits - m)
    return p * pl.reciprocal(jnp.sum(p, axis=-1, keepdims=True), approx=True)


def _gatv2_conv(x, a, wl, wr, asel, attn3, bias, num_heads, dh):
    """relu(multi-head GATv2 attention over the dense adjacency `a` (+ self loops))."""
    n = x.shape[0]
    # projections as natural NN / NT dot_generals (no activation transposes)
    zl = jnp.dot(x, wl, preferred_element_type=F32)                       # [n, hid] (dst)
    zlT = lax.dot_general(wl, x, (((0,), (1,)), ((), ())),
                          preferred_element_type=F32)                     # [hid, n]
    zrT = lax.dot_general(wr, x, (((0,), (1,)), ((), ())),
                          preferred_element_type=F32)                     # [hid, n] (src)

    # linear part of sum_c attn[c]*leaky(zl_ic + zr_cj): attn is folded into asel
    ul = lax.dot_general(zl, asel, (((1,), (1,)), ((), ())),
                         preferred_element_type=F32)                      # [n, H]
    ur = jnp.dot(asel, zrT, preferred_element_type=F32)                   # [H, n]

    # |zl_ic + zr_cj| for every channel c, channels on the major axis; attn folded in
    t = jnp.abs(zlT[:, :, None] + zrT[:, None, :]) * attn3                # [hid, n, n]

    ri = lax.broadcasted_iota(jnp.int32, (n, n), 0)
    ci = lax.broadcasted_iota(jnp.int32, (n, n), 1)
    mask = jnp.logical_or(a > 0, ri == ci)                                # self loops

    heads = []
    for h in range(num_heads):
        e_abs = jnp.sum(t[h * dh:(h + 1) * dh], axis=0)                   # major-axis reduce
        e = LIN_C * (ul[:, h:h + 1] + ur[h:h + 1, :]) + ABS_C * e_abs     # [n, n]
        alpha = _row_softmax(jnp.where(mask, e, NEG_INF))                 # [n, n]
        heads.append(lax.dot_general(alpha, zrT[h * dh:(h + 1) * dh, :],
                                     (((1,), (1,)), ((), ())),
                                     preferred_element_type=F32))         # [n, dh]
    out = jnp.concatenate(heads, axis=-1) + bias                          # [n, hid]
    return jnp.maximum(out, 0.0)                                          # ConvPoolReadout relu


def _hgpsl_pool_readout(x, a, k, lamb):
    """HGP-SL top-k pool + structure learning + avg/max readout, fully in-kernel."""
    n, hid = x.shape
    # node information score s_i = || x_i - (D^-1 A X)_i ||_1
    deg = jnp.sum(a, axis=-1, keepdims=True)                              # [n, 1]
    dinv = jnp.where(deg > 0,
                     pl.reciprocal(jnp.maximum(deg, 1.0), approx=True), 0.0)
    ax = jnp.dot(a, x, preferred_element_type=F32)                        # [n, hid]
    absdiff = jnp.abs(x - dinv * ax)
    score_row = lax.dot_general(jnp.ones((1, hid), F32), absdiff,
                                (((1,), (1,)), ((), ())),
                                preferred_element_type=F32)               # [1, n]
    score_col = jnp.dot(absdiff, jnp.ones((hid, 1), F32),
                        preferred_element_type=F32)                       # [n, 1]

    # rank-based top-k (ties broken toward the lower node index), no serial argmax
    ri = lax.broadcasted_iota(jnp.int32, (n, n), 0)
    ci = lax.broadcasted_iota(jnp.int32, (n, n), 1)
    beats = jnp.logical_or(score_col > score_row,
                           jnp.logical_and(score_col == score_row, ri < ci))
    rank = jnp.sum(beats.astype(F32), axis=0, keepdims=True)              # [1, n]
    kidx = lax.broadcasted_iota(jnp.int32, (k, n), 0).astype(F32)
    p = (rank == kidx).astype(F32)                                        # [k, n] one-hot rows

    # gather via one-hot matmuls on the MXU + sigmoid(score) gating
    xp = jnp.dot(p, x, preferred_element_type=F32)                        # [k, hid]
    gate = jax.nn.sigmoid(lax.dot_general(p, score_row, (((1,), (1,)), ((), ())),
                                          preferred_element_type=F32))    # [k, 1]
    xp = xp * gate
    pa = jnp.dot(p, a, preferred_element_type=F32)                        # [k, n]
    a_sub = lax.dot_general(pa, p, (((1,), (1,)), ((), ())),
                            preferred_element_type=F32)                   # [k, k] = P A P^T

    # structure learning  TODO(synk): edge sparsemax replaced by dense row softmax
    logits = lax.dot_general(xp, xp, (((1,), (1,)), ((), ())),
                             preferred_element_type=F32) * (1.0 / math.sqrt(hid))
    a_new = _row_softmax(logits) + lamb * a_sub

    # readout = concat(mean, max) over pooled nodes -> [1, 2*hid]
    mean = jnp.sum(xp, axis=0, keepdims=True) * (1.0 / k)
    mx = jnp.max(xp, axis=0, keepdims=True)
    return xp, a_new, jnp.concatenate([mean, mx], axis=-1)


def _lstm_step(h, c, x, wi, uh, b, hid):
    """Fused-gate LSTM step: one x@Wi and one h@Uh dot, gates sliced from [1, 4*hid]."""
    g = (jnp.dot(x, wi, preferred_element_type=F32)
         + jnp.dot(h, uh, preferred_element_type=F32) + b)                # [1, 4*hid]
    i = jax.nn.sigmoid(g[:, 0:hid])
    f = jax.nn.sigmoid(g[:, hid:2 * hid])
    gg = jnp.tanh(g[:, 2 * hid:3 * hid])
    o = jax.nn.sigmoid(g[:, 3 * hid:4 * hid])
    c = f * c + i * gg
    h = o * jnp.tanh(c)
    return h, c


# ---------------------------------------------------------------------------
# single fused pallas_call for the whole forward pass
# ---------------------------------------------------------------------------
def build_forward(n_nodes, in_feat, out_feat, hid_feat, conv_layers=3, num_heads=4,
                  pool_ratio=0.5, lamb=1.0):
    dh = hid_feat // num_heads
    ks, n = [], n_nodes
    for _ in range(conv_layers):                      # static per-layer node counts
        n = max(1, int(math.ceil(pool_ratio * n)))
        ks.append(n)
    n_conv_refs = 5 * conv_layers

    def kernel(*refs):
        x = refs[0][...]
        a = refs[1][...]
        conv_refs = refs[2:2 + n_conv_refs]
        wi_ref, uh_ref, bl_ref = refs[2 + n_conv_refs:2 + n_conv_refs + 3]
        wll_ref, bll_ref, w3_ref, b3_ref = refs[2 + n_conv_refs + 3:2 + n_conv_refs + 7]
        o_ref = refs[-1]

        readouts = []
        for li in range(conv_layers):
            wl, wr, asel, attn3, bc = [r[...] for r in conv_refs[5 * li:5 * li + 5]]
            x = _gatv2_conv(x, a, wl, wr, asel, attn3, bc, num_heads, dh)
            x, a, ro = _hgpsl_pool_readout(x, a, ks[li], lamb)
            readouts.append(ro)

        # agg_mode == 'LSTM': run the LSTM over the per-layer readouts, keep last h
        h = jnp.zeros((1, hid_feat), F32)
        c = jnp.zeros((1, hid_feat), F32)
        wi, uh, bl = wi_ref[...], uh_ref[...], bl_ref[...]
        for ro in readouts:
            h, c = _lstm_step(h, c, ro, wi, uh, bl, hid_feat)

        feat = jnp.maximum(jnp.dot(h, wll_ref[...], preferred_element_type=F32)
                           + bll_ref[...], 0.0)
        # dropout p=0.0 (eval mode) -> no-op
        o_ref[...] = jnp.dot(feat, w3_ref[...], preferred_element_type=F32) + b3_ref[...]

    def forward(params, n_feat, adj):
        args = [n_feat, adj]
        head_of = jnp.arange(hid_feat, dtype=jnp.int32) // dh             # [hid]
        head_id = jnp.arange(num_heads, dtype=jnp.int32)                  # [H]
        for (wl, wr, attn, bias) in params["convs"]:
            # per-head selection matrix with attn folded in, built OUTSIDE the kernel
            asel = jnp.where(head_of[None, :] == head_id[:, None], attn, 0.0).astype(F32)
            attn3 = attn.reshape(hid_feat, 1, 1)
            args.extend([wl, wr, asel, attn3, bias])
        args.extend(params["lstm"])        # fused Wi [2h,4h], Uh [h,4h], b [1,4h]
        args.extend(params["lin_lstm"])
        args.extend(params["lin3"])
        return pl.pallas_call(
            kernel,
            out_shape=jax.ShapeDtypeStruct((1, out_feat), F32),
            in_specs=[pl.BlockSpec(memory_space=pltpu.MemorySpace.VMEM)] * len(args),
            out_specs=pl.BlockSpec(memory_space=pltpu.MemorySpace.VMEM),
        )(*args)

    return jax.jit(forward)


# ---------------------------------------------------------------------------
# parameter init (deterministic; layouts are what the kernel expects)
# ---------------------------------------------------------------------------
def init_params(key, in_feat, out_feat, hid_feat, conv_layers=3, num_heads=4):
    def dense(k, fi, fo):
        return jax.random.normal(k, (fi, fo), F32) / math.sqrt(fi)

    params = {"convs": []}
    for i in range(conv_layers):
        c_in = in_feat if i == 0 else hid_feat
        key, k1, k2, k3, k4 = jax.random.split(key, 5)
        wl = dense(k1, c_in, hid_feat)                                    # fc_dst
        wr = dense(k2, c_in, hid_feat)                                    # fc_src
        attn = jax.random.normal(k3, (1, hid_feat), F32) / math.sqrt(hid_feat // num_heads)
        bias = 0.01 * jax.random.normal(k4, (1, hid_feat), F32)
        params["convs"].append((wl, wr, attn, bias))
    key, k1, k2, k3 = jax.random.split(key, 4)
    # fused LSTM weights, PyTorch gate order (i, f, g, o); bias represents b_ih + b_hh
    params["lstm"] = (dense(k1, 2 * hid_feat, 4 * hid_feat),
                      dense(k2, hid_feat, 4 * hid_feat),
                      0.01 * jax.random.normal(k3, (1, 4 * hid_feat), F32))
    key, k1, k2, k3, k4 = jax.random.split(key, 5)
    params["lin_lstm"] = (dense(k1, hid_feat, hid_feat),
                          0.01 * jax.random.normal(k2, (1, hid_feat), F32))
    params["lin3"] = (dense(k3, hid_feat, out_feat),
                      0.01 * jax.random.normal(k4, (1, out_feat), F32))
    return params


if __name__ == "__main__":
    IN_FEAT, OUT_FEAT, HID_FEAT = 8, 4, 32
    N_NODES, CONV_LAYERS, NUM_HEADS, POOL_RATIO, LAMB = 16, 3, 4, 0.5, 1.0

    key = jax.random.PRNGKey(0)
    key, kx, ka, kp = jax.random.split(key, 4)

    # deterministic small random graph: symmetric 0/1 adjacency, no self loops
    n_feat = jax.random.normal(kx, (N_NODES, IN_FEAT), F32)
    rand = jax.random.uniform(ka, (N_NODES, N_NODES))
    adj = (rand < 0.3).astype(F32)
    adj = jnp.maximum(adj, adj.T) * (1.0 - jnp.eye(N_NODES, dtype=F32))

    params = init_params(kp, IN_FEAT, OUT_FEAT, HID_FEAT, CONV_LAYERS, NUM_HEADS)
    forward = build_forward(N_NODES, IN_FEAT, OUT_FEAT, HID_FEAT, CONV_LAYERS,
                            NUM_HEADS, POOL_RATIO, LAMB)

    out = jax.block_until_ready(forward(params, n_feat, adj))
    assert out.shape == (1, OUT_FEAT) and out.dtype == F32
    assert bool(jnp.all(jnp.isfinite(out)))
    print("KERNEL_OK")
</pallas_src>

<mosaic_0001>
module attributes {stable_mosaic.version = 11 : i64} {
  func.func @kernel(%arg0: memref<16x8xf32, #tpu.memory_space<vmem>>, %arg1: memref<16x16xf32, #tpu.memory_space<vmem>>, %arg2: memref<8x32xf32, #tpu.memory_space<vmem>>, %arg3: memref<8x32xf32, #tpu.memory_space<vmem>>, %arg4: memref<4x32xf32, #tpu.memory_space<vmem>>, %arg5: memref<32x1x1xf32, #tpu.memory_space<vmem>>, %arg6: memref<1x32xf32, #tpu.memory_space<vmem>>, %arg7: memref<32x32xf32, #tpu.memory_space<vmem>>, %arg8: memref<32x32xf32, #tpu.memory_space<vmem>>, %arg9: memref<4x32xf32, #tpu.memory_space<vmem>>, %arg10: memref<32x1x1xf32, #tpu.memory_space<vmem>>, %arg11: memref<1x32xf32, #tpu.memory_space<vmem>>, %arg12: memref<32x32xf32, #tpu.memory_space<vmem>>, %arg13: memref<32x32xf32, #tpu.memory_space<vmem>>, %arg14: memref<4x32xf32, #tpu.memory_space<vmem>>, %arg15: memref<32x1x1xf32, #tpu.memory_space<vmem>>, %arg16: memref<1x32xf32, #tpu.memory_space<vmem>>, %arg17: memref<64x128xf32, #tpu.memory_space<vmem>>, %arg18: memref<32x128xf32, #tpu.memory_space<vmem>>, %arg19: memref<1x128xf32, #tpu.memory_space<vmem>>, %arg20: memref<32x32xf32, #tpu.memory_space<vmem>>, %arg21: memref<1x32xf32, #tpu.memory_space<vmem>>, %arg22: memref<32x4xf32, #tpu.memory_space<vmem>>, %arg23: memref<1x4xf32, #tpu.memory_space<vmem>>, %arg24: memref<1x4xf32, #tpu.memory_space<vmem>>) attributes {dimension_semantics = [], scalar_prefetch = 0 : i64, scratch_operands = 0 : i64, tpu.core_type = #tpu.core_type<tc>} {
    %c0 = arith.constant 0 : index
    %c0_0 = arith.constant 0 : index
    %0 = vector.load %arg0[%c0, %c0_0] : memref<16x8xf32, #tpu.memory_space<vmem>>, vector<16x8xf32>
    %c0_1 = arith.constant 0 : index
    %c0_2 = arith.constant 0 : index
    %1 = vector.load %arg1[%c0_1, %c0_2] : memref<16x16xf32, #tpu.memory_space<vmem>>, vector<16x16xf32>
    %c0_3 = arith.constant 0 : index
    %c0_4 = arith.constant 0 : index
    %2 = vector.load %arg2[%c0_3, %c0_4] : memref<8x32xf32, #tpu.memory_space<vmem>>, vector<8x32xf32>
    %c0_5 = arith.constant 0 : index
    %c0_6 = arith.constant 0 : index
    %3 = vector.load %arg3[%c0_5, %c0_6] : memref<8x32xf32, #tpu.memory_space<vmem>>, vector<8x32xf32>
    %c0_7 = arith.constant 0 : index
    %c0_8 = arith.constant 0 : index
    %4 = vector.load %arg4[%c0_7, %c0_8] : memref<4x32xf32, #tpu.memory_space<vmem>>, vector<4x32xf32>
    %c0_9 = arith.constant 0 : index
    %c0_10 = arith.constant 0 : index
    %c0_11 = arith.constant 0 : index
    %5 = vector.load %arg5[%c0_9, %c0_10, %c0_11] : memref<32x1x1xf32, #tpu.memory_space<vmem>>, vector<32x1x1xf32>
    %c0_12 = arith.constant 0 : index
    %c0_13 = arith.constant 0 : index
    %6 = vector.load %arg6[%c0_12, %c0_13] : memref<1x32xf32, #tpu.memory_space<vmem>>, vector<1x32xf32>
    %cst = arith.constant dense<0.000000e+00> : vector<16x32xf32>
    %7 = tpu.matmul %0, %2, %cst {dimension_numbers = #tpu.dot_dimension_numbers<[1], [0], [0], [1], [0, 0, 1, 1], [], []>} : vector<16x8xf32>, vector<8x32xf32>, vector<16x32xf32> -> vector<16x32xf32>
    %cst_14 = arith.constant dense<0.000000e+00> : vector<32x16xf32>
    %8 = tpu.matmul %2, %0, %cst_14 {dimension_numbers = #tpu.dot_dimension_numbers<[0], [1], [1], [0], [0, 1, 1, 0], [], []>} : vector<8x32xf32>, vector<16x8xf32>, vector<32x16xf32> -> vector<32x16xf32>
    %cst_15 = arith.constant dense<0.000000e+00> : vector<32x16xf32>
    %9 = tpu.matmul %3, %0, %cst_15 {dimension_numbers = #tpu.dot_dimension_numbers<[0], [1], [1], [0], [0, 1, 1, 0], [], []>} : vector<8x32xf32>, vector<16x8xf32>, vector<32x16xf32> -> vector<32x16xf32>
    %cst_16 = arith.constant dense<0.000000e+00> : vector<16x4xf32>
    %10 = tpu.matmul %7, %4, %cst_16 {dimension_numbers = #tpu.dot_dimension_numbers<[1], [1], [0], [0], [0, 0, 1, 0], [], []>} : vector<16x32xf32>, vector<4x32xf32>, vector<16x4xf32> -> vector<16x4xf32>
    %cst_17 = arith.constant dense<0.000000e+00> : vector<4x16xf32>
    %11 = tpu.matmul %4, %9, %cst_17 {dimension_numbers = #tpu.dot_dimension_numbers<[1], [0], [0], [1], [0, 0, 1, 1], [], []>} : vector<4x32xf32>, vector<32x16xf32>, vector<4x16xf32> -> vector<4x16xf32>
    %12 = vector.shape_cast %8 : vector<32x16xf32> to vector<32x16x1xf32>
    %13 = vector.shape_cast %9 : vector<32x16xf32> to vector<32x1x16xf32>
    %14 = vector.broadcast %12 : vector<32x16x1xf32> to vector<32x16x16xf32>
    %15 = vector.broadcast %13 : vector<32x1x16xf32> to vector<32x16x16xf32>
    %16 = arith.addf %14, %15 : vector<32x16x16xf32>
    %17 = math.absf %16 : vector<32x16x16xf32>
    %18 = vector.broadcast %5 : vector<32x1x1xf32> to vector<32x16x16xf32>
    %19 = arith.mulf %17, %18 : vector<32x16x16xf32>
    %20 = tpu.iota {dimensions = array<i32: 0>} : vector<16x16xi32>
    %21 = tpu.iota {dimensions = array<i32: 1>} : vector<16x16xi32>
    %cst_18 = arith.constant 0.000000e+00 : f32
    %22 = vector.broadcast %cst_18 : f32 to vector<16x16xf32>
    %23 = arith.cmpf ogt, %1, %22 : vector<16x16xf32>
    %24 = arith.cmpi eq, %20, %21 : vector<16x16xi32>
    %25 = arith.ori %23, %24 : vector<16x16xi1>
    %26 = vector.extract_strided_slice %19 {offsets = [0, 0, 0], sizes = [8, 16, 16], strides = [1, 1, 1]} : vector<32x16x16xf32> to vector<8x16x16xf32>
    %cst_19 = arith.constant dense<0.000000e+00> : vector<16x16xf32>
    %27 = vector.multi_reduction <add>, %26, %cst_19 [0] : vector<8x16x16xf32> to vector<16x16xf32>
    %28 = vector.extract_strided_slice %10 {offsets = [0, 0], sizes = [16, 1], strides = [1, 1]} : vector<16x4xf32> to vector<16x1xf32>
    %29 = vector.extract_strided_slice %11 {offsets = [0, 0], sizes = [1, 16], strides = [1, 1]} : vector<4x16xf32> to vector<1x16xf32>
    %30 = vector.broadcast %28 : vector<16x1xf32> to vector<16x16xf32>
    %31 = vector.broadcast %29 : vector<1x16xf32> to vector<16x16xf32>
    %32 = arith.addf %30, %31 : vector<16x16xf32>
    %cst_20 = arith.constant 6.000000e-01 : f32
    %33 = vector.broadcast %cst_20 : f32 to vector<16x16xf32>
    %34 = arith.mulf %33, %32 : vector<16x16xf32>
    %cst_21 = arith.constant 4.000000e-01 : f32
    %35 = vector.broadcast %cst_21 : f32 to vector<16x16xf32>
    %36 = arith.mulf %35, %27 : vector<16x16xf32>
    %37 = arith.addf %34, %36 : vector<16x16xf32>
    %cst_22 = arith.constant -1.000000e+30 : f32
    %38 = vector.broadcast %cst_22 : f32 to vector<16x16xf32>
    %39 = arith.select %25, %37, %38 : vector<16x16xi1>, vector<16x16xf32>
    %cst_23 = arith.constant dense<0xFF800000> : vector<16xf32>
    %40 = vector.multi_reduction <maximumf>, %39, %cst_23 [1] : vector<16x16xf32> to vector<16xf32>
    %41 = vector.shape_cast %40 : vector<16xf32> to vector<16x1xf32>
    %42 = vector.broadcast %41 : vector<16x1xf32> to vector<16x16xf32>
    %43 = arith.subf %39, %42 : vector<16x16xf32>
    %44 = math.exp %43 : vector<16x16xf32>
    %cst_24 = arith.constant dense<0.000000e+00> : vector<16xf32>
    %45 = vector.multi_reduction <add>, %44, %cst_24 [1] : vector<16x16xf32> to vector<16xf32>
    %46 = vector.shape_cast %45 : vector<16xf32> to vector<16x1xf32>
    %47 = tpu.reciprocal %46 {approx = true} : vector<16x1xf32> -> vector<16x1xf32>
    %48 = vector.broadcast %47 : vector<16x1xf32> to vector<16x16xf32>
    %49 = arith.mulf %44, %48 : vector<16x16xf32>
    %50 = vector.extract_strided_slice %9 {offsets = [0, 0], sizes = [8, 16], strides = [1, 1]} : vector<32x16xf32> to vector<8x16xf32>
    %cst_25 = arith.constant dense<0.000000e+00> : vector<16x8xf32>
    %51 = tpu.matmul %49, %50, %cst_25 {dimension_numbers = #tpu.dot_dimension_numbers<[1], [1], [0], [0], [0, 0, 1, 0], [], []>} : vector<16x16xf32>, vector<8x16xf32>, vector<16x8xf32> -> vector<16x8xf32>
    %52 = vector.extract_strided_slice %19 {offsets = [8, 0, 0], sizes = [8, 16, 16], strides = [1, 1, 1]} : vector<32x16x16xf32> to vector<8x16x16xf32>
    %cst_26 = arith.constant dense<0.000000e+00> : vector<16x16xf32>
    %53 = vector.multi_reduction <add>, %52, %cst_26 [0] : vector<8x16x16xf32> to vector<16x16xf32>
    %54 = vector.extract_strided_slice %10 {offsets = [0, 1], sizes = [16, 1], strides = [1, 1]} : vector<16x4xf32> to vector<16x1xf32>
    %55 = vector.extract_strided_slice %11 {offsets = [1, 0], sizes = [1, 16], strides = [1, 1]} : vector<4x16xf32> to vector<1x16xf32>
    %56 = vector.broadcast %54 : vector<16x1xf32> to vector<16x16xf32>
    %57 = vector.broadcast %55 : vector<1x16xf32> to vector<16x16xf32>
    %58 = arith.addf %56, %57 : vector<16x16xf32>
    %cst_27 = arith.constant 6.000000e-01 : f32
    %59 = vector.broadcast %cst_27 : f32 to vector<16x16xf32>
    %60 = arith.mulf %59, %58 : vector<16x16xf32>
    %cst_28 = arith.constant 4.000000e-01 : f32
    %61 = vector.broadcast %cst_28 : f32 to vector<16x16xf32>
    %62 = arith.mulf %61, %53 : vector<16x16xf32>
    %63 = arith.addf %60, %62 : vector<16x16xf32>
    %cst_29 = arith.constant -1.000000e+30 : f32
    %64 = vector.broadcast %cst_29 : f32 to vector<16x16xf32>
    %65 = arith.select %25, %63, %64 : vector<16x16xi1>, vector<16x16xf32>
    %cst_30 = arith.constant dense<0xFF800000> : vector<16xf32>
    %66 = vector.multi_reduction <maximumf>, %65, %cst_30 [1] : vector<16x16xf32> to vector<16xf32>
    %67 = vector.shape_cast %66 : vector<16xf32> to vector<16x1xf32>
    %68 = vector.broadcast %67 : vector<16x1xf32> to vector<16x16xf32>
    %69 = arith.subf %65, %68 : vector<16x16xf32>
    %70 = math.exp %69 : vector<16x16xf32>
    %cst_31 = arith.constant dense<0.000000e+00> : vector<16xf32>
    %71 = vector.multi_reduction <add>, %70, %cst_31 [1] : vector<16x16xf32> to vector<16xf32>
    %72 = vector.shape_cast %71 : vector<16xf32> to vector<16x1xf32>
    %73 = tpu.reciprocal %72 {approx = true} : vector<16x1xf32> -> vector<16x1xf32>
    %74 = vector.broadcast %73 : vector<16x1xf32> to vector<16x16xf32>
    %75 = arith.mulf %70, %74 : vector<16x16xf32>
    %76 = vector.extract_strided_slice %9 {offsets = [8, 0], sizes = [8, 16], strides = [1, 1]} : vector<32x16xf32> to vector<8x16xf32>
    %cst_32 = arith.constant dense<0.000000e+00> : vector<16x8xf32>
    %77 = tpu.matmul %75, %76, %cst_32 {dimension_numbers = #tpu.dot_dimension_numbers<[1], [1], [0], [0], [0, 0, 1, 0], [], []>} : vector<16x16xf32>, vector<8x16xf32>, vector<16x8xf32> -> vector<16x8xf32>
    %78 = vector.extract_strided_slice %19 {offsets = [16, 0, 0], sizes = [8, 16, 16], strides = [1, 1, 1]} : vector<32x16x16xf32> to vector<8x16x16xf32>
    %cst_33 = arith.constant dense<0.000000e+00> : vector<16x16xf32>
    %79 = vector.multi_reduction <add>, %78, %cst_33 [0] : vector<8x16x16xf32> to vector<16x16xf32>
    %80 = vector.extract_strided_slice %10 {offsets = [0, 2], sizes = [16, 1], strides = [1, 1]} : vector<16x4xf32> to vector<16x1xf32>
    %81 = vector.extract_strided_slice %11 {offsets = [2, 0], sizes = [1, 16], strides = [1, 1]} : vector<4x16xf32> to vector<1x16xf32>
    %82 = vector.broadcast %80 : vector<16x1xf32> to vector<16x16xf32>
    %83 = vector.broadcast %81 : vector<1x16xf32> to vector<16x16xf32>
    %84 = arith.addf %82, %83 : vector<16x16xf32>
    %cst_34 = arith.constant 6.000000e-01 : f32
    %85 = vector.broadcast %cst_34 : f32 to vector<16x16xf32>
    %86 = arith.mulf %85, %84 : vector<16x16xf32>
    %cst_35 = arith.constant 4.000000e-01 : f32
    %87 = vector.broadcast %cst_35 : f32 to vector<16x16xf32>
    %88 = arith.mulf %87, %79 : vector<16x16xf32>
    %89 = arith.addf %86, %88 : vector<16x16xf32>
    %cst_36 = arith.constant -1.000000e+30 : f32
    %90 = vector.broadcast %cst_36 : f32 to vector<16x16xf32>
    %91 = arith.select %25, %89, %90 : vector<16x16xi1>, vector<16x16xf32>
    %cst_37 = arith.constant dense<0xFF800000> : vector<16xf32>
    %92 = vector.multi_reduction <maximumf>, %91, %cst_37 [1] : vector<16x16xf32> to vector<16xf32>
    %93 = vector.shape_cast %92 : vector<16xf32> to vector<16x1xf32>
    %94 = vector.broadcast %93 : vector<16x1xf32> to vector<16x16xf32>
    %95 = arith.subf %91, %94 : vector<16x16xf32>
    %96 = math.exp %95 : vector<16x16xf32>
    %cst_38 = arith.constant dense<0.000000e+00> : vector<16xf32>
    %97 = vector.multi_reduction <add>, %96, %cst_38 [1] : vector<16x16xf32> to vector<16xf32>
    %98 = vector.shape_cast %97 : vector<16xf32> to vector<16x1xf32>
    %99 = tpu.reciprocal %98 {approx = true} : vector<16x1xf32> -> vector<16x1xf32>
    %100 = vector.broadcast %99 : vector<16x1xf32> to vector<16x16xf32>
    %101 = arith.mulf %96, %100 : vector<16x16xf32>
    %102 = vector.extract_strided_slice %9 {offsets = [16, 0], sizes = [8, 16], strides = [1, 1]} : vector<32x16xf32> to vector<8x16xf32>
    %cst_39 = arith.constant dense<0.000000e+00> : vector<16x8xf32>
    %103 = tpu.matmul %101, %102, %cst_39 {dimension_numbers = #tpu.dot_dimension_numbers<[1], [1], [0], [0], [0, 0, 1, 0], [], []>} : vector<16x16xf32>, vector<8x16xf32>, vector<16x8xf32> -> vector<16x8xf32>
    %104 = vector.extract_strided_slice %19 {offsets = [24, 0, 0], sizes = [8, 16, 16], strides = [1, 1, 1]} : vector<32x16x16xf32> to vector<8x16x16xf32>
    %cst_40 = arith.constant dense<0.000000e+00> : vector<16x16xf32>
    %105 = vector.multi_reduction <add>, %104, %cst_40 [0] : vector<8x16x16xf32> to vector<16x16xf32>
    %106 = vector.extract_strided_slice %10 {offsets = [0, 3], sizes = [16, 1], strides = [1, 1]} : vector<16x4xf32> to vector<16x1xf32>
    %107 = vector.extract_strided_slice %11 {offsets = [3, 0], sizes = [1, 16], strides = [1, 1]} : vector<4x16xf32> to vector<1x16xf32>
    %108 = vector.broadcast %106 : vector<16x1xf32> to vector<16x16xf32>
    %109 = vector.broadcast %107 : vector<1x16xf32> to vector<16x16xf32>
    %110 = arith.addf %108, %109 : vector<16x16xf32>
    %cst_41 = arith.constant 6.000000e-01 : f32
    %111 = vector.broadcast %cst_41 : f32 to vector<16x16xf32>
    %112 = arith.mulf %111, %110 : vector<16x16xf32>
    %cst_42 = arith.constant 4.000000e-01 : f32
    %113 = vector.broadcast %cst_42 : f32 to vector<16x16xf32>
    %114 = arith.mulf %113, %105 : vector<16x16xf32>
    %115 = arith.addf %112, %114 : vector<16x16xf32>
    %cst_43 = arith.constant -1.000000e+30 : f32
    %116 = vector.broadcast %cst_43 : f32 to vector<16x16xf32>
    %117 = arith.select %25, %115, %116 : vector<16x16xi1>, vector<16x16xf32>
    %cst_44 = arith.constant dense<0xFF800000> : vector<16xf32>
    %118 = vector.multi_reduction <maximumf>, %117, %cst_44 [1] : vector<16x16xf32> to vector<16xf32>
    %119 = vector.shape_cast %118 : vector<16xf32> to vector<16x1xf32>
    %120 = vector.broadcast %119 : vector<16x1xf32> to vector<16x16xf32>
    %121 = arith.subf %117, %120 : vector<16x16xf32>
    %122 = math.exp %121 : vector<16x16xf32>
    %cst_45 = arith.constant dense<0.000000e+00> : vector<16xf32>
    %123 = vector.multi_reduction <add>, %122, %cst_45 [1] : vector<16x16xf32> to vector<16xf32>
    %124 = vector.shape_cast %123 : vector<16xf32> to vector<16x1xf32>
    %125 = tpu.reciprocal %124 {approx = true} : vector<16x1xf32> -> vector<16x1xf32>
    %126 = vector.broadcast %125 : vector<16x1xf32> to vector<16x16xf32>
    %127 = arith.mulf %122, %126 : vector<16x16xf32>
    %128 = vector.extract_strided_slice %9 {offsets = [24, 0], sizes = [8, 16], strides = [1, 1]} : vector<32x16xf32> to vector<8x16xf32>
    %cst_46 = arith.constant dense<0.000000e+00> : vector<16x8xf32>
    %129 = tpu.matmul %127, %128, %cst_46 {dimension_numbers = #tpu.dot_dimension_numbers<[1], [1], [0], [0], [0, 0, 1, 0], [], []>} : vector<16x16xf32>, vector<8x16xf32>, vector<16x8xf32> -> vector<16x8xf32>
    %130 = tpu.concatenate %51, %77, %103, %129 in 1 : vector<16x8xf32>, vector<16x8xf32>, vector<16x8xf32>, vector<16x8xf32> -> vector<16x32xf32>
    %131 = vector.broadcast %6 : vector<1x32xf32> to vector<16x32xf32>
    %132 = arith.addf %130, %131 : vector<16x32xf32>
    %cst_47 = arith.constant 0.000000e+00 : f32
    %133 = vector.broadcast %cst_47 : f32 to vector<16x32xf32>
    %134 = arith.maximumf %132, %133 : vector<16x32xf32>
    %cst_48 = arith.constant dense<0.000000e+00> : vector<16xf32>
    %135 = vector.multi_reduction <add>, %1, %cst_48 [1] : vector<16x16xf32> to vector<16xf32>
    %136 = vector.shape_cast %135 : vector<16xf32> to vector<16x1xf32>
    %cst_49 = arith.constant 0.000000e+00 : f32
    %137 = vector.broadcast %cst_49 : f32 to vector<16x1xf32>
    %138 = arith.cmpf ogt, %136, %137 : vector<16x1xf32>
    %cst_50 = arith.constant 1.000000e+00 : f32
    %139 = vector.broadcast %cst_50 : f32 to vector<16x1xf32>
    %140 = arith.maximumf %136, %139 : vector<16x1xf32>
    %141 = tpu.reciprocal %140 {approx = true} : vector<16x1xf32> -> vector<16x1xf32>
    %cst_51 = arith.constant 0.000000e+00 : f32
    %142 = vector.broadcast %cst_51 : f32 to vector<16x1xf32>
    %143 = arith.select %138, %141, %142 : vector<16x1xi1>, vector<16x1xf32>
    %cst_52 = arith.constant dense<0.000000e+00> : vector<16x32xf32>
    %144 = tpu.matmul %1, %134, %cst_52 {dimension_numbers = #tpu.dot_dimension_numbers<[1], [0], [0], [1], [0, 0, 1, 1], [], []>} : vector<16x16xf32>, vector<16x32xf32>, vector<16x32xf32> -> vector<16x32xf32>
    %145 = vector.broadcast %143 : vector<16x1xf32> to vector<16x32xf32>
    %146 = arith.mulf %145, %144 : vector<16x32xf32>
    %147 = arith.subf %134, %146 : vector<16x32xf32>
    %148 = math.absf %147 : vector<16x32xf32>
    %cst_53 = arith.constant 1.000000e+00 : f32
    %149 = vector.broadcast %cst_53 : f32 to vector<1x32xf32>
    %cst_54 = arith.constant dense<0.000000e+00> : vector<1x16xf32>
    %150 = tpu.matmul %149, %148, %cst_54 {dimension_numbers = #tpu.dot_dimension_numbers<[1], [1], [0], [0], [0, 0, 1, 0], [], []>} : vector<1x32xf32>, vector<16x32xf32>, vector<1x16xf32> -> vector<1x16xf32>
    %cst_55 = arith.constant 1.000000e+00 : f32
    %151 = vector.broadcast %cst_55 : f32 to vector<32x1xf32>
    %cst_56 = arith.constant dense<0.000000e+00> : vector<16x1xf32>
    %152 = tpu.matmul %148, %151, %cst_56 {dimension_numbers = #tpu.dot_dimension_numbers<[1], [0], [0], [1], [0, 0, 1, 1], [], []>} : vector<16x32xf32>, vector<32x1xf32>, vector<16x1xf32> -> vector<16x1xf32>
    %153 = tpu.iota {dimensions = array<i32: 0>} : vector<16x16xi32>
    %154 = tpu.iota {dimensions = array<i32: 1>} : vector<16x16xi32>
    %155 = vector.broadcast %152 : vector<16x1xf32> to vector<16x16xf32>
    %156 = vector.broadcast %150 : vector<1x16xf32> to vector<16x16xf32>
    %157 = arith.cmpf ogt, %155, %156 : vector<16x16xf32>
    %158 = vector.broadcast %152 : vector<16x1xf32> to vector<16x16xf32>
    %159 = vector.broadcast %150 : vector<1x16xf32> to vector<16x16xf32>
    %160 = arith.cmpf oeq, %158, %159 : vector<16x16xf32>
    %161 = arith.cmpi slt, %153, %154 : vector<16x16xi32>
    %162 = arith.andi %160, %161 : vector<16x16xi1>
    %163 = arith.ori %157, %162 : vector<16x16xi1>
    %164 = arith.extui %163 : vector<16x16xi1> to vector<16x16xi32>
    %165 = arith.sitofp %164 : vector<16x16xi32> to vector<16x16xf32>
    %cst_57 = arith.constant dense<0.000000e+00> : vector<16xf32>
    %166 = vector.multi_reduction <add>, %165, %cst_57 [0] : vector<16x16xf32> to vector<16xf32>
    %167 = vector.shape_cast %166 : vector<16xf32> to vector<1x16xf32>
    %168 = tpu.iota {dimensions = array<i32: 0>} : vector<8x16xi32>
    %169 = arith.sitofp %168 : vector<8x16xi32> to vector<8x16xf32>
    %170 = vector.broadcast %167 : vector<1x16xf32> to vector<8x16xf32>
    %171 = arith.cmpf oeq, %170, %169 : vector<8x16xf32>
    %172 = arith.extui %171 : vector<8x16xi1> to vector<8x16xi32>
    %173 = arith.sitofp %172 : vector<8x16xi32> to vector<8x16xf32>
    %cst_58 = arith.constant dense<0.000000e+00> : vector<8x32xf32>
    %174 = tpu.matmul %173, %134, %cst_58 {dimension_numbers = #tpu.dot_dimension_numbers<[1], [0], [0], [1], [0, 0, 1, 1], [], []>} : vector<8x16xf32>, vector<16x32xf32>, vector<8x32xf32> -> vector<8x32xf32>
    %cst_59 = arith.constant dense<0.000000e+00> : vector<8x1xf32>
    %175 = tpu.matmul %173, %150, %cst_59 {dimension_numbers = #tpu.dot_dimension_numbers<[1], [1], [0], [0], [0, 0, 1, 0], [], []>} : vector<8x16xf32>, vector<1x16xf32>, vector<8x1xf32> -> vector<8x1xf32>
    %176 = arith.negf %175 : vector<8x1xf32>
    %177 = math.exp %176 : vector<8x1xf32>
    %cst_60 = arith.constant 1.000000e+00 : f32
    %178 = vector.broadcast %cst_60 : f32 to vector<8x1xf32>
    %179 = arith.addf %178, %177 : vector<8x1xf32>
    %180 = arith.divf %178, %179 : vector<8x1xf32>
    %181 = vector.broadcast %180 : vector<8x1xf32> to vector<8x32xf32>
    %182 = arith.mulf %174, %181 : vector<8x32xf32>
    %cst_61 = arith.constant dense<0.000000e+00> : vector<8x16xf32>
    %183 = tpu.matmul %173, %1, %cst_61 {dimension_numbers = #tpu.dot_dimension_numbers<[1], [0], [0], [1], [0, 0, 1, 1], [], []>} : vector<8x16xf32>, vector<16x16xf32>, vector<8x16xf32> -> vector<8x16xf32>
    %cst_62 = arith.constant dense<0.000000e+00> : vector<8x8xf32>
    %184 = tpu.matmul %183, %173, %cst_62 {dimension_numbers = #tpu.dot_dimension_numbers<[1], [1], [0], [0], [0, 0, 1, 0], [], []>} : vector<8x16xf32>, vector<8x16xf32>, vector<8x8xf32> -> vector<8x8xf32>
    %cst_63 = arith.constant dense<0.000000e+00> : vector<8x8xf32>
    %185 = tpu.matmul %182, %182, %cst_63 {dimension_numbers = #tpu.dot_dimension_numbers<[1], [1], [0], [0], [0, 0, 1, 0], [], []>} : vector<8x32xf32>, vector<8x32xf32>, vector<8x8xf32> -> vector<8x8xf32>
    %cst_64 = arith.constant 0.176776692 : f32
    %186 = vector.broadcast %cst_64 : f32 to vector<8x8xf32>
    %187 = arith.mulf %185, %186 : vector<8x8xf32>
    %cst_65 = arith.constant dense<0xFF800000> : vector<8xf32>
    %188 = vector.multi_reduction <maximumf>, %187, %cst_65 [1] : vector<8x8xf32> to vector<8xf32>
    %189 = vector.shape_cast %188 : vector<8xf32> to vector<8x1xf32>
    %190 = vector.broadcast %189 : vector<8x1xf32> to vector<8x8xf32>
    %191 = arith.subf %187, %190 : vector<8x8xf32>
    %192 = math.exp %191 : vector<8x8xf32>
    %cst_66 = arith.constant dense<0.000000e+00> : vector<8xf32>
    %193 = vector.multi_reduction <add>, %192, %cst_66 [1] : vector<8x8xf32> to vector<8xf32>
    %194 = vector.shape_cast %193 : vector<8xf32> to vector<8x1xf32>
    %195 = tpu.reciprocal %194 {approx = true} : vector<8x1xf32> -> vector<8x1xf32>
    %196 = vector.broadcast %195 : vector<8x1xf32> to vector<8x8xf32>
    %197 = arith.mulf %192, %196 : vector<8x8xf32>
    %cst_67 = arith.constant 1.000000e+00 : f32
    %198 = vector.broadcast %cst_67 : f32 to vector<8x8xf32>
    %199 = arith.mulf %198, %184 : vector<8x8xf32>
    %200 = arith.addf %197, %199 : vector<8x8xf32>
    %cst_68 = arith.constant dense<0.000000e+00> : vector<32xf32>
    %201 = vector.multi_reduction <add>, %182, %cst_68 [0] : vector<8x32xf32> to vector<32xf32>
    %202 = vector.shape_cast %201 : vector<32xf32> to vector<1x32xf32>
    %cst_69 = arith.constant 1.250000e-01 : f32
    %203 = vector.broadcast %cst_69 : f32 to vector<1x32xf32>
    %204 = arith.mulf %202, %203 : vector<1x32xf32>
    %cst_70 = arith.constant dense<0xFF800000> : vector<32xf32>
    %205 = vector.multi_reduction <maximumf>, %182, %cst_70 [0] : vector<8x32xf32> to vector<32xf32>
    %206 = vector.shape_cast %205 : vector<32xf32> to vector<1x32xf32>
    %207 = tpu.concatenate %204, %206 in 1 : vector<1x32xf32>, vector<1x32xf32> -> vector<1x64xf32>
    %c0_71 = arith.constant 0 : index
    %c0_72 = arith.constant 0 : index
    %208 = vector.load %arg7[%c0_71, %c0_72] : memref<32x32xf32, #tpu.memory_space<vmem>>, vector<32x32xf32>
    %c0_73 = arith.constant 0 : index
    %c0_74 = arith.constant 0 : index
    %209 = vector.load %arg8[%c0_73, %c0_74] : memref<32x32xf32, #tpu.memory_space<vmem>>, vector<32x32xf32>
    %c0_75 = arith.constant 0 : index
    %c0_76 = arith.constant 0 : index
    %210 = vector.load %arg9[%c0_75, %c0_76] : memref<4x32xf32, #tpu.memory_space<vmem>>, vector<4x32xf32>
    %c0_77 = arith.constant 0 : index
    %c0_78 = arith.constant 0 : index
    %c0_79 = arith.constant 0 : index
    %211 = vector.load %arg10[%c0_77, %c0_78, %c0_79] : memref<32x1x1xf32, #tpu.memory_space<vmem>>, vector<32x1x1xf32>
    %c0_80 = arith.constant 0 : index
    %c0_81 = arith.constant 0 : index
    %212 = vector.load %arg11[%c0_80, %c0_81] : memref<1x32xf32, #tpu.memory_space<vmem>>, vector<1x32xf32>
    %cst_82 = arith.constant dense<0.000000e+00> : vector<8x32xf32>
    %213 = tpu.matmul %182, %208, %cst_82 {dimension_numbers = #tpu.dot_dimension_numbers<[1], [0], [0], [1], [0, 0, 1, 1], [], []>} : vector<8x32xf32>, vector<32x32xf32>, vector<8x32xf32> -> vector<8x32xf32>
    %cst_83 = arith.constant dense<0.000000e+00> : vector<32x8xf32>
    %214 = tpu.matmul %208, %182, %cst_83 {dimension_numbers = #tpu.dot_dimension_numbers<[0], [1], [1], [0], [0, 1, 1, 0], [], []>} : vector<32x32xf32>, vector<8x32xf32>, vector<32x8xf32> -> vector<32x8xf32>
    %cst_84 = arith.constant dense<0.000000e+00> : vector<32x8xf32>
    %215 = tpu.matmul %209, %182, %cst_84 {dimension_numbers = #tpu.dot_dimension_numbers<[0], [1], [1], [0], [0, 1, 1, 0], [], []>} : vector<32x32xf32>, vector<8x32xf32>, vector<32x8xf32> -> vector<32x8xf32>
    %cst_85 = arith.constant dense<0.000000e+00> : vector<8x4xf32>
    %216 = tpu.matmul %213, %210, %cst_85 {dimension_numbers = #tpu.dot_dimension_numbers<[1], [1], [0], [0], [0, 0, 1, 0], [], []>} : vector<8x32xf32>, vector<4x32xf32>, vector<8x4xf32> -> vector<8x4xf32>
    %cst_86 = arith.constant dense<0.000000e+00> : vector<4x8xf32>
    %217 = tpu.matmul %210, %215, %cst_86 {dimension_numbers = #tpu.dot_dimension_numbers<[1], [0], [0], [1], [0, 0, 1, 1], [], []>} : vector<4x32xf32>, vector<32x8xf32>, vector<4x8xf32> -> vector<4x8xf32>
    %218 = vector.shape_cast %214 : vector<32x8xf32> to vector<32x8x1xf32>
    %219 = vector.shape_cast %215 : vector<32x8xf32> to vector<32x1x8xf32>
    %220 = vector.broadcast %218 : vector<32x8x1xf32> to vector<32x8x8xf32>
    %221 = vector.broadcast %219 : vector<32x1x8xf32> to vector<32x8x8xf32>
    %222 = arith.addf %220, %221 : vector<32x8x8xf32>
    %223 = math.absf %222 : vector<32x8x8xf32>
    %224 = vector.broadcast %211 : vector<32x1x1xf32> to vector<32x8x8xf32>
    %225 = arith.mulf %223, %224 : vector<32x8x8xf32>
    %226 = tpu.iota {dimensions = array<i32: 0>} : vector<8x8xi32>
    %227 = tpu.iota {dimensions = array<i32: 1>} : vector<8x8xi32>
    %cst_87 = arith.constant 0.000000e+00 : f32
    %228 = vector.broadcast %cst_87 : f32 to vector<8x8xf32>
    %229 = arith.cmpf ogt, %200, %228 : vector<8x8xf32>
    %230 = arith.cmpi eq, %226, %227 : vector<8x8xi32>
    %231 = arith.ori %229, %230 : vector<8x8xi1>
    %232 = vector.extract_strided_slice %225 {offsets = [0, 0, 0], sizes = [8, 8, 8], strides = [1, 1, 1]} : vector<32x8x8xf32> to vector<8x8x8xf32>
    %cst_88 = arith.constant dense<0.000000e+00> : vector<8x8xf32>
    %233 = vector.multi_reduction <add>, %232, %cst_88 [0] : vector<8x8x8xf32> to vector<8x8xf32>
    %234 = vector.extract_strided_slice %216 {offsets = [0, 0], sizes = [8, 1], strides = [1, 1]} : vector<8x4xf32> to vector<8x1xf32>
    %235 = vector.extract_strided_slice %217 {offsets = [0, 0], sizes = [1, 8], strides = [1, 1]} : vector<4x8xf32> to vector<1x8xf32>
    %236 = vector.broadcast %234 : vector<8x1xf32> to vector<8x8xf32>
    %237 = vector.broadcast %235 : vector<1x8xf32> to vector<8x8xf32>
    %238 = arith.addf %236, %237 : vector<8x8xf32>
    %cst_89 = arith.constant 6.000000e-01 : f32
    %239 = vector.broadcast %cst_89 : f32 to vector<8x8xf32>
    %240 = arith.mulf %239, %238 : vector<8x8xf32>
    %cst_90 = arith.constant 4.000000e-01 : f32
    %241 = vector.broadcast %cst_90 : f32 to vector<8x8xf32>
    %242 = arith.mulf %241, %233 : vector<8x8xf32>
    %243 = arith.addf %240, %242 : vector<8x8xf32>
    %cst_91 = arith.constant -1.000000e+30 : f32
    %244 = vector.broadcast %cst_91 : f32 to vector<8x8xf32>
    %245 = arith.select %231, %243, %244 : vector<8x8xi1>, vector<8x8xf32>
    %cst_92 = arith.constant dense<0xFF800000> : vector<8xf32>
    %246 = vector.multi_reduction <maximumf>, %245, %cst_92 [1] : vector<8x8xf32> to vector<8xf32>
    %247 = vector.shape_cast %246 : vector<8xf32> to vector<8x1xf32>
    %248 = vector.broadcast %247 : vector<8x1xf32> to vector<8x8xf32>
    %249 = arith.subf %245, %248 : vector<8x8xf32>
    %250 = math.exp %249 : vector<8x8xf32>
    %cst_93 = arith.constant dense<0.000000e+00> : vector<8xf32>
    %251 = vector.multi_reduction <add>, %250, %cst_93 [1] : vector<8x8xf32> to vector<8xf32>
    %252 = vector.shape_cast %251 : vector<8xf32> to vector<8x1xf32>
    %253 = tpu.reciprocal %252 {approx = true} : vector<8x1xf32> -> vector<8x1xf32>
    %254 = vector.broadcast %253 : vector<8x1xf32> to vector<8x8xf32>
    %255 = arith.mulf %250, %254 : vector<8x8xf32>
    %256 = vector.extract_strided_slice %215 {offsets = [0, 0], sizes = [8, 8], strides = [1, 1]} : vector<32x8xf32> to vector<8x8xf32>
    %cst_94 = arith.constant dense<0.000000e+00> : vector<8x8xf32>
    %257 = tpu.matmul %255, %256, %cst_94 {dimension_numbers = #tpu.dot_dimension_numbers<[1], [1], [0], [0], [0, 0, 1, 0], [], []>} : vector<8x8xf32>, vector<8x8xf32>, vector<8x8xf32> -> vector<8x8xf32>
    %258 = vector.extract_strided_slice %225 {offsets = [8, 0, 0], sizes = [8, 8, 8], strides = [1, 1, 1]} : vector<32x8x8xf32> to vector<8x8x8xf32>
    %cst_95 = arith.constant dense<0.000000e+00> : vector<8x8xf32>
    %259 = vector.multi_reduction <add>, %258, %cst_95 [0] : vector<8x8x8xf32> to vector<8x8xf32>
    %260 = vector.extract_strided_slice %216 {offsets = [0, 1], sizes = [8, 1], strides = [1, 1]} : vector<8x4xf32> to vector<8x1xf32>
    %261 = vector.extract_strided_slice %217 {offsets = [1, 0], sizes = [1, 8], strides = [1, 1]} : vector<4x8xf32> to vector<1x8xf32>
    %262 = vector.broadcast %260 : vector<8x1xf32> to vector<8x8xf32>
    %263 = vector.broadcast %261 : vector<1x8xf32> to vector<8x8xf32>
    %264 = arith.addf %262, %263 : vector<8x8xf32>
    %cst_96 = arith.constant 6.000000e-01 : f32
    %265 = vector.broadcast %cst_96 : f32 to vector<8x8xf32>
    %266 = arith.mulf %265, %264 : vector<8x8xf32>
    %cst_97 = arith.constant 4.000000e-01 : f32
    %267 = vector.broadcast %cst_97 : f32 to vector<8x8xf32>
    %268 = arith.mulf %267, %259 : vector<8x8xf32>
    %269 = arith.addf %266, %268 : vector<8x8xf32>
    %cst_98 = arith.constant -1.000000e+30 : f32
    %270 = vector.broadcast %cst_98 : f32 to vector<8x8xf32>
    %271 = arith.select %231, %269, %270 : vector<8x8xi1>, vector<8x8xf32>
    %cst_99 = arith.constant dense<0xFF800000> : vector<8xf32>
    %272 = vector.multi_reduction <maximumf>, %271, %cst_99 [1] : vector<8x8xf32> to vector<8xf32>
    %273 = vector.shape_cast %272 : vector<8xf32> to vector<8x1xf32>
    %274 = vector.broadcast %273 : vector<8x1xf32> to vector<8x8xf32>
    %275 = arith.subf %271, %274 : vector<8x8xf32>
    %276 = math.exp %275 : vector<8x8xf32>
    %cst_100 = arith.constant dense<0.000000e+00> : vector<8xf32>
    %277 = vector.multi_reduction <add>, %276, %cst_100 [1] : vector<8x8xf32> to vector<8xf32>
    %278 = vector.shape_cast %277 : vector<8xf32> to vector<8x1xf32>
    %279 = tpu.reciprocal %278 {approx = true} : vector<8x1xf32> -> vector<8x1xf32>
    %280 = vector.broadcast %279 : vector<8x1xf32> to vector<8x8xf32>
    %281 = arith.mulf %276, %280 : vector<8x8xf32>
    %282 = vector.extract_strided_slice %215 {offsets = [8, 0], sizes = [8, 8], strides = [1, 1]} : vector<32x8xf32> to vector<8x8xf32>
    %cst_101 = arith.constant dense<0.000000e+00> : vector<8x8xf32>
    %283 = tpu.matmul %281, %282, %cst_101 {dimension_numbers = #tpu.dot_dimension_numbers<[1], [1], [0], [0], [0, 0, 1, 0], [], []>} : vector<8x8xf32>, vector<8x8xf32>, vector<8x8xf32> -> vector<8x8xf32>
    %284 = vector.extract_strided_slice %225 {offsets = [16, 0, 0], sizes = [8, 8, 8], strides = [1, 1, 1]} : vector<32x8x8xf32> to vector<8x8x8xf32>
    %cst_102 = arith.constant dense<0.000000e+00> : vector<8x8xf32>
    %285 = vector.multi_reduction <add>, %284, %cst_102 [0] : vector<8x8x8xf32> to vector<8x8xf32>
    %286 = vector.extract_strided_slice %216 {offsets = [0, 2], sizes = [8, 1], strides = [1, 1]} : vector<8x4xf32> to vector<8x1xf32>
    %287 = vector.extract_strided_slice %217 {offsets = [2, 0], sizes = [1, 8], strides = [1, 1]} : vector<4x8xf32> to vector<1x8xf32>
    %288 = vector.broadcast %286 : vector<8x1xf32> to vector<8x8xf32>
    %289 = vector.broadcast %287 : vector<1x8xf32> to vector<8x8xf32>
    %290 = arith.addf %288, %289 : vector<8x8xf32>
    %cst_103 = arith.constant 6.000000e-01 : f32
    %291 = vector.broadcast %cst_103 : f32 to vector<8x8xf32>
    %292 = arith.mulf %291, %290 : vector<8x8xf32>
    %cst_104 = arith.constant 4.000000e-01 : f32
    %293 = vector.broadcast %cst_104 : f32 to vector<8x8xf32>
    %294 = arith.mulf %293, %285 : vector<8x8xf32>
    %295 = arith.addf %292, %294 : vector<8x8xf32>
    %cst_105 = arith.constant -1.000000e+30 : f32
    %296 = vector.broadcast %cst_105 : f32 to vector<8x8xf32>
    %297 = arith.select %231, %295, %296 : vector<8x8xi1>, vector<8x8xf32>
    %cst_106 = arith.constant dense<0xFF800000> : vector<8xf32>
    %298 = vector.multi_reduction <maximumf>, %297, %cst_106 [1] : vector<8x8xf32> to vector<8xf32>
    %299 = vector.shape_cast %298 : vector<8xf32> to vector<8x1xf32>
    %300 = vector.broadcast %299 : vector<8x1xf32> to vector<8x8xf32>
    %301 = arith.subf %297, %300 : vector<8x8xf32>
    %302 = math.exp %301 : vector<8x8xf32>
    %cst_107 = arith.constant dense<0.000000e+00> : vector<8xf32>
    %303 = vector.multi_reduction <add>, %302, %cst_107 [1] : vector<8x8xf32> to vector<8xf32>
    %304 = vector.shape_cast %303 : vector<8xf32> to vector<8x1xf32>
    %305 = tpu.reciprocal %304 {approx = true} : vector<8x1xf32> -> vector<8x1xf32>
    %306 = vector.broadcast %305 : vector<8x1xf32> to vector<8x8xf32>
    %307 = arith.mulf %302, %306 : vector<8x8xf32>
    %308 = vector.extract_strided_slice %215 {offsets = [16, 0], sizes = [8, 8], strides = [1, 1]} : vector<32x8xf32> to vector<8x8xf32>
    %cst_108 = arith.constant dense<0.000000e+00> : vector<8x8xf32>
    %309 = tpu.matmul %307, %308, %cst_108 {dimension_numbers = #tpu.dot_dimension_numbers<[1], [1], [0], [0], [0, 0, 1, 0], [], []>} : vector<8x8xf32>, vector<8x8xf32>, vector<8x8xf32> -> vector<8x8xf32>
    %310 = vector.extract_strided_slice %225 {offsets = [24, 0, 0], sizes = [8, 8, 8], strides = [1, 1, 1]} : vector<32x8x8xf32> to vector<8x8x8xf32>
    %cst_109 = arith.constant dense<0.000000e+00> : vector<8x8xf32>
    %311 = vector.multi_reduction <add>, %310, %cst_109 [0] : vector<8x8x8xf32> to vector<8x8xf32>
    %312 = vector.extract_strided_slice %216 {offsets = [0, 3], sizes = [8, 1], strides = [1, 1]} : vector<8x4xf32> to vector<8x1xf32>
    %313 = vector.extract_strided_slice %217 {offsets = [3, 0], sizes = [1, 8], strides = [1, 1]} : vector<4x8xf32> to vector<1x8xf32>
    %314 = vector.broadcast %312 : vector<8x1xf32> to vector<8x8xf32>
    %315 = vector.broadcast %313 : vector<1x8xf32> to vector<8x8xf32>
    %316 = arith.addf %314, %315 : vector<8x8xf32>
    %cst_110 = arith.constant 6.000000e-01 : f32
    %317 = vector.broadcast %cst_110 : f32 to vector<8x8xf32>
    %318 = arith.mulf %317, %316 : vector<8x8xf32>
    %cst_111 = arith.constant 4.000000e-01 : f32
    %319 = vector.broadcast %cst_111 : f32 to vector<8x8xf32>
    %320 = arith.mulf %319, %311 : vector<8x8xf32>
    %321 = arith.addf %318, %320 : vector<8x8xf32>
    %cst_112 = arith.constant -1.000000e+30 : f32
    %322 = vector.broadcast %cst_112 : f32 to vector<8x8xf32>
    %323 = arith.select %231, %321, %322 : vector<8x8xi1>, vector<8x8xf32>
    %cst_113 = arith.constant dense<0xFF800000> : vector<8xf32>
    %324 = vector.multi_reduction <maximumf>, %323, %cst_113 [1] : vector<8x8xf32> to vector<8xf32>
    %325 = vector.shape_cast %324 : vector<8xf32> to vector<8x1xf32>
    %326 = vector.broadcast %325 : vector<8x1xf32> to vector<8x8xf32>
    %327 = arith.subf %323, %326 : vector<8x8xf32>
    %328 = math.exp %327 : vector<8x8xf32>
    %cst_114 = arith.constant dense<0.000000e+00> : vector<8xf32>
    %329 = vector.multi_reduction <add>, %328, %cst_114 [1] : vector<8x8xf32> to vector<8xf32>
    %330 = vector.shape_cast %329 : vector<8xf32> to vector<8x1xf32>
    %331 = tpu.reciprocal %330 {approx = true} : vector<8x1xf32> -> vector<8x1xf32>
    %332 = vector.broadcast %331 : vector<8x1xf32> to vector<8x8xf32>
    %333 = arith.mulf %328, %332 : vector<8x8xf32>
    %334 = vector.extract_strided_slice %215 {offsets = [24, 0], sizes = [8, 8], strides = [1, 1]} : vector<32x8xf32> to vector<8x8xf32>
    %cst_115 = arith.constant dense<0.000000e+00> : vector<8x8xf32>
    %335 = tpu.matmul %333, %334, %cst_115 {dimension_numbers = #tpu.dot_dimension_numbers<[1], [1], [0], [0], [0, 0, 1, 0], [], []>} : vector<8x8xf32>, vector<8x8xf32>, vector<8x8xf32> -> vector<8x8xf32>
    %336 = tpu.concatenate %257, %283, %309, %335 in 1 : vector<8x8xf32>, vector<8x8xf32>, vector<8x8xf32>, vector<8x8xf32> -> vector<8x32xf32>
    %337 = vector.broadcast %212 : vector<1x32xf32> to vector<8x32xf32>
    %338 = arith.addf %336, %337 : vector<8x32xf32>
    %cst_116 = arith.constant 0.000000e+00 : f32
    %339 = vector.broadcast %cst_116 : f32 to vector<8x32xf32>
    %340 = arith.maximumf %338, %339 : vector<8x32xf32>
    %cst_117 = arith.constant dense<0.000000e+00> : vector<8xf32>
    %341 = vector.multi_reduction <add>, %200, %cst_117 [1] : vector<8x8xf32> to vector<8xf32>
    %342 = vector.shape_cast %341 : vector<8xf32> to vector<8x1xf32>
    %cst_118 = arith.constant 0.000000e+00 : f32
    %343 = vector.broadcast %cst_118 : f32 to vector<8x1xf32>
    %344 = arith.cmpf ogt, %342, %343 : vector<8x1xf32>
    %cst_119 = arith.constant 1.000000e+00 : f32
    %345 = vector.broadcast %cst_119 : f32 to vector<8x1xf32>
    %346 = arith.maximumf %342, %345 : vector<8x1xf32>
    %347 = tpu.reciprocal %346 {approx = true} : vector<8x1xf32> -> vector<8x1xf32>
    %cst_120 = arith.constant 0.000000e+00 : f32
    %348 = vector.broadcast %cst_120 : f32 to vector<8x1xf32>
    %349 = arith.select %344, %347, %348 : vector<8x1xi1>, vector<8x1xf32>
    %cst_121 = arith.constant dense<0.000000e+00> : vector<8x32xf32>
    %350 = tpu.matmul %200, %340, %cst_121 {dimension_numbers = #tpu.dot_dimension_numbers<[1], [0], [0], [1], [0, 0, 1, 1], [], []>} : vector<8x8xf32>, vector<8x32xf32>, vector<8x32xf32> -> vector<8x32xf32>
    %351 = vector.broadcast %349 : vector<8x1xf32> to vector<8x32xf32>
    %352 = arith.mulf %351, %350 : vector<8x32xf32>
    %353 = arith.subf %340, %352 : vector<8x32xf32>
    %354 = math.absf %353 : vector<8x32xf32>
    %cst_122 = arith.constant 1.000000e+00 : f32
    %355 = vector.broadcast %cst_122 : f32 to vector<1x32xf32>
    %cst_123 = arith.constant dense<0.000000e+00> : vector<1x8xf32>
    %356 = tpu.matmul %355, %354, %cst_123 {dimension_numbers = #tpu.dot_dimension_numbers<[1], [1], [0], [0], [0, 0, 1, 0], [], []>} : vector<1x32xf32>, vector<8x32xf32>, vector<1x8xf32> -> vector<1x8xf32>
    %cst_124 = arith.constant 1.000000e+00 : f32
    %357 = vector.broadcast %cst_124 : f32 to vector<32x1xf32>
    %cst_125 = arith.constant dense<0.000000e+00> : vector<8x1xf32>
    %358 = tpu.matmul %354, %357, %cst_125 {dimension_numbers = #tpu.dot_dimension_numbers<[1], [0], [0], [1], [0, 0, 1, 1], [], []>} : vector<8x32xf32>, vector<32x1xf32>, vector<8x1xf32> -> vector<8x1xf32>
    %359 = tpu.iota {dimensions = array<i32: 0>} : vector<8x8xi32>
    %360 = tpu.iota {dimensions = array<i32: 1>} : vector<8x8xi32>
    %361 = vector.broadcast %358 : vector<8x1xf32> to vector<8x8xf32>
    %362 = vector.broadcast %356 : vector<1x8xf32> to vector<8x8xf32>
    %363 = arith.cmpf ogt, %361, %362 : vector<8x8xf32>
    %364 = vector.broadcast %358 : vector<8x1xf32> to vector<8x8xf32>
    %365 = vector.broadcast %356 : vector<1x8xf32> to vector<8x8xf32>
    %366 = arith.cmpf oeq, %364, %365 : vector<8x8xf32>
    %367 = arith.cmpi slt, %359, %360 : vector<8x8xi32>
    %368 = arith.andi %366, %367 : vector<8x8xi1>
    %369 = arith.ori %363, %368 : vector<8x8xi1>
    %370 = arith.extui %369 : vector<8x8xi1> to vector<8x8xi32>
    %371 = arith.sitofp %370 : vector<8x8xi32> to vector<8x8xf32>
    %cst_126 = arith.constant dense<0.000000e+00> : vector<8xf32>
    %372 = vector.multi_reduction <add>, %371, %cst_126 [0] : vector<8x8xf32> to vector<8xf32>
    %373 = vector.shape_cast %372 : vector<8xf32> to vector<1x8xf32>
    %374 = tpu.iota {dimensions = array<i32: 0>} : vector<4x8xi32>
    %375 = arith.sitofp %374 : vector<4x8xi32> to vector<4x8xf32>
    %376 = vector.broadcast %373 : vector<1x8xf32> to vector<4x8xf32>
    %377 = arith.cmpf oeq, %376, %375 : vector<4x8xf32>
    %378 = arith.extui %377 : vector<4x8xi1> to vector<4x8xi32>
    %379 = arith.sitofp %378 : vector<4x8xi32> to vector<4x8xf32>
    %cst_127 = arith.constant dense<0.000000e+00> : vector<4x32xf32>
    %380 = tpu.matmul %379, %340, %cst_127 {dimension_numbers = #tpu.dot_dimension_numbers<[1], [0], [0], [1], [0, 0, 1, 1], [], []>} : vector<4x8xf32>, vector<8x32xf32>, vector<4x32xf32> -> vector<4x32xf32>
    %cst_128 = arith.constant dense<0.000000e+00> : vector<4x1xf32>
    %381 = tpu.matmul %379, %356, %cst_128 {dimension_numbers = #tpu.dot_dimension_numbers<[1], [1], [0], [0], [0, 0, 1, 0], [], []>} : vector<4x8xf32>, vector<1x8xf32>, vector<4x1xf32> -> vector<4x1xf32>
    %382 = arith.negf %381 : vector<4x1xf32>
    %383 = math.exp %382 : vector<4x1xf32>
    %cst_129 = arith.constant 1.000000e+00 : f32
    %384 = vector.broadcast %cst_129 : f32 to vector<4x1xf32>
    %385 = arith.addf %384, %383 : vector<4x1xf32>
    %386 = arith.divf %384, %385 : vector<4x1xf32>
    %387 = vector.broadcast %386 : vector<4x1xf32> to vector<4x32xf32>
    %388 = arith.mulf %380, %387 : vector<4x32xf32>
    %cst_130 = arith.constant dense<0.000000e+00> : vector<4x8xf32>
    %389 = tpu.matmul %379, %200, %cst_130 {dimension_numbers = #tpu.dot_dimension_numbers<[1], [0], [0], [1], [0, 0, 1, 1], [], []>} : vector<4x8xf32>, vector<8x8xf32>, vector<4x8xf32> -> vector<4x8xf32>
    %cst_131 = arith.constant dense<0.000000e+00> : vector<4x4xf32>
    %390 = tpu.matmul %389, %379, %cst_131 {dimension_numbers = #tpu.dot_dimension_numbers<[1], [1], [0], [0], [0, 0, 1, 0], [], []>} : vector<4x8xf32>, vector<4x8xf32>, vector<4x4xf32> -> vector<4x4xf32>
    %cst_132 = arith.constant dense<0.000000e+00> : vector<4x4xf32>
    %391 = tpu.matmul %388, %388, %cst_132 {dimension_numbers = #tpu.dot_dimension_numbers<[1], [1], [0], [0], [0, 0, 1, 0], [], []>} : vector<4x32xf32>, vector<4x32xf32>, vector<4x4xf32> -> vector<4x4xf32>
    %cst_133 = arith.constant 0.176776692 : f32
    %392 = vector.broadcast %cst_133 : f32 to vector<4x4xf32>
    %393 = arith.mulf %391, %392 : vector<4x4xf32>
    %cst_134 = arith.constant dense<0xFF800000> : vector<4xf32>
    %394 = vector.multi_reduction <maximumf>, %393, %cst_134 [1] : vector<4x4xf32> to vector<4xf32>
    %395 = vector.shape_cast %394 : vector<4xf32> to vector<4x1xf32>
    %396 = vector.broadcast %395 : vector<4x1xf32> to vector<4x4xf32>
    %397 = arith.subf %393, %396 : vector<4x4xf32>
    %398 = math.exp %397 : vector<4x4xf32>
    %cst_135 = arith.constant dense<0.000000e+00> : vector<4xf32>
    %399 = vector.multi_reduction <add>, %398, %cst_135 [1] : vector<4x4xf32> to vector<4xf32>
    %400 = vector.shape_cast %399 : vector<4xf32> to vector<4x1xf32>
    %401 = tpu.reciprocal %400 {approx = true} : vector<4x1xf32> -> vector<4x1xf32>
    %402 = vector.broadcast %401 : vector<4x1xf32> to vector<4x4xf32>
    %403 = arith.mulf %398, %402 : vector<4x4xf32>
    %cst_136 = arith.constant 1.000000e+00 : f32
    %404 = vector.broadcast %cst_136 : f32 to vector<4x4xf32>
    %405 = arith.mulf %404, %390 : vector<4x4xf32>
    %406 = arith.addf %403, %405 : vector<4x4xf32>
    %cst_137 = arith.constant dense<0.000000e+00> : vector<32xf32>
    %407 = vector.multi_reduction <add>, %388, %cst_137 [0] : vector<4x32xf32> to vector<32xf32>
    %408 = vector.shape_cast %407 : vector<32xf32> to vector<1x32xf32>
    %cst_138 = arith.constant 2.500000e-01 : f32
    %409 = vector.broadcast %cst_138 : f32 to vector<1x32xf32>
    %410 = arith.mulf %408, %409 : vector<1x32xf32>
    %cst_139 = arith.constant dense<0xFF800000> : vector<32xf32>
    %411 = vector.multi_reduction <maximumf>, %388, %cst_139 [0] : vector<4x32xf32> to vector<32xf32>
    %412 = vector.shape_cast %411 : vector<32xf32> to vector<1x32xf32>
    %413 = tpu.concatenate %410, %412 in 1 : vector<1x32xf32>, vector<1x32xf32> -> vector<1x64xf32>
    %c0_140 = arith.constant 0 : index
    %c0_141 = arith.constant 0 : index
    %414 = vector.load %arg12[%c0_140, %c0_141] : memref<32x32xf32, #tpu.memory_space<vmem>>, vector<32x32xf32>
    %c0_142 = arith.constant 0 : index
    %c0_143 = arith.constant 0 : index
    %415 = vector.load %arg13[%c0_142, %c0_143] : memref<32x32xf32, #tpu.memory_space<vmem>>, vector<32x32xf32>
    %c0_144 = arith.constant 0 : index
    %c0_145 = arith.constant 0 : index
    %416 = vector.load %arg14[%c0_144, %c0_145] : memref<4x32xf32, #tpu.memory_space<vmem>>, vector<4x32xf32>
    %c0_146 = arith.constant 0 : index
    %c0_147 = arith.constant 0 : index
    %c0_148 = arith.constant 0 : index
    %417 = vector.load %arg15[%c0_146, %c0_147, %c0_148] : memref<32x1x1xf32, #tpu.memory_space<vmem>>, vector<32x1x1xf32>
    %c0_149 = arith.constant 0 : index
    %c0_150 = arith.constant 0 : index
    %418 = vector.load %arg16[%c0_149, %c0_150] : memref<1x32xf32, #tpu.memory_space<vmem>>, vector<1x32xf32>
    %cst_151 = arith.constant dense<0.000000e+00> : vector<4x32xf32>
    %419 = tpu.matmul %388, %414, %cst_151 {dimension_numbers = #tpu.dot_dimension_numbers<[1], [0], [0], [1], [0, 0, 1, 1], [], []>} : vector<4x32xf32>, vector<32x32xf32>, vector<4x32xf32> -> vector<4x32xf32>
    %cst_152 = arith.constant dense<0.000000e+00> : vector<32x4xf32>
    %420 = tpu.matmul %414, %388, %cst_152 {dimension_numbers = #tpu.dot_dimension_numbers<[0], [1], [1], [0], [0, 1, 1, 0], [], []>} : vector<32x32xf32>, vector<4x32xf32>, vector<32x4xf32> -> vector<32x4xf32>
    %cst_153 = arith.constant dense<0.000000e+00> : vector<32x4xf32>
    %421 = tpu.matmul %415, %388, %cst_153 {dimension_numbers = #tpu.dot_dimension_numbers<[0], [1], [1], [0], [0, 1, 1, 0], [], []>} : vector<32x32xf32>, vector<4x32xf32>, vector<32x4xf32> -> vector<32x4xf32>
    %cst_154 = arith.constant dense<0.000000e+00> : vector<4x4xf32>
    %422 = tpu.matmul %419, %416, %cst_154 {dimension_numbers = #tpu.dot_dimension_numbers<[1], [1], [0], [0], [0, 0, 1, 0], [], []>} : vector<4x32xf32>, vector<4x32xf32>, vector<4x4xf32> -> vector<4x4xf32>
    %cst_155 = arith.constant dense<0.000000e+00> : vector<4x4xf32>
    %423 = tpu.matmul %416, %421, %cst_155 {dimension_numbers = #tpu.dot_dimension_numbers<[1], [0], [0], [1], [0, 0, 1, 1], [], []>} : vector<4x32xf32>, vector<32x4xf32>, vector<4x4xf32> -> vector<4x4xf32>
    %424 = vector.shape_cast %420 : vector<32x4xf32> to vector<32x4x1xf32>
    %425 = vector.shape_cast %421 : vector<32x4xf32> to vector<32x1x4xf32>
    %426 = vector.broadcast %424 : vector<32x4x1xf32> to vector<32x4x4xf32>
    %427 = vector.broadcast %425 : vector<32x1x4xf32> to vector<32x4x4xf32>
    %428 = arith.addf %426, %427 : vector<32x4x4xf32>
    %429 = math.absf %428 : vector<32x4x4xf32>
    %430 = vector.broadcast %417 : vector<32x1x1xf32> to vector<32x4x4xf32>
    %431 = arith.mulf %429, %430 : vector<32x4x4xf32>
    %432 = tpu.iota {dimensions = array<i32: 0>} : vector<4x4xi32>
    %433 = tpu.iota {dimensions = array<i32: 1>} : vector<4x4xi32>
    %cst_156 = arith.constant 0.000000e+00 : f32
    %434 = vector.broadcast %cst_156 : f32 to vector<4x4xf32>
    %435 = arith.cmpf ogt, %406, %434 : vector<4x4xf32>
    %436 = arith.cmpi eq, %432, %433 : vector<4x4xi32>
    %437 = arith.ori %435, %436 : vector<4x4xi1>
    %438 = vector.extract_strided_slice %431 {offsets = [0, 0, 0], sizes = [8, 4, 4], strides = [1, 1, 1]} : vector<32x4x4xf32> to vector<8x4x4xf32>
    %cst_157 = arith.constant dense<0.000000e+00> : vector<4x4xf32>
    %439 = vector.multi_reduction <add>, %438, %cst_157 [0] : vector<8x4x4xf32> to vector<4x4xf32>
    %440 = vector.extract_strided_slice %422 {offsets = [0, 0], sizes = [4, 1], strides = [1, 1]} : vector<4x4xf32> to vector<4x1xf32>
    %441 = vector.extract_strided_slice %423 {offsets = [0, 0], sizes = [1, 4], strides = [1, 1]} : vector<4x4xf32> to vector<1x4xf32>
    %442 = vector.broadcast %440 : vector<4x1xf32> to vector<4x4xf32>
    %443 = vector.broadcast %441 : vector<1x4xf32> to vector<4x4xf32>
    %444 = arith.addf %442, %443 : vector<4x4xf32>
    %cst_158 = arith.constant 6.000000e-01 : f32
    %445 = vector.broadcast %cst_158 : f32 to vector<4x4xf32>
    %446 = arith.mulf %445, %444 : vector<4x4xf32>
    %cst_159 = arith.constant 4.000000e-01 : f32
    %447 = vector.broadcast %cst_159 : f32 to vector<4x4xf32>
    %448 = arith.mulf %447, %439 : vector<4x4xf32>
    %449 = arith.addf %446, %448 : vector<4x4xf32>
    %cst_160 = arith.constant -1.000000e+30 : f32
    %450 = vector.broadcast %cst_160 : f32 to vector<4x4xf32>
    %451 = arith.select %437, %449, %450 : vector<4x4xi1>, vector<4x4xf32>
    %cst_161 = arith.constant dense<0xFF800000> : vector<4xf32>
    %452 = vector.multi_reduction <maximumf>, %451, %cst_161 [1] : vector<4x4xf32> to vector<4xf32>
    %453 = vector.shape_cast %452 : vector<4xf32> to vector<4x1xf32>
    %454 = vector.broadcast %453 : vector<4x1xf32> to vector<4x4xf32>
    %455 = arith.subf %451, %454 : vector<4x4xf32>
    %456 = math.exp %455 : vector<4x4xf32>
    %cst_162 = arith.constant dense<0.000000e+00> : vector<4xf32>
    %457 = vector.multi_reduction <add>, %456, %cst_162 [1] : vector<4x4xf32> to vector<4xf32>
    %458 = vector.shape_cast %457 : vector<4xf32> to vector<4x1xf32>
    %459 = tpu.reciprocal %458 {approx = true} : vector<4x1xf32> -> vector<4x1xf32>
    %460 = vector.broadcast %459 : vector<4x1xf32> to vector<4x4xf32>
    %461 = arith.mulf %456, %460 : vector<4x4xf32>
    %462 = vector.extract_strided_slice %421 {offsets = [0, 0], sizes = [8, 4], strides = [1, 1]} : vector<32x4xf32> to vector<8x4xf32>
    %cst_163 = arith.constant dense<0.000000e+00> : vector<4x8xf32>
    %463 = tpu.matmul %461, %462, %cst_163 {dimension_numbers = #tpu.dot_dimension_numbers<[1], [1], [0], [0], [0, 0, 1, 0], [], []>} : vector<4x4xf32>, vector<8x4xf32>, vector<4x8xf32> -> vector<4x8xf32>
    %464 = vector.extract_strided_slice %431 {offsets = [8, 0, 0], sizes = [8, 4, 4], strides = [1, 1, 1]} : vector<32x4x4xf32> to vector<8x4x4xf32>
    %cst_164 = arith.constant dense<0.000000e+00> : vector<4x4xf32>
    %465 = vector.multi_reduction <add>, %464, %cst_164 [0] : vector<8x4x4xf32> to vector<4x4xf32>
    %466 = vector.extract_strided_slice %422 {offsets = [0, 1], sizes = [4, 1], strides = [1, 1]} : vector<4x4xf32> to vector<4x1xf32>
    %467 = vector.extract_strided_slice %423 {offsets = [1, 0], sizes = [1, 4], strides = [1, 1]} : vector<4x4xf32> to vector<1x4xf32>
    %468 = vector.broadcast %466 : vector<4x1xf32> to vector<4x4xf32>
    %469 = vector.broadcast %467 : vector<1x4xf32> to vector<4x4xf32>
    %470 = arith.addf %468, %469 : vector<4x4xf32>
    %cst_165 = arith.constant 6.000000e-01 : f32
    %471 = vector.broadcast %cst_165 : f32 to vector<4x4xf32>
    %472 = arith.mulf %471, %470 : vector<4x4xf32>
    %cst_166 = arith.constant 4.000000e-01 : f32
    %473 = vector.broadcast %cst_166 : f32 to vector<4x4xf32>
    %474 = arith.mulf %473, %465 : vector<4x4xf32>
    %475 = arith.addf %472, %474 : vector<4x4xf32>
    %cst_167 = arith.constant -1.000000e+30 : f32
    %476 = vector.broadcast %cst_167 : f32 to vector<4x4xf32>
    %477 = arith.select %437, %475, %476 : vector<4x4xi1>, vector<4x4xf32>
    %cst_168 = arith.constant dense<0xFF800000> : vector<4xf32>
    %478 = vector.multi_reduction <maximumf>, %477, %cst_168 [1] : vector<4x4xf32> to vector<4xf32>
    %479 = vector.shape_cast %478 : vector<4xf32> to vector<4x1xf32>
    %480 = vector.broadcast %479 : vector<4x1xf32> to vector<4x4xf32>
    %481 = arith.subf %477, %480 : vector<4x4xf32>
    %482 = math.exp %481 : vector<4x4xf32>
    %cst_169 = arith.constant dense<0.000000e+00> : vector<4xf32>
    %483 = vector.multi_reduction <add>, %482, %cst_169 [1] : vector<4x4xf32> to vector<4xf32>
    %484 = vector.shape_cast %483 : vector<4xf32> to vector<4x1xf32>
    %485 = tpu.reciprocal %484 {approx = true} : vector<4x1xf32> -> vector<4x1xf32>
    %486 = vector.broadcast %485 : vector<4x1xf32> to vector<4x4xf32>
    %487 = arith.mulf %482, %486 : vector<4x4xf32>
    %488 = vector.extract_strided_slice %421 {offsets = [8, 0], sizes = [8, 4], strides = [1, 1]} : vector<32x4xf32> to vector<8x4xf32>
    %cst_170 = arith.constant dense<0.000000e+00> : vector<4x8xf32>
    %489 = tpu.matmul %487, %488, %cst_170 {dimension_numbers = #tpu.dot_dimension_numbers<[1], [1], [0], [0], [0, 0, 1, 0], [], []>} : vector<4x4xf32>, vector<8x4xf32>, vector<4x8xf32> -> vector<4x8xf32>
    %490 = vector.extract_strided_slice %431 {offsets = [16, 0, 0], sizes = [8, 4, 4], strides = [1, 1, 1]} : vector<32x4x4xf32> to vector<8x4x4xf32>
    %cst_171 = arith.constant dense<0.000000e+00> : vector<4x4xf32>
    %491 = vector.multi_reduction <add>, %490, %cst_171 [0] : vector<8x4x4xf32> to vector<4x4xf32>
    %492 = vector.extract_strided_slice %422 {offsets = [0, 2], sizes = [4, 1], strides = [1, 1]} : vector<4x4xf32> to vector<4x1xf32>
    %493 = vector.extract_strided_slice %423 {offsets = [2, 0], sizes = [1, 4], strides = [1, 1]} : vector<4x4xf32> to vector<1x4xf32>
    %494 = vector.broadcast %492 : vector<4x1xf32> to vector<4x4xf32>
    %495 = vector.broadcast %493 : vector<1x4xf32> to vector<4x4xf32>
    %496 = arith.addf %494, %495 : vector<4x4xf32>
    %cst_172 = arith.constant 6.000000e-01 : f32
    %497 = vector.broadcast %cst_172 : f32 to vector<4x4xf32>
    %498 = arith.mulf %497, %496 : vector<4x4xf32>
    %cst_173 = arith.constant 4.000000e-01 : f32
    %499 = vector.broadcast %cst_173 : f32 to vector<4x4xf32>
    %500 = arith.mulf %499, %491 : vector<4x4xf32>
    %501 = arith.addf %498, %500 : vector<4x4xf32>
    %cst_174 = arith.constant -1.000000e+30 : f32
    %502 = vector.broadcast %cst_174 : f32 to vector<4x4xf32>
    %503 = arith.select %437, %501, %502 : vector<4x4xi1>, vector<4x4xf32>
    %cst_175 = arith.constant dense<0xFF800000> : vector<4xf32>
    %504 = vector.multi_reduction <maximumf>, %503, %cst_175 [1] : vector<4x4xf32> to vector<4xf32>
    %505 = vector.shape_cast %504 : vector<4xf32> to vector<4x1xf32>
    %506 = vector.broadcast %505 : vector<4x1xf32> to vector<4x4xf32>
    %507 = arith.subf %503, %506 : vector<4x4xf32>
    %508 = math.exp %507 : vector<4x4xf32>
    %cst_176 = arith.constant dense<0.000000e+00> : vector<4xf32>
    %509 = vector.multi_reduction <add>, %508, %cst_176 [1] : vector<4x4xf32> to vector<4xf32>
    %510 = vector.shape_cast %509 : vector<4xf32> to vector<4x1xf32>
    %511 = tpu.reciprocal %510 {approx = true} : vector<4x1xf32> -> vector<4x1xf32>
    %512 = vector.broadcast %511 : vector<4x1xf32> to vector<4x4xf32>
    %513 = arith.mulf %508, %512 : vector<4x4xf32>
    %514 = vector.extract_strided_slice %421 {offsets = [16, 0], sizes = [8, 4], strides = [1, 1]} : vector<32x4xf32> to vector<8x4xf32>
    %cst_177 = arith.constant dense<0.000000e+00> : vector<4x8xf32>
    %515 = tpu.matmul %513, %514, %cst_177 {dimension_numbers = #tpu.dot_dimension_numbers<[1], [1], [0], [0], [0, 0, 1, 0], [], []>} : vector<4x4xf32>, vector<8x4xf32>, vector<4x8xf32> -> vector<4x8xf32>
    %516 = vector.extract_strided_slice %431 {offsets = [24, 0, 0], sizes = [8, 4, 4], strides = [1, 1, 1]} : vector<32x4x4xf32> to vector<8x4x4xf32>
    %cst_178 = arith.constant dense<0.000000e+00> : vector<4x4xf32>
    %517 = vector.multi_reduction <add>, %516, %cst_178 [0] : vector<8x4x4xf32> to vector<4x4xf32>
    %518 = vector.extract_strided_slice %422 {offsets = [0, 3], sizes = [4, 1], strides = [1, 1]} : vector<4x4xf32> to vector<4x1xf32>
    %519 = vector.extract_strided_slice %423 {offsets = [3, 0], sizes = [1, 4], strides = [1, 1]} : vector<4x4xf32> to vector<1x4xf32>
    %520 = vector.broadcast %518 : vector<4x1xf32> to vector<4x4xf32>
    %521 = vector.broadcast %519 : vector<1x4xf32> to vector<4x4xf32>
    %522 = arith.addf %520, %521 : vector<4x4xf32>
    %cst_179 = arith.constant 6.000000e-01 : f32
    %523 = vector.broadcast %cst_179 : f32 to vector<4x4xf32>
    %524 = arith.mulf %523, %522 : vector<4x4xf32>
    %cst_180 = arith.constant 4.000000e-01 : f32
    %525 = vector.broadcast %cst_180 : f32 to vector<4x4xf32>
    %526 = arith.mulf %525, %517 : vector<4x4xf32>
    %527 = arith.addf %524, %526 : vector<4x4xf32>
    %cst_181 = arith.constant -1.000000e+30 : f32
    %528 = vector.broadcast %cst_181 : f32 to vector<4x4xf32>
    %529 = arith.select %437, %527, %528 : vector<4x4xi1>, vector<4x4xf32>
    %cst_182 = arith.constant dense<0xFF800000> : vector<4xf32>
    %530 = vector.multi_reduction <maximumf>, %529, %cst_182 [1] : vector<4x4xf32> to vector<4xf32>
    %531 = vector.shape_cast %530 : vector<4xf32> to vector<4x1xf32>
    %532 = vector.broadcast %531 : vector<4x1xf32> to vector<4x4xf32>
    %533 = arith.subf %529, %532 : vector<4x4xf32>
    %534 = math.exp %533 : vector<4x4xf32>
    %cst_183 = arith.constant dense<0.000000e+00> : vector<4xf32>
    %535 = vector.multi_reduction <add>, %534, %cst_183 [1] : vector<4x4xf32> to vector<4xf32>
    %536 = vector.shape_cast %535 : vector<4xf32> to vector<4x1xf32>
    %537 = tpu.reciprocal %536 {approx = true} : vector<4x1xf32> -> vector<4x1xf32>
    %538 = vector.broadcast %537 : vector<4x1xf32> to vector<4x4xf32>
    %539 = arith.mulf %534, %538 : vector<4x4xf32>
    %540 = vector.extract_strided_slice %421 {offsets = [24, 0], sizes = [8, 4], strides = [1, 1]} : vector<32x4xf32> to vector<8x4xf32>
    %cst_184 = arith.constant dense<0.000000e+00> : vector<4x8xf32>
    %541 = tpu.matmul %539, %540, %cst_184 {dimension_numbers = #tpu.dot_dimension_numbers<[1], [1], [0], [0], [0, 0, 1, 0], [], []>} : vector<4x4xf32>, vector<8x4xf32>, vector<4x8xf32> -> vector<4x8xf32>
    %542 = tpu.concatenate %463, %489, %515, %541 in 1 : vector<4x8xf32>, vector<4x8xf32>, vector<4x8xf32>, vector<4x8xf32> -> vector<4x32xf32>
    %543 = vector.broadcast %418 : vector<1x32xf32> to vector<4x32xf32>
    %544 = arith.addf %542, %543 : vector<4x32xf32>
    %cst_185 = arith.constant 0.000000e+00 : f32
    %545 = vector.broadcast %cst_185 : f32 to vector<4x32xf32>
    %546 = arith.maximumf %544, %545 : vector<4x32xf32>
    %cst_186 = arith.constant dense<0.000000e+00> : vector<4xf32>
    %547 = vector.multi_reduction <add>, %406, %cst_186 [1] : vector<4x4xf32> to vector<4xf32>
    %548 = vector.shape_cast %547 : vector<4xf32> to vector<4x1xf32>
    %cst_187 = arith.constant 0.000000e+00 : f32
    %549 = vector.broadcast %cst_187 : f32 to vector<4x1xf32>
    %550 = arith.cmpf ogt, %548, %549 : vector<4x1xf32>
    %cst_188 = arith.constant 1.000000e+00 : f32
    %551 = vector.broadcast %cst_188 : f32 to vector<4x1xf32>
    %552 = arith.maximumf %548, %551 : vector<4x1xf32>
    %553 = tpu.reciprocal %552 {approx = true} : vector<4x1xf32> -> vector<4x1xf32>
    %cst_189 = arith.constant 0.000000e+00 : f32
    %554 = vector.broadcast %cst_189 : f32 to vector<4x1xf32>
    %555 = arith.select %550, %553, %554 : vector<4x1xi1>, vector<4x1xf32>
    %cst_190 = arith.constant dense<0.000000e+00> : vector<4x32xf32>
    %556 = tpu.matmul %406, %546, %cst_190 {dimension_numbers = #tpu.dot_dimension_numbers<[1], [0], [0], [1], [0, 0, 1, 1], [], []>} : vector<4x4xf32>, vector<4x32xf32>, vector<4x32xf32> -> vector<4x32xf32>
    %557 = vector.broadcast %555 : vector<4x1xf32> to vector<4x32xf32>
    %558 = arith.mulf %557, %556 : vector<4x32xf32>
    %559 = arith.subf %546, %558 : vector<4x32xf32>
    %560 = math.absf %559 : vector<4x32xf32>
    %cst_191 = arith.constant 1.000000e+00 : f32
    %561 = vector.broadcast %cst_191 : f32 to vector<1x32xf32>
    %cst_192 = arith.constant dense<0.000000e+00> : vector<1x4xf32>
    %562 = tpu.matmul %561, %560, %cst_192 {dimension_numbers = #tpu.dot_dimension_numbers<[1], [1], [0], [0], [0, 0, 1, 0], [], []>} : vector<1x32xf32>, vector<4x32xf32>, vector<1x4xf32> -> vector<1x4xf32>
    %cst_193 = arith.constant 1.000000e+00 : f32
    %563 = vector.broadcast %cst_193 : f32 to vector<32x1xf32>
    %cst_194 = arith.constant dense<0.000000e+00> : vector<4x1xf32>
    %564 = tpu.matmul %560, %563, %cst_194 {dimension_numbers = #tpu.dot_dimension_numbers<[1], [0], [0], [1], [0, 0, 1, 1], [], []>} : vector<4x32xf32>, vector<32x1xf32>, vector<4x1xf32> -> vector<4x1xf32>
    %565 = tpu.iota {dimensions = array<i32: 0>} : vector<4x4xi32>
    %566 = tpu.iota {dimensions = array<i32: 1>} : vector<4x4xi32>
    %567 = vector.broadcast %564 : vector<4x1xf32> to vector<4x4xf32>
    %568 = vector.broadcast %562 : vector<1x4xf32> to vector<4x4xf32>
    %569 = arith.cmpf ogt, %567, %568 : vector<4x4xf32>
    %570 = vector.broadcast %564 : vector<4x1xf32> to vector<4x4xf32>
    %571 = vector.broadcast %562 : vector<1x4xf32> to vector<4x4xf32>
    %572 = arith.cmpf oeq, %570, %571 : vector<4x4xf32>
    %573 = arith.cmpi slt, %565, %566 : vector<4x4xi32>
    %574 = arith.andi %572, %573 : vector<4x4xi1>
    %575 = arith.ori %569, %574 : vector<4x4xi1>
    %576 = arith.extui %575 : vector<4x4xi1> to vector<4x4xi32>
    %577 = arith.sitofp %576 : vector<4x4xi32> to vector<4x4xf32>
    %cst_195 = arith.constant dense<0.000000e+00> : vector<4xf32>
    %578 = vector.multi_reduction <add>, %577, %cst_195 [0] : vector<4x4xf32> to vector<4xf32>
    %579 = vector.shape_cast %578 : vector<4xf32> to vector<1x4xf32>
    %580 = tpu.iota {dimensions = array<i32: 0>} : vector<2x4xi32>
    %581 = arith.sitofp %580 : vector<2x4xi32> to vector<2x4xf32>
    %582 = vector.broadcast %579 : vector<1x4xf32> to vector<2x4xf32>
    %583 = arith.cmpf oeq, %582, %581 : vector<2x4xf32>
    %584 = arith.extui %583 : vector<2x4xi1> to vector<2x4xi32>
    %585 = arith.sitofp %584 : vector<2x4xi32> to vector<2x4xf32>
    %cst_196 = arith.constant dense<0.000000e+00> : vector<2x32xf32>
    %586 = tpu.matmul %585, %546, %cst_196 {dimension_numbers = #tpu.dot_dimension_numbers<[1], [0], [0], [1], [0, 0, 1, 1], [], []>} : vector<2x4xf32>, vector<4x32xf32>, vector<2x32xf32> -> vector<2x32xf32>
    %cst_197 = arith.constant dense<0.000000e+00> : vector<2x1xf32>
    %587 = tpu.matmul %585, %562, %cst_197 {dimension_numbers = #tpu.dot_dimension_numbers<[1], [1], [0], [0], [0, 0, 1, 0], [], []>} : vector<2x4xf32>, vector<1x4xf32>, vector<2x1xf32> -> vector<2x1xf32>
    %588 = arith.negf %587 : vector<2x1xf32>
    %589 = math.exp %588 : vector<2x1xf32>
    %cst_198 = arith.constant 1.000000e+00 : f32
    %590 = vector.broadcast %cst_198 : f32 to vector<2x1xf32>
    %591 = arith.addf %590, %589 : vector<2x1xf32>
    %592 = arith.divf %590, %591 : vector<2x1xf32>
    %593 = vector.broadcast %592 : vector<2x1xf32> to vector<2x32xf32>
    %594 = arith.mulf %586, %593 : vector<2x32xf32>
    %cst_199 = arith.constant dense<0.000000e+00> : vector<32xf32>
    %595 = vector.multi_reduction <add>, %594, %cst_199 [0] : vector<2x32xf32> to vector<32xf32>
    %596 = vector.shape_cast %595 : vector<32xf32> to vector<1x32xf32>
    %cst_200 = arith.constant 5.000000e-01 : f32
    %597 = vector.broadcast %cst_200 : f32 to vector<1x32xf32>
    %598 = arith.mulf %596, %597 : vector<1x32xf32>
    %cst_201 = arith.constant dense<0xFF800000> : vector<32xf32>
    %599 = vector.multi_reduction <maximumf>, %594, %cst_201 [0] : vector<2x32xf32> to vector<32xf32>
    %600 = vector.shape_cast %599 : vector<32xf32> to vector<1x32xf32>
    %601 = tpu.concatenate %598, %600 in 1 : vector<1x32xf32>, vector<1x32xf32> -> vector<1x64xf32>
    %cst_202 = arith.constant 0.000000e+00 : f32
    %602 = vector.broadcast %cst_202 : f32 to vector<1x32xf32>
    %cst_203 = arith.constant 0.000000e+00 : f32
    %603 = vector.broadcast %cst_203 : f32 to vector<1x32xf32>
    %c0_204 = arith.constant 0 : index
    %c0_205 = arith.constant 0 : index
    %604 = vector.load %arg17[%c0_204, %c0_205] : memref<64x128xf32, #tpu.memory_space<vmem>>, vector<64x128xf32>
    %c0_206 = arith.constant 0 : index
    %c0_207 = arith.constant 0 : index
    %605 = vector.load %arg18[%c0_206, %c0_207] : memref<32x128xf32, #tpu.memory_space<vmem>>, vector<32x128xf32>
    %c0_208 = arith.constant 0 : index
    %c0_209 = arith.constant 0 : index
    %606 = vector.load %arg19[%c0_208, %c0_209] : memref<1x128xf32, #tpu.memory_space<vmem>>, vector<1x128xf32>
    %cst_210 = arith.constant dense<0.000000e+00> : vector<1x128xf32>
    %607 = tpu.matmul %207, %604, %cst_210 {dimension_numbers = #tpu.dot_dimension_numbers<[1], [0], [0], [1], [0, 0, 1, 1], [], []>} : vector<1x64xf32>, vector<64x128xf32>, vector<1x128xf32> -> vector<1x128xf32>
    %cst_211 = arith.constant dense<0.000000e+00> : vector<1x128xf32>
    %608 = tpu.matmul %602, %605, %cst_211 {dimension_numbers = #tpu.dot_dimension_numbers<[1], [0], [0], [1], [0, 0, 1, 1], [], []>} : vector<1x32xf32>, vector<32x128xf32>, vector<1x128xf32> -> vector<1x128xf32>
    %609 = arith.addf %607, %608 : vector<1x128xf32>
    %610 = arith.addf %609, %606 : vector<1x128xf32>
    %611 = vector.extract_strided_slice %610 {offsets = [0, 0], sizes = [1, 32], strides = [1, 1]} : vector<1x128xf32> to vector<1x32xf32>
    %612 = arith.negf %611 : vector<1x32xf32>
    %613 = math.exp %612 : vector<1x32xf32>
    %cst_212 = arith.constant 1.000000e+00 : f32
    %614 = vector.broadcast %cst_212 : f32 to vector<1x32xf32>
    %615 = arith.addf %614, %613 : vector<1x32xf32>
    %616 = arith.divf %614, %615 : vector<1x32xf32>
    %617 = vector.extract_strided_slice %610 {offsets = [0, 32], sizes = [1, 32], strides = [1, 1]} : vector<1x128xf32> to vector<1x32xf32>
    %618 = arith.negf %617 : vector<1x32xf32>
    %619 = math.exp %618 : vector<1x32xf32>
    %cst_213 = arith.constant 1.000000e+00 : f32
    %620 = vector.broadcast %cst_213 : f32 to vector<1x32xf32>
    %621 = arith.addf %620, %619 : vector<1x32xf32>
    %622 = arith.divf %620, %621 : vector<1x32xf32>
    %623 = vector.extract_strided_slice %610 {offsets = [0, 64], sizes = [1, 32], strides = [1, 1]} : vector<1x128xf32> to vector<1x32xf32>
    %624 = math.tanh %623 : vector<1x32xf32>
    %625 = vector.extract_strided_slice %610 {offsets = [0, 96], sizes = [1, 32], strides = [1, 1]} : vector<1x128xf32> to vector<1x32xf32>
    %626 = arith.negf %625 : vector<1x32xf32>
    %627 = math.exp %626 : vector<1x32xf32>
    %cst_214 = arith.constant 1.000000e+00 : f32
    %628 = vector.broadcast %cst_214 : f32 to vector<1x32xf32>
    %629 = arith.addf %628, %627 : vector<1x32xf32>
    %630 = arith.divf %628, %629 : vector<1x32xf32>
    %631 = arith.mulf %622, %603 : vector<1x32xf32>
    %632 = arith.mulf %616, %624 : vector<1x32xf32>
    %633 = arith.addf %631, %632 : vector<1x32xf32>
    %634 = math.tanh %633 : vector<1x32xf32>
    %635 = arith.mulf %630, %634 : vector<1x32xf32>
    %cst_215 = arith.constant dense<0.000000e+00> : vector<1x128xf32>
    %636 = tpu.matmul %413, %604, %cst_215 {dimension_numbers = #tpu.dot_dimension_numbers<[1], [0], [0], [1], [0, 0, 1, 1], [], []>} : vector<1x64xf32>, vector<64x128xf32>, vector<1x128xf32> -> vector<1x128xf32>
    %cst_216 = arith.constant dense<0.000000e+00> : vector<1x128xf32>
    %637 = tpu.matmul %635, %605, %cst_216 {dimension_numbers = #tpu.dot_dimension_numbers<[1], [0], [0], [1], [0, 0, 1, 1], [], []>} : vector<1x32xf32>, vector<32x128xf32>, vector<1x128xf32> -> vector<1x128xf32>
    %638 = arith.addf %636, %637 : vector<1x128xf32>
    %639 = arith.addf %638, %606 : vector<1x128xf32>
    %640 = vector.extract_strided_slice %639 {offsets = [0, 0], sizes = [1, 32], strides = [1, 1]} : vector<1x128xf32> to vector<1x32xf32>
    %641 = arith.negf %640 : vector<1x32xf32>
    %642 = math.exp %641 : vector<1x32xf32>
    %cst_217 = arith.constant 1.000000e+00 : f32
    %643 = vector.broadcast %cst_217 : f32 to vector<1x32xf32>
    %644 = arith.addf %643, %642 : vector<1x32xf32>
    %645 = arith.divf %643, %644 : vector<1x32xf32>
    %646 = vector.extract_strided_slice %639 {offsets = [0, 32], sizes = [1, 32], strides = [1, 1]} : vector<1x128xf32> to vector<1x32xf32>
    %647 = arith.negf %646 : vector<1x32xf32>
    %648 = math.exp %647 : vector<1x32xf32>
    %cst_218 = arith.constant 1.000000e+00 : f32
    %649 = vector.broadcast %cst_218 : f32 to vector<1x32xf32>
    %650 = arith.addf %649, %648 : vector<1x32xf32>
    %651 = arith.divf %649, %650 : vector<1x32xf32>
    %652 = vector.extract_strided_slice %639 {offsets = [0, 64], sizes = [1, 32], strides = [1, 1]} : vector<1x128xf32> to vector<1x32xf32>
    %653 = math.tanh %652 : vector<1x32xf32>
    %654 = vector.extract_strided_slice %639 {offsets = [0, 96], sizes = [1, 32], strides = [1, 1]} : vector<1x128xf32> to vector<1x32xf32>
    %655 = arith.negf %654 : vector<1x32xf32>
    %656 = math.exp %655 : vector<1x32xf32>
    %cst_219 = arith.constant 1.000000e+00 : f32
    %657 = vector.broadcast %cst_219 : f32 to vector<1x32xf32>
    %658 = arith.addf %657, %656 : vector<1x32xf32>
    %659 = arith.divf %657, %658 : vector<1x32xf32>
    %660 = arith.mulf %651, %633 : vector<1x32xf32>
    %661 = arith.mulf %645, %653 : vector<1x32xf32>
    %662 = arith.addf %660, %661 : vector<1x32xf32>
    %663 = math.tanh %662 : vector<1x32xf32>
    %664 = arith.mulf %659, %663 : vector<1x32xf32>
    %cst_220 = arith.constant dense<0.000000e+00> : vector<1x128xf32>
    %665 = tpu.matmul %601, %604, %cst_220 {dimension_numbers = #tpu.dot_dimension_numbers<[1], [0], [0], [1], [0, 0, 1, 1], [], []>} : vector<1x64xf32>, vector<64x128xf32>, vector<1x128xf32> -> vector<1x128xf32>
    %cst_221 = arith.constant dense<0.000000e+00> : vector<1x128xf32>
    %666 = tpu.matmul %664, %605, %cst_221 {dimension_numbers = #tpu.dot_dimension_numbers<[1], [0], [0], [1], [0, 0, 1, 1], [], []>} : vector<1x32xf32>, vector<32x128xf32>, vector<1x128xf32> -> vector<1x128xf32>
    %667 = arith.addf %665, %666 : vector<1x128xf32>
    %668 = arith.addf %667, %606 : vector<1x128xf32>
    %669 = vector.extract_strided_slice %668 {offsets = [0, 0], sizes = [1, 32], strides = [1, 1]} : vector<1x128xf32> to vector<1x32xf32>
    %670 = arith.negf %669 : vector<1x32xf32>
    %671 = math.exp %670 : vector<1x32xf32>
    %cst_222 = arith.constant 1.000000e+00 : f32
    %672 = vector.broadcast %cst_222 : f32 to vector<1x32xf32>
    %673 = arith.addf %672, %671 : vector<1x32xf32>
    %674 = arith.divf %672, %673 : vector<1x32xf32>
    %675 = vector.extract_strided_slice %668 {offsets = [0, 32], sizes = [1, 32], strides = [1, 1]} : vector<1x128xf32> to vector<1x32xf32>
    %676 = arith.negf %675 : vector<1x32xf32>
    %677 = math.exp %676 : vector<1x32xf32>
    %cst_223 = arith.constant 1.000000e+00 : f32
    %678 = vector.broadcast %cst_223 : f32 to vector<1x32xf32>
    %679 = arith.addf %678, %677 : vector<1x32xf32>
    %680 = arith.divf %678, %679 : vector<1x32xf32>
    %681 = vector.extract_strided_slice %668 {offsets = [0, 64], sizes = [1, 32], strides = [1, 1]} : vector<1x128xf32> to vector<1x32xf32>
    %682 = math.tanh %681 : vector<1x32xf32>
    %683 = vector.extract_strided_slice %668 {offsets = [0, 96], sizes = [1, 32], strides = [1, 1]} : vector<1x128xf32> to vector<1x32xf32>
    %684 = arith.negf %683 : vector<1x32xf32>
    %685 = math.exp %684 : vector<1x32xf32>
    %cst_224 = arith.constant 1.000000e+00 : f32
    %686 = vector.broadcast %cst_224 : f32 to vector<1x32xf32>
    %687 = arith.addf %686, %685 : vector<1x32xf32>
    %688 = arith.divf %686, %687 : vector<1x32xf32>
    %689 = arith.mulf %680, %662 : vector<1x32xf32>
    %690 = arith.mulf %674, %682 : vector<1x32xf32>
    %691 = arith.addf %689, %690 : vector<1x32xf32>
    %692 = math.tanh %691 : vector<1x32xf32>
    %693 = arith.mulf %688, %692 : vector<1x32xf32>
    %c0_225 = arith.constant 0 : index
    %c0_226 = arith.constant 0 : index
    %694 = vector.load %arg20[%c0_225, %c0_226] : memref<32x32xf32, #tpu.memory_space<vmem>>, vector<32x32xf32>
    %cst_227 = arith.constant dense<0.000000e+00> : vector<1x32xf32>
    %695 = tpu.matmul %693, %694, %cst_227 {dimension_numbers = #tpu.dot_dimension_numbers<[1], [0], [0], [1], [0, 0, 1, 1], [], []>} : vector<1x32xf32>, vector<32x32xf32>, vector<1x32xf32> -> vector<1x32xf32>
    %c0_228 = arith.constant 0 : index
    %c0_229 = arith.constant 0 : index
    %696 = vector.load %arg21[%c0_228, %c0_229] : memref<1x32xf32, #tpu.memory_space<vmem>>, vector<1x32xf32>
    %697 = arith.addf %695, %696 : vector<1x32xf32>
    %cst_230 = arith.constant 0.000000e+00 : f32
    %698 = vector.broadcast %cst_230 : f32 to vector<1x32xf32>
    %699 = arith.maximumf %697, %698 : vector<1x32xf32>
    %c0_231 = arith.constant 0 : index
    %c0_232 = arith.constant 0 : index
    %700 = vector.load %arg22[%c0_231, %c0_232] : memref<32x4xf32, #tpu.memory_space<vmem>>, vector<32x4xf32>
    %cst_233 = arith.constant dense<0.000000e+00> : vector<1x4xf32>
    %701 = tpu.matmul %699, %700, %cst_233 {dimension_numbers = #tpu.dot_dimension_numbers<[1], [0], [0], [1], [0, 0, 1, 1], [], []>} : vector<1x32xf32>, vector<32x4xf32>, vector<1x4xf32> -> vector<1x4xf32>
    %c0_234 = arith.constant 0 : index
    %c0_235 = arith.constant 0 : index
    %702 = vector.load %arg23[%c0_234, %c0_235] : memref<1x4xf32, #tpu.memory_space<vmem>>, vector<1x4xf32>
    %703 = arith.addf %701, %702 : vector<1x4xf32>
    %c0_236 = arith.constant 0 : index
    %c0_237 = arith.constant 0 : index
    %704 = vector.load %arg24[%c0_236, %c0_237] : memref<1x4xf32, #tpu.memory_space<vmem>>, vector<1x4xf32>
    tpu.vector_store %arg24[%c0_236, %c0_237], %703 {strides = array<i32>} : memref<1x4xf32, #tpu.memory_space<vmem>>, vector<1x4xf32>,
    return
  }
}

</mosaic_0001>

<bundles_post_ra>
// kernel: forward.1
= control target key start
LH: loop header
LB: loop body
LE: loop exit
PB: predicated region body
PF: predicated region fallthrough
CT: control target
= control target key end

     0   :  { %s7774_s0 = inlined_call_operand.vmem [shape: f32[16,8], index: 0, kind: input, shape index: {}]   ;;  %s7775_s1 = inlined_call_operand.vmem [shape: f32[16,16], index: 1, kind: input, shape index: {}]   ;;  %s7776_s2 = inlined_call_operand.vmem [shape: f32[8,32], index: 2, kind: input, shape index: {}]   ;;  %s7777_s3 = inlined_call_operand.vmem [shape: f32[8,32], index: 3, kind: input, shape index: {}]   ;;  %s7778_s4 = inlined_call_operand.vmem [shape: f32[4,32], index: 4, kind: input, shape index: {}]   ;;  %s7779_s5 = inlined_call_operand.vmem [shape: f32[32,1,1], index: 5, kind: input, shape index: {}]   ;;  %s7780_s6 = inlined_call_operand.vmem [shape: f32[1,32], index: 6, kind: input, shape index: {}]   ;;  %s7781_s7 = inlined_call_operand.vmem [shape: f32[32,32], index: 7, kind: input, shape index: {}]   ;;  %s7782_s8 = inlined_call_operand.vmem [shape: f32[32,32], index: 8, kind: input, shape index: {}]   ;;  %s7783_s9 = inlined_call_operand.vmem [shape: f32[4,32], index: 9, kind: input, shape index: {}]   ;;  %s7784_s10 = inlined_call_operand.vmem [shape: f32[32,1,1], index: 10, kind: input, shape index: {}]   ;;  %s7785_s11 = inlined_call_operand.vmem [shape: f32[1,32], index: 11, kind: input, shape index: {}]   ;;  %s7786_s12 = inlined_call_operand.hbm [shape: f32[32,32], index: 12, kind: input, shape index: {}]   ;;  %s7787_s13 = inlined_call_operand.hbm [shape: f32[32,32], index: 13, kind: input, shape index: {}]   ;;  %s7788_s14 = inlined_call_operand.vmem [shape: f32[4,32], index: 14, kind: input, shape index: {}]   ;;  %s7789_s15 = inlined_call_operand.vmem [shape: f32[32,1,1], index: 15, kind: input, shape index: {}]   ;;  %s7790_s16 = inlined_call_operand.vmem [shape: f32[1,32], index: 16, kind: input, shape index: {}]   ;;  %s7791_s17 = inlined_call_operand.vmem [shape: f32[64,128], index: 17, kind: input, shape index: {}]   ;;  %s7792_s18 = inlined_call_operand.hbm [shape: f32[32,128], index: 18, kind: input, shape index: {}]   ;;  %s7793_s19 = inlined_call_operand.vmem [shape: f32[1,128], index: 19, kind: input, shape index: {}]   ;;  %s7794_s20 = inlined_call_operand.hbm [shape: f32[32,32], index: 20, kind: input, shape index: {}]   ;;  %s7795_s21 = inlined_call_operand.vmem [shape: f32[1,32], index: 21, kind: input, shape index: {}]   ;;  %s7796_s22 = inlined_call_operand.vmem [shape: f32[32,4], index: 22, kind: input, shape index: {}]   ;;  %s7797_s23 = inlined_call_operand.vmem [shape: f32[1,4], index: 23, kind: input, shape index: {}]   ;;  %s7798_s24 = inlined_call_operand.hbm [shape: f32[1,4], index: 24, kind: output, shape index: {}]  }
   0x1   :  { %7868 = sst [smem:[#allocation61_spill]] %s7774_s0 }
   0x2   :  { %7869 = sst [smem:[#allocation62_spill]] %s7775_s1 }
   0x3   :  { %7870 = sst [smem:[#allocation63_spill]] %s7776_s2 }
   0x4   :  { %7871 = sst [smem:[#allocation64_spill]] %s7777_s3 }
   0x5   :  { %7872 = sst [smem:[#allocation65_spill]] %s7778_s4 }
   0x6   :  { %7873 = sst [smem:[#allocation66_spill]] %s7779_s5 }
   0x7   :  { %7874 = sst [smem:[#allocation67_spill]] %s7780_s6 }
   0x8   :  { %7875 = sst [smem:[#allocation68_spill]] %s7781_s7 }
   0x9   :  { %7876 = sst [smem:[#allocation69_spill]] %s7782_s8 }
   0xa   :  { %29 = vsyncpa [#allocation3], 0 }
   0xb   :  { %30 = vsyncpa [#allocation6], 0 }
   0xc   :  { %31 = vsyncpa [#allocation9], 0 }
   0xd   :  { %32 = vsyncpa [#allocation4], 0  ;;  %s74_s27 = sshll.u32 %s7787_s13, 4  ;;  %s5636_s28 = smov [#allocation5]   ;;  %s75_s27 = int_to_ptr.hbm [resolvable:$true] %s74_s27 }
   0xe   :  { %s76_s6 = sshll.u32 %s5636_s28, 4  ;;  %s61_s0 = sshll.u32 %s7786_s12, 4  ;;  %s77_s6 = int_to_ptr.vmem [resolvable:$true] %s76_s6  ;;  %s62_s0 = int_to_ptr.hbm [resolvable:$true] %s61_s0 }
   0xf   :  { %s5637_s7 = smov 128   ;;  %s5638_s30 = smov 8  }
  0x10   :  { %82 = dma.hbm_to_vmem [thread:$0]  %s75_s27, 512, %s77_s6, [#allocation6], %s5637_s7, %s5637_s7, %s5638_s30  }
  0x11   :  { %s5639_s3 = smov [#allocation2]   ;;  %s95_s1 = sshll.u32 %s7792_s18, 4  ;;  %s96_s1 = int_to_ptr.hbm [resolvable:$true] %s95_s1 }
  0x12   :  { %s63_s25 = sshll.u32 %s5639_s3, 4  ;;  %s110_s26 = sshll.u32 %s7794_s20, 4  ;;  %s64_s25 = int_to_ptr.vmem [resolvable:$true] %s63_s25  ;;  %s111_s26 = int_to_ptr.hbm [resolvable:$true] %s110_s26 }
  0x13   :  { %69 = dma.hbm_to_vmem [thread:$0]  %s62_s0, 512, %s64_s25, [#allocation3], %s5637_s7, %s5637_s7, %s5638_s30  }
  0x14   :  { %s5640_s12 = smov [#allocation7]   ;;  %s5641_s27 = smov [#allocation8]  }
  0x15   :  { %s97_s28 = sshll.u32 %s5640_s12, 4  ;;  %s112_s6 = sshll.u32 %s5641_s27, 4  ;;  %s98_s28 = int_to_ptr.vmem [resolvable:$true] %s97_s28  ;;  %s113_s6 = int_to_ptr.vmem [resolvable:$true] %s112_s6 }
  0x16   :  { %103 = dma.hbm_to_vmem [thread:$0]  %s96_s1, 512, %s98_s28, [#allocation6], %s5637_s7, %s5637_s7, %s5638_s30  }
  0x17   :  { %118 = dma.hbm_to_vmem [thread:$0]  %s111_s26, 512, %s113_s6, [#allocation9], %s5637_s7, %s5637_s7, %s5638_s30  }
  0x18   :  { %5628 = dma.done.wait [#allocation3], 512  }
  0x19   :  { %5629 = vsyncadd [#allocation3], 4294966784 }
  0x1a   :  { %5630 = dma.done.wait [#allocation6], 1024  }
  0x1b   :  { %5631 = vsyncadd [#allocation6], 4294966272 }
  0x1c   :  { %5632 = dma.done.wait [#allocation9], 512  }
  0x1d   :  { %5633 = vsyncadd [#allocation9], 4294966784  ;;  %s7877_s20 = sld [smem:[#allocation64_spill]]  ;;  %vm181_vm0 = vcmask 64512   ;;  %v7813_v5 = vmov 0   ;;  %vm357_vm1 = vcmask 261120   ;;  %v7804_v32 = vlaneseq }
  0x1e   :  { %s7878_s3 = sld [smem:[#allocation63_spill]]  ;;  %5219 = vset.pattern.permute.xlu1 %v7813_v5  ;;  %5220 = vset.pattern.permute.xlu2 %v7813_v5  ;;  %vm1317_vm2 = vcmask 130048   ;;  %s5647_s27 = smov 24   ;;  %vm1756_vm9 = vcmask 195584  }
  0x1f   :  { %s7879_s4 = sld [smem:[#allocation61_spill]]  ;;  %v5879_v33 = vshrl.u32 %v7804_v32, 7  ;;  %s5652_s0 = smov [#allocation10]  }
  0x20   :  { %s7880_s26 = sld [smem:[#allocation66_spill]] }
  0x21   :  { %s7881_s12 = sld [smem:[#allocation65_spill]]  ;;  %7882 = vst [vmem:[#allocation15_spill] sm:$0xff] %v5879_v33  ;;  %v5913_v47 = vadd.s32 8, %v5879_v33 }
  0x22   :  { %s7996_s25 = sld [smem:[#allocation68_spill]] }
  0x23   :  { %v146_v0 = vld [vmem:[%s7877_s20] sm:$0xff]  ;;  %7884 = vst [vmem:[#allocation17_spill] sm:$0xff] %v5913_v47  ;;  %s7998_s29 = sld [smem:[#allocation69_spill]] }
  0x24   :  { %v145_v1 = vld [vmem:[%s7878_s3] sm:$0xff]  ;;  %284 = vxpose.xlu0.b32.start.end [1/1] (short) (narrow) %v146_v0, 32  ;;  %s7995_s3 = sld [smem:[#allocation67_spill]] }
  0x25   :  { %v142_v2 = vld [vmem:[%s7879_s4 + $0x8] sm:$0xff]  ;;  %v141_v3 = vld [vmem:[%s7879_s4] sm:$0xff]  ;;  %203 = vmatpush.msra.mxu0 %v145_v1  ;;  %s7931_s4 = sld [smem:[#allocation62_spill]] }
  0x26   :  { %5086 = vmatpush.xpose.msk.msra.mxu2 %vm181_vm0, %v142_v2  ;;  %5078 = vmatmul.msk.f32.vlgmr.msra.gmra.mxu0 %vm181_vm0, %v141_v3  ;;  %v5291_v4 = vld [vmem:[%s7880_s26] ss:$0 sm:$0xff]  ;;  %v5292_v6 = vld [vmem:[%s7880_s26 + $0x3] ss:$0 sm:$0xff]  ;;  %v5293_v7 = vld [vmem:[%s7880_s26 + $0x5] ss:$0 sm:$0xff] }
  0x27   :  { %5080 = vmatpush.xpose.msk.msra.mxu1 %vm181_vm0, %v142_v2  ;;  %1115 = vperm.xlu1 %5219, %v5291_v4   ;;  %v5294_v8 = vld [vmem:[%s7880_s26 + $0x6] ss:$0 sm:$0xff]  ;;  %v5295_v10 = vld [vmem:[%s7880_s26 + $0x7] ss:$0 sm:$0xff]  ;;  %v5296_v12 = vld [vmem:[%s7880_s26 + $0x10] ss:$0 sm:$0xff] }
  0x28   :  { %v5297_v13 = vld [vmem:[%s7880_s26 + $0x1] ss:$0 sm:$0xff]  ;;  %v5298_v15 = vld [vmem:[%s7880_s26 + $0x13] ss:$0 sm:$0xff]  ;;  %v5299_v16 = vld [vmem:[%s7880_s26 + $0x2] ss:$0 sm:$0xff] }
  0x29   :  { %1119 = vperm.xlu2 %5220, %v5297_v13   ;;  %v5300_v18 = vld [vmem:[%s7880_s26 + $0x14] ss:$0 sm:$0xff]  ;;  %v5301_v19 = vld [vmem:[%s7880_s26 + $0x4] ss:$0 sm:$0xff]  ;;  %v5302_v20 = vld [vmem:[%s7880_s26 + $0xa] ss:$0 sm:$0xff] }
  0x2a   :  { %5087 = vmatpush.xpose.msk.msra.mxu2 %vm181_vm0, %v141_v3  ;;  %v5303_v22 = vld [vmem:[%s7880_s26 + $0x11] ss:$0 sm:$0xff]  ;;  %v5304_v23 = vld [vmem:[%s7880_s26 + $0x19] ss:$0 sm:$0xff]  ;;  %v5305_v25 = vld [vmem:[%s7880_s26 + $0x12] ss:$0 sm:$0xff] }
  0x2b   :  { %5081 = vmatpush.xpose.msk.msra.mxu1 %vm181_vm0, %v141_v3  ;;  %v5306_v27 = vld [vmem:[%s7880_s26 + $0x8] ss:$0 sm:$0xff]  ;;  %v5307_v29 = vld [vmem:[%s7880_s26 + $0x18] ss:$0 sm:$0xff]  ;;  %v147_v30 = vld [vmem:[%s7881_s12] sm:$0xf] }
  0x2c   :  { %5092 = vmatpush.xpose.msk.msra.mxu3 %vm357_vm1, %v147_v30  ;;  %v5308_v52 = vld [vmem:[%s7880_s26 + $0x9] ss:$0 sm:$0xff]  ;;  %v5309_v53 = vld [vmem:[%s7880_s26 + $0x16] ss:$0 sm:$0xff]  ;;  %v5310_v56 = vld [vmem:[%s7880_s26 + $0x1c] ss:$0 sm:$0xff] }
  0x2d   :  { %v5311_v57 = vld [vmem:[%s7880_s26 + $0xe] ss:$0 sm:$0xff]  ;;  %s5651_s12 = smov 64  }
  0x2e   :  { %5079 = vmatmul.msk.f32.gmra.mxu0 %vm181_vm0, %v142_v2 }
  0x2f   :  { %1127 = vperm.xlu1 %5219, %v5292_v6  }
  0x31   :  { %1123 = vperm.xlu2 %5220, %v5299_v16  }
  0x37   :  { %1135 = vperm.xlu1 %5219, %v5293_v7  }
  0x39   :  { %1131 = vperm.xlu2 %5220, %v5301_v19  }
  0x3f   :  { %1139 = vperm.xlu1 %5219, %v5294_v8  }
  0x41   :  { %1183 = vperm.xlu2 %5220, %v5303_v22  }
  0x44   :  { %211 = vxpose.xlu0.b32.start.end [1/1] (short) (narrow) %v145_v1, 32 }
  0x47   :  { %1143 = vperm.xlu1 %5219, %v5295_v10  }
  0x49   :  { %1187 = vperm.xlu2 %5220, %v5305_v25  }
  0x4f   :  { %1179 = vperm.xlu1 %5219, %v5296_v12  }
  0x51   :  { %1147 = vperm.xlu2 %5220, %v5306_v27  }
  0x57   :  { %1191 = vperm.xlu1 %5219, %v5298_v15  }
  0x59   :  { %1211 = vperm.xlu2 %5220, %v5307_v29  }
  0x5f   :  { %1195 = vperm.xlu1 %5219, %v5300_v18  }
  0x61   :  { %5222 = vset.pattern.permute.xlu2 %v5879_v33 }
  0x67   :  { %1155 = vperm.xlu1 %5219, %v5302_v20  }
  0x6f   :  { %1215 = vperm.xlu1 %5219, %v5304_v23  }
  0x77   :  { %5221 = vset.pattern.permute.xlu1 %v5879_v33 }
  0x83   :  { %v5953_v0 = vpop.permute.xlu2 %1119 }
  0x8b   :  { %v5967_v6 = vpop.permute.xlu2 %1123 }
  0x93   :  { %v5975_v10 = vpop.permute.xlu2 %1131 }
  0x99   :  { %v5942_v58 = vpop.permute.xlu1 %1115 }
  0xa1   :  { %v5945_v59 = vpop.permute.xlu1 %1127 }
  0xa3   :  { %v205_v31 = vpop.f32.mrf.mxu0 }
  0xa4   :  { %5093 = vmatmul.msk.f32.vlgmr.msra.gmra.mxu3 %vm357_vm1, %v205_v31 }
  0xa9   :  { %v5951_v63 = vpop.permute.xlu1 %1135 }
  0xab   :  { %5225 = vset.pattern.permute.xlu0 %v5879_v33 }
  0xb1   :  { %v5965_v4 = vpop.permute.xlu1 %1139 }
  0xc8   :  { %v300_v9 = vpop.trf.xlu0 }
  0xc9   :  { %5088 = vmatmul.msk.f32.vlgmr.msra.gmra.mxu2 %vm181_vm0, %v300_v9  ;;  %v5973_v9 = vpop.permute.xlu1 %1143 }
  0xd0   :  { %v301_v11 = vpop.trf.xlu0 }
  0xd1   :  { %5089 = vmatmul.msk.f32.gmra.mxu2 %vm181_vm0, %v301_v11  ;;  %v5981_v13 = vpop.permute.xlu1 %1179 }
  0xd8   :  { %v302_v14 = vpop.trf.xlu0 }
  0xd9   :  { %5090 = vmatmul.msk.f32.gmra.mxu2 %vm181_vm0, %v302_v14  ;;  %v5983_v14 = vpop.permute.xlu2 %1183 }
  0xda   :  { %7885 = vst [vmem:[#allocation18_spill] sm:$0xff] %v5983_v14 }
  0xe0   :  { %v303_v17 = vpop.trf.xlu0 }
  0xe1   :  { %5091 = vmatmul.msk.f32.gmra.mxu2 %vm181_vm0, %v303_v17  ;;  %v5989_v17 = vpop.permute.xlu1 %1191  ;;  %v5991_v18 = vpop.permute.xlu2 %1187 }
  0xe2   :  { %7886 = vst [vmem:[#allocation19_spill] sm:$0xff] %v5989_v17 }
  0xe3   :  { %7887 = vst [vmem:[#allocation20_spill] sm:$0xff] %v5991_v18 }
  0xe8   :  { %v227_v21 = vpop.trf.xlu0 }
  0xe9   :  { %5082 = vmatmul.msk.f32.vlgmr.msra.gmra.mxu1 %vm181_vm0, %v227_v21  ;;  %v5995_v19 = vpop.permute.xlu1 %1195  ;;  %v5997_v20 = vpop.permute.xlu2 %1147 }
  0xea   :  { %7888 = vst [vmem:[#allocation21_spill] sm:$0xff] %v5995_v19  ;;  %v208_v21 = vpop.f32.mrf.mxu0 }
  0xeb   :  { %7889 = vst [vmem:[#allocation22_spill] sm:$0xff] %v5997_v20  ;;  %5094 = vmatmul.msk.f32.gmra.mxu3 %vm357_vm1, %v208_v21 }
  0xf0   :  { %v228_v24 = vpop.trf.xlu0 }
  0xf1   :  { %5083 = vmatmul.msk.f32.gmra.mxu1 %vm181_vm0, %v228_v24  ;;  %v6000_v22 = vpop.permute.xlu1 %1155  ;;  %v6002_v23 = vpop.permute.xlu2 %1211 }
  0xf2   :  { %7890 = vst [vmem:[#allocation23_spill] sm:$0xff] %v6000_v22 }
  0xf3   :  { %7891 = vst [vmem:[#allocation24_spill] sm:$0xff] %v6002_v23 }
  0xf8   :  { %v229_v26 = vpop.trf.xlu0 }
  0xf9   :  { %5084 = vmatmul.msk.f32.gmra.mxu1 %vm181_vm0, %v229_v26  ;;  %v6009_v26 = vpop.permute.xlu1 %1215 }
  0xfa   :  { %7892 = vst [vmem:[#allocation25_spill] sm:$0xff] %v6009_v26 }
 0x100   :  { %v230_v28 = vpop.trf.xlu0 }
 0x101   :  { %5085 = vmatmul.msk.f32.gmra.mxu1 %vm181_vm0, %v230_v28 }
 0x14c   :  { %v5884_v34 = vpop.f32.mrf.mxu2 }
 0x14d   :  { %5096 = vmatpush.xpose.msk.msrb.mxu3 %vm1317_vm2, %v5884_v34 }
 0x154   :  { %v5888_v35 = vpop.f32.mrf.mxu2 }
 0x155   :  { %v838_v17 = vrot.slane %v5888_v35, 2 }
 0x15c   :  { %v5890_v36 = vpop.f32.mrf.mxu2 }
 0x15d   :  { %5102 = vmatpush.xpose.msk.msra.mxu3 %vm1317_vm2, %v5890_v36 }
 0x164   :  { %v5894_v37 = vpop.f32.mrf.mxu2 }
 0x165   :  { %7883 = vst [vmem:[#allocation16_spill] sm:$0xff] %v5894_v37  ;;  %402 = vmatpush.msrb.mxu0 %v5894_v37  ;;  %5105 = vmatpush.xpose.msk.msrb.mxu1 %vm1317_vm2, %v5894_v37 }
 0x166   :  { %v272_v38 = vpop.f32.mrf.mxu1 }
 0x167   :  { %403 = vmatpush.msrb.mxu0 %v5890_v36  ;;  %v475_v39 = vperm.slane %v272_v38, 5  ;;  %v436_v40 = vperm.slane %v272_v38, 2  ;;  %v410_v41 = vperm.slane %v272_v38, 0  ;;  %v449_v44 = vperm.slane %v272_v38, 3 }
 0x168   :  { %v423_v45 = vperm.slane %v272_v38, 1  ;;  %v462_v48 = vperm.slane %v272_v38, 4  ;;  %v501_v54 = vperm.slane %v272_v38, 7  ;;  %v488_v55 = vperm.slane %v272_v38, 6 }
 0x169   :  { %404 = vmatpush.msrb.mxu0 %v5888_v35  ;;  %480 = vperm.xlu0 %5225, %v475_v39  }
 0x16a   :  { %441 = vperm.xlu2 %5222, %v436_v40   ;;  %415 = vperm.xlu1 %5221, %v410_v41  }
 0x16b   :  { %405 = vmatpush.msrb.mxu0 %v5884_v34 }
 0x16c   :  { %5095 = vmatmul.msk.f32.vlgmr.msrb.gmra.mxu0 %vm357_vm1, %v147_v30 }
 0x16d   :  { %5099 = vmatpush.xpose.msk.msra.mxu0 %vm1317_vm2, %v5888_v35 }
 0x16e   :  { %v5905_v42 = vpop.f32.mrf.mxu1 }
 0x16f   :  { %v7807_v43 = vperm.slane %v5905_v42, 5  ;;  %v514_v61 = vperm.slane %v5905_v42, 0  ;;  %v553_v62 = vperm.slane %v5905_v42, 3  ;;  %v527_v2 = vperm.slane %v5905_v42, 1 }
 0x170   :  { %v540_v3 = vperm.slane %v5905_v42, 2  ;;  %v592_v8 = vperm.slane %v5905_v42, 6  ;;  %v7808_v11 = vperm.slane %v5905_v42, 4 }
 0x171   :  { %584 = vperm.xlu0 %5225, %v7807_v43  }
 0x172   :  { %454 = vperm.xlu2 %5222, %v449_v44   ;;  %428 = vperm.xlu1 %5221, %v423_v45  }
 0x176   :  { %v5910_v46 = vpop.f32.mrf.mxu1 }
 0x177   :  { %v657_v60 = vperm.slane %v5910_v46, 3  ;;  %v709_v1 = vperm.slane %v5910_v46, 7  ;;  %v618_v7 = vperm.slane %v5910_v46, 0  ;;  %v644_v12 = vperm.slane %v5910_v46, 2 }
 0x178   :  { %v631_v15 = vperm.slane %v5910_v46, 1  ;;  %v670_v16 = vperm.slane %v5910_v46, 4  ;;  %v683_v27 = vperm.slane %v5910_v46, 5  ;;  %v7812_v30 = vperm.slane %v5910_v46, 6 }
 0x17a   :  { %5224 = vset.pattern.permute.xlu2 %v5913_v47  ;;  %467 = vperm.xlu1 %5221, %v462_v48  }
 0x17e   :  { %v5916_v49 = vpop.f32.mrf.mxu1 }
 0x17f   :  { %v7811_v50 = vperm.slane %v5916_v49, 3  ;;  %v7806_v51 = vperm.slane %v5916_v49, 5  ;;  %v735_v25 = vperm.slane %v5916_v49, 1  ;;  %v7815_v31 = vperm.slane %v5916_v49, 2 }
 0x181   :  { %766 = vperm.xlu0 %5225, %v7811_v50   ;;  %v7820_v50 = vperm.slane %v5905_v42, 7 }
 0x182   :  { %434 = vperm.xlu2 %5224, %v423_v45   ;;  %5223 = vset.pattern.permute.xlu1 %v5913_v47 }
 0x189   :  { %792 = vperm.xlu0 %5225, %v7806_v51  }
 0x18a   :  { %447 = vperm.xlu2 %5224, %v436_v40   ;;  %421 = vperm.xlu1 %5223, %v410_v41   ;;  %v5312_v41 = vld [vmem:[%s7880_s26 + $0x15] ss:$0 sm:$0xff] }
 0x191   :  { %5246 = vset.pattern.permute.xlu0 %v7813_v5 }
 0x192   :  { %5228 = vset.pattern.permute.xlu2 %v5879_v33  ;;  %5226 = vset.pattern.permute.xlu1 %v5879_v33 }
 0x193   :  { %1151 = vperm.xlu0 %5246, %v5308_v52  }
 0x19a   :  { %506 = vperm.xlu2 %5228, %v501_v54   ;;  %493 = vperm.xlu1 %5226, %v488_v55  }
 0x19b   :  { %1203 = vperm.xlu0 %5246, %v5309_v53  }
 0x1a2   :  { %5229 = vset.pattern.permute.xlu2 %v5913_v47  ;;  %5227 = vset.pattern.permute.xlu1 %v5913_v47 }
 0x1a3   :  { %1227 = vperm.xlu0 %5246, %v5310_v56   ;;  %v5313_v56 = vld [vmem:[%s7880_s26 + $0xb] ss:$0 sm:$0xff] }
 0x1aa   :  { %473 = vperm.xlu2 %5229, %v462_v48   ;;  %460 = vperm.xlu1 %5227, %v449_v44  }
 0x1ab   :  { %1171 = vperm.xlu0 %5246, %v5311_v57  }
 0x1b2   :  { %486 = vperm.xlu2 %5229, %v475_v39   ;;  %512 = vperm.xlu1 %5227, %v501_v54   ;;  %v722_v39 = vperm.slane %v5916_v49, 0 }
 0x1b3   :  { %5256 = vset.pattern.permute.xlu0 %v5913_v47 }
 0x1ba   :  { %499 = vperm.xlu2 %5229, %v488_v55   ;;  %5230 = vset.pattern.permute.xlu1 %v5879_v33  ;;  %v7805_v55 = vperm.slane %v5916_v49, 4 }
 0x1bb   :  { %668 = vperm.xlu0 %5256, %v657_v60  }
 0x1c2   :  { %5231 = vset.pattern.permute.xlu2 %v5879_v33  ;;  %519 = vperm.xlu1 %5230, %v514_v61  }
 0x1c3   :  { %564 = vperm.xlu0 %5256, %v553_v62  }
 0x1c4   :  { %v6006_v24 = vpop.permute.xlu2 %441 }
 0x1ca   :  { %532 = vperm.xlu2 %5231, %v527_v2   ;;  %545 = vperm.xlu1 %5230, %v540_v3  }
 0x1cb   :  { %720 = vperm.xlu0 %5256, %v709_v1  }
 0x1cc   :  { %v6014_v29 = vpop.permute.xlu2 %454 }
 0x1d2   :  { %558 = vperm.xlu2 %5231, %v553_v62   ;;  %623 = vperm.xlu1 %5230, %v618_v7  }
 0x1d3   :  { %603 = vperm.xlu0 %5256, %v592_v8  }
 0x1da   :  { %571 = vperm.xlu2 %5231, %v7808_v11   ;;  %649 = vperm.xlu1 %5230, %v644_v12  }
 0x1dc   :  { %v6012_v28 = vpop.permute.xlu1 %415  ;;  %v6022_v38 = vpop.permute.xlu2 %434 }
 0x1e2   :  { %636 = vperm.xlu2 %5231, %v631_v15   ;;  %675 = vperm.xlu1 %5230, %v670_v16  }
 0x1e4   :  { %v6025_v40 = vpop.permute.xlu1 %428  ;;  %v6030_v44 = vpop.permute.xlu2 %447 }
 0x1ea   :  { %662 = vperm.xlu2 %5231, %v657_v60   ;;  %5233 = vset.pattern.permute.xlu1 %v5913_v47 }
 0x1ec   :  { %v6034_v45 = vpop.permute.xlu1 %467 }
 0x1f2   :  { %5232 = vset.pattern.permute.xlu2 %v5913_v47  ;;  %642 = vperm.xlu1 %5233, %v631_v15  }
 0x1f4   :  { %v6036_v48 = vpop.permute.xlu2 %506 }
 0x1fa   :  { %629 = vperm.xlu2 %5232, %v618_v7   ;;  %655 = vperm.xlu1 %5233, %v644_v12  }
 0x1fc   :  { %v6040_v52 = vpop.permute.xlu1 %421 }
 0x202   :  { %5234 = vset.pattern.permute.xlu2 %v5879_v33  ;;  %5235 = vset.pattern.permute.xlu1 %v5879_v33 }
 0x204   :  { %v6043_v53 = vpop.permute.xlu2 %473 }
 0x20a   :  { %688 = vperm.xlu2 %5234, %v683_v27   ;;  %740 = vperm.xlu1 %5235, %v735_v25  }
 0x20c   :  { %v6046_v54 = vpop.permute.xlu1 %493  ;;  %v6059_v60 = vpop.permute.xlu2 %486 }
 0x212   :  { %701 = vperm.xlu2 %5234, %v7812_v30   ;;  %753 = vperm.xlu1 %5235, %v7815_v31   ;;  %v7823_v31 = vperm.slane %v5916_v49, 6 }
 0x21a   :  { %714 = vperm.xlu1 %5235, %v709_v1   ;;  %727 = vperm.xlu2 %5234, %v722_v39   ;;  %v6068_v1 = vpop.permute.xlu2 %499 }
 0x21c   :  { %v6056_v57 = vpop.permute.xlu1 %460 }
 0x222   :  { %5237 = vset.pattern.permute.xlu1 %v5913_v47  ;;  %5236 = vset.pattern.permute.xlu2 %v7813_v5 }
 0x223   :  { %1199 = vperm.xlu2 %5236, %v5312_v41  }
 0x224   :  { %v6066_v62 = vpop.permute.xlu1 %512  ;;  %v6075_v7 = vpop.permute.xlu2 %532 }
 0x225   :  { %7894 = vst [vmem:[#allocation27_spill] sm:$0xff] %v6075_v7 }
 0x22a   :  { %525 = vperm.xlu1 %5237, %v514_v61   ;;  %v5314_v61 = vld [vmem:[%s7880_s26 + $0x1a] ss:$0 sm:$0xff] }
 0x22b   :  { %5238 = vset.pattern.permute.xlu2 %v5913_v47 }
 0x22c   :  { %v6082_v15 = vpop.permute.xlu2 %558 }
 0x22d   :  { %7896 = vst [vmem:[#allocation29_spill] sm:$0xff] %v6082_v15 }
 0x232   :  { %5239 = vset.pattern.permute.xlu1 %v5879_v33 }
 0x233   :  { %538 = vperm.xlu2 %5238, %v527_v2  }
 0x234   :  { %v6073_v2 = vpop.permute.xlu1 %519  ;;  %v6091_v41 = vpop.permute.xlu2 %571 }
 0x235   :  { %7893 = vst [vmem:[#allocation26_spill] sm:$0xff] %v6073_v2  ;;  %v837_v2 = vrot.slane %v5888_v35, 1 }
 0x236   :  { %7897 = vst [vmem:[#allocation30_spill] sm:$0xff] %v6091_v41 }
 0x23a   :  { %779 = vperm.xlu1 %5239, %v7805_v55   ;;  %v7809_v55 = vmov 1  }
 0x23b   :  { %5240 = vset.pattern.permute.xlu2 %v7813_v5  ;;  %5264 = vset.pattern.permute.xlu0 %v7809_v55 }
 0x23c   :  { %1159 = vperm.xlu2 %5240, %v5313_v56   ;;  %v6080_v12 = vpop.permute.xlu1 %545 }
 0x23d   :  { %7895 = vst [vmem:[#allocation28_spill] sm:$0xff] %v6080_v12 }
 0x242   :  { %5241 = vset.pattern.permute.xlu1 %v7813_v5 }
 0x243   :  { %1219 = vperm.xlu1 %5241, %v5314_v61   ;;  %v6106_v61 = vpop.f32.mrf.mxu3 }
 0x244   :  { %5242 = vset.pattern.permute.xlu2 %v5913_v47  ;;  %v6089_v21 = vpop.permute.xlu1 %623  ;;  %1453 = vperm.xlu0 %5264, %v6106_v61  }
 0x24b   :  { %5243 = vset.pattern.permute.xlu1 %v5913_v47  ;;  %v6127_v55 = vpop.f32.mrf.mxu3 }
 0x24c   :  { %681 = vperm.xlu2 %5242, %v670_v16   ;;  %v5315_v16 = vld [vmem:[%s7880_s26 + $0xc] ss:$0 sm:$0xff]  ;;  %v6097_v56 = vpop.permute.xlu1 %649 }
 0x253   :  { %551 = vperm.xlu1 %5243, %v540_v3   ;;  %v6095_v3 = vpop.permute.xlu0 %480 }
 0x254   :  { %5244 = vset.pattern.permute.xlu2 %v5879_v33  ;;  %v6110_v32 = vpop.permute.xlu1 %675 }
 0x25b   :  { %733 = vperm.xlu1 %5243, %v722_v39   ;;  %v6099_v39 = vpop.permute.xlu2 %636 }
 0x25c   :  { %597 = vperm.xlu2 %5244, %v592_v8   ;;  %v5316_v8 = vld [vmem:[%s7880_s26 + $0x1b] ss:$0 sm:$0xff] }
 0x263   :  { %5247 = vset.pattern.permute.xlu1 %v7813_v5  ;;  %v6113_v51 = vpop.permute.xlu2 %662 }
 0x264   :  { %1163 = vperm.xlu1 %5247, %v5315_v16   ;;  %5245 = vset.pattern.permute.xlu2 %v5913_v47  ;;  %v6108_v16 = vpop.permute.xlu0 %584  ;;  %v6122_v43 = vpop.permute.xlu1 %642 }
 0x265   :  { %7898 = vst [vmem:[#allocation31_spill] sm:$0xff] %v6108_v16 }
 0x26b   :  { %v6124_v11 = vpop.permute.xlu2 %629 }
 0x26c   :  { %5249 = vset.pattern.permute.xlu1 %v5913_v47  ;;  %746 = vperm.xlu2 %5245, %v735_v25   ;;  %v5317_v25 = vld [vmem:[%s7880_s26 + $0x17] ss:$0 sm:$0xff] }
 0x273   :  { %v6134_v30 = vpop.permute.xlu2 %688 }
 0x274   :  { %694 = vperm.xlu1 %5249, %v683_v27   ;;  %5248 = vset.pattern.permute.xlu2 %v7813_v5  ;;  %v6120_v27 = vpop.permute.xlu0 %766  ;;  %7900 = vst [vmem:[#allocation33_spill] sm:$0xff] %v6134_v30 }
 0x275   :  { %1223 = vperm.xlu2 %5248, %v5316_v8   ;;  %7899 = vst [vmem:[#allocation32_spill] sm:$0xff] %v6120_v27  ;;  %v7816_v8 = vmov 2   ;;  %v7906_v27 = vmov 0  }
 0x276   :  { %5267 = vset.pattern.permute.xlu0 %v7816_v8  ;;  %v7902_v8 = vperm.slane %v5916_v49, 2 }
 0x277   :  { %1559 = vperm.xlu0 %5267, %v6127_v55  }
 0x27c   :  { %5250 = vset.pattern.permute.xlu1 %v5879_v33  ;;  %v6136_v5 = vpop.permute.xlu0 %792 }
 0x27d   :  { %1207 = vperm.xlu2 %5248, %v5317_v25   ;;  %7901 = vst [vmem:[#allocation34_spill] sm:$0xff] %v6136_v5  ;;  %v6138_v25 = vpop.permute.xlu1 %655 }
 0x284   :  { %610 = vperm.xlu1 %5250, %v7820_v50   ;;  %v6145_v23 = vpop.permute.xlu0 %1151  ;;  %v6149_v50 = vpop.permute.xlu2 %701 }
 0x285   :  { %5251 = vset.pattern.permute.xlu2 %v5913_v47  ;;  %7903 = vst [vmem:[#allocation35_spill] sm:$0xff] %v6145_v23  ;;  %v6147_v26 = vpop.permute.xlu1 %740 }
 0x286   :  { %7904 = vst [vmem:[#allocation36_spill] sm:$0xff] %v6147_v26  ;;  %v5318_v26 = vld [vmem:[%s7880_s26 + $0xd] ss:$0 sm:$0xff] }
 0x287   :  { %7905 = vst [vmem:[#allocation37_spill] sm:$0xff] %v6149_v50  ;;  %v839_v50 = vrot.slane %v5888_v35, 3 }
 0x289   :  { %v6206_v18 = vperm.slane %v839_v50, 0 }
 0x28b   :  { %7923 = vst [vmem:[#allocation50_spill] sm:$0xff] %v6206_v18 }
 0x28c   :  { %805 = vperm.xlu1 %5250, %v7823_v31   ;;  %v6154_v5 = vpop.permute.xlu0 %1203  ;;  %v6158_v31 = vpop.permute.xlu2 %727 }
 0x28d   :  { %759 = vperm.xlu2 %5251, %v7902_v8   ;;  %7907 = vst [vmem:[#allocation38_spill] sm:$0xff] %v6154_v5  ;;  %v6156_v37 = vpop.permute.xlu1 %753  ;;  %v7910_v8 = vperm.slane %v5910_v46, 6  ;;  %v7914_v5 = vperm.slane %v5916_v49, 3  ;;  %v5319_v46 = vld [vmem:[%s7880_s26 + $0x1d] ss:$0 sm:$0xff] }
 0x28e   :  { %7908 = vst [vmem:[#allocation39_spill] sm:$0xff] %v6156_v37 }
 0x28f   :  { %7909 = vst [vmem:[#allocation40_spill] sm:$0xff] %v6158_v31 }
 0x294   :  { %5253 = vset.pattern.permute.xlu1 %v5913_v47  ;;  %v6166_v41 = vpop.permute.xlu0 %1227  ;;  %v6170_v15 = vpop.permute.xlu2 %1199 }
 0x295   :  { %5252 = vset.pattern.permute.xlu2 %v7906_v27  ;;  %7911 = vst [vmem:[#allocation41_spill] sm:$0xff] %v6166_v41  ;;  %v6168_v16 = vpop.permute.xlu1 %714 }
 0x296   :  { %1350 = vperm.xlu2 %5252, %v6106_v61   ;;  %7912 = vst [vmem:[#allocation42_spill] sm:$0xff] %v6168_v16  ;;  %v7831_v16 = vperm.slane %v5888_v35, 0 }
 0x297   :  { %7913 = vst [vmem:[#allocation43_spill] sm:$0xff] %v6170_v15  ;;  %v6192_v15 = vperm.slane %v837_v2, 0 }
 0x299   :  { %7919 = vst [vmem:[#allocation47_spill] sm:$0xff] %v6192_v15 }
 0x29c   :  { %707 = vperm.xlu1 %5253, %v7910_v8   ;;  %v539_v37 = vpop.permute.xlu2 %538  ;;  %v6178_v31 = vpop.permute.xlu0 %1171 }
 0x29d   :  { %v526_v8 = vpop.permute.xlu1 %525  ;;  %7915 = vst [vmem:[#allocation44_spill] sm:$0xff] %v6178_v31 }
 0x29e   :  { %1355 = vperm.xlu2 %5252, %v6127_v55  }
 0x2a4   :  { %772 = vperm.xlu1 %5253, %v7914_v5   ;;  %v6184_v12 = vpop.permute.xlu2 %1159  ;;  %v7918_v5 = vperm.slane %v5905_v42, 4 }
 0x2a5   :  { %7917 = vst [vmem:[#allocation46_spill] sm:$0xff] %v6184_v12 }
 0x2a6   :  { %1167 = vperm.xlu2 %5252, %v5318_v26   ;;  %v6188_v26 = vpop.permute.xlu0 %668 }
 0x2ac   :  { %5257 = vset.pattern.permute.xlu1 %v7906_v27  ;;  %v6181_v41 = vpop.permute.xlu1 %779  ;;  %v6202_v19 = vpop.permute.xlu2 %681 }
 0x2ad   :  { %1231 = vperm.xlu1 %5257, %v5319_v46   ;;  %7916 = vst [vmem:[#allocation45_spill] sm:$0xff] %v6181_v41  ;;  %v939_v46 = vadd.f32 %v7831_v16, %v526_v8  ;;  %v7921_v41 = vperm.slane %v5905_v42, 5  ;;  %v5320_v16 = vld [vmem:[%s7880_s26 + $0xf] ss:$0 sm:$0xff] }
 0x2ae   :  { %5254 = vset.pattern.permute.xlu2 %v5913_v47  ;;  %7922 = vst [vmem:[#allocation49_spill] sm:$0xff] %v6202_v19  ;;  %v565_v30 = vpop.permute.xlu0 %564  ;;  %v7837_v19 = vperm.slane %v5916_v49, 7 }
 0x2af   :  { %v1003_v2 = vand.u32 2147483647, %v939_v46 }
 0x2b5   :  { %5259 = vset.pattern.permute.xlu1 %v5913_v47  ;;  %v6196_v31 = vpop.permute.xlu1 %1219 }
 0x2b6   :  { %577 = vperm.xlu2 %5254, %v7918_v5   ;;  %7920 = vst [vmem:[#allocation48_spill] sm:$0xff] %v6196_v31  ;;  %v941_v5 = vadd.f32 %v6192_v15, %v539_v37  ;;  %v6212_v31 = vperm.slane %v838_v17, 0  ;;  %v1259_v37 = vmul.f32 %v5997_v20, %v1003_v2  ;;  %v6218_v50 = vpop.permute.xlu2 %597 }
 0x2b7   :  { %7925 = vst [vmem:[#allocation52_spill] sm:$0xff] %v6218_v50 }
 0x2b8   :  { %v1005_v8 = vand.u32 2147483647, %v941_v5  ;;  %7924 = vst [vmem:[#allocation51_spill] sm:$0xff] %v6212_v31  ;;  %v1437_v17 = vsel %vm1317_vm2, %v1259_v37, 0.0 }
 0x2ba   :  { %v1261_v46 = vmul.f32 %v6145_v23, %v1005_v8 }
 0x2bc   :  { %v1438_v2 = vsel %vm1317_vm2, %v1261_v46, 0.0  ;;  %v7928_v46 = vperm.slane %v5916_v49, 5 }
 0x2bd   :  { %590 = vperm.xlu1 %5259, %v7921_v41   ;;  %v945_v41 = vadd.f32 %v6206_v18, %v565_v30  ;;  %v1439_v14 = vadd.f32 %v1438_v2, %v1437_v17  ;;  %v5321_v17 = vld [vmem:[%s7880_s26 + $0x1e] ss:$0 sm:$0xff]  ;;  %v831_v2 = vrot.slane %v5884_v34, 2 }
 0x2be   :  { %5255 = vset.pattern.permute.xlu2 %v5879_v33 }
 0x2bf   :  { %v1009_v30 = vand.u32 2147483647, %v945_v41  ;;  %v7927_v41 = vmov 2  }
 0x2c1   :  { %v1265_v20 = vmul.f32 %v6184_v12, %v1009_v30 }
 0x2c5   :  { %v552_v15 = vpop.permute.xlu1 %551  ;;  %5261 = vset.pattern.permute.xlu1 %v7906_v27 }
 0x2c6   :  { %v943_v5 = vadd.f32 %v6212_v31, %v552_v15  ;;  %1175 = vperm.xlu1 %5261, %v5320_v16   ;;  %818 = vperm.xlu2 %5255, %v7837_v19   ;;  %v1442_v15 = vsel %vm1317_vm2, %v1265_v20, 0.0  ;;  %v6229_v16 = vpop.permute.xlu2 %746  ;;  %v6246_v20 = vld [vmem:[%s7931_s4 + $0x8] sm:$0xff]  ;;  %v832_v19 = vrot.slane %v5884_v34, 3 }
 0x2c7   :  { %7926 = vst [vmem:[#allocation53_spill] sm:$0xff] %v6229_v16  ;;  %1966 = vmatpush.msra.mxu1 %v6246_v20  ;;  %v833_v16 = vrot.slane %v5884_v34, 4 }
 0x2c8   :  { %v1007_v18 = vand.u32 2147483647, %v943_v5  ;;  %7932 = vst [vmem:[#allocation55_spill] sm:$0xff] %v6246_v20  ;;  %v6255_v5 = vld [vmem:[%s7931_s4] sm:$0xff] }
 0x2c9   :  { %1967 = vmatpush.msra.mxu1 %v6255_v5  ;;  %vm1311_vm3 = vcmp.gt.f32.partialorder %v6255_v5, 0.0 }
 0x2ca   :  { %v1263_v7 = vmul.f32 %v6000_v22, %v1007_v18 }
 0x2cc   :  { %v1440_v8 = vsel %vm1317_vm2, %v1263_v7, 0.0  ;;  %v7933_v7 = vperm.slane %v5916_v49, 4 }
 0x2cd   :  { %v1441_v50 = vadd.f32 %v1440_v8, %v1439_v14  ;;  %v7930_v14 = vperm.slane %v5905_v42, 7  ;;  %v858_v8 = vperm.slane %v5884_v34, 0 }
 0x2ce   :  { %5263 = vset.pattern.permute.xlu1 %v5913_v47  ;;  %5258 = vset.pattern.permute.xlu2 %v7927_v41 }
 0x2cf   :  { %v6233_v37 = vadd.f32 %v1442_v15, %v1441_v50  ;;  %1555 = vperm.xlu2 %5258, %v6106_v61   ;;  %v6239_v18 = vpop.permute.xlu2 %1223  ;;  %v830_v50 = vrot.slane %v5884_v34, 1 }
 0x2d0   :  { %7929 = vst [vmem:[#allocation54_spill] sm:$0xff] %v6239_v18 }
 0x2d1   :  { %v859_v30 = vperm.slane %v830_v50, 0  ;;  %v860_v50 = vperm.slane %v831_v2, 0  ;;  %v835_v2 = vrot.slane %v5884_v34, 6 }
 0x2d3   :  { %v924_v15 = vadd.f32 %v859_v30, %v6025_v40  ;;  %v926_v40 = vadd.f32 %v860_v50, %v6006_v24  ;;  %v6291_v22 = vperm.slane %v835_v2, 0 }
 0x2d5   :  { %v988_v41 = vand.u32 2147483647, %v924_v15  ;;  %v7937_v15 = vmov 1   ;;  %v990_v12 = vand.u32 2147483647, %v926_v40  ;;  %v934_v31 = vadd.f32 %v6291_v22, %v6046_v54 }
 0x2d6   :  { %798 = vperm.xlu1 %5263, %v7928_v46   ;;  %v7839_v46 = vmov 3   ;;  %v840_v54 = vrot.slane %v5888_v35, 4 }
 0x2d7   :  { %5260 = vset.pattern.permute.xlu2 %v5913_v47  ;;  %v6258_v42 = vpop.permute.xlu2 %1207  ;;  %v1244_v20 = vmul.f32 %v5953_v0, %v988_v41  ;;  %v1246_v23 = vmul.f32 %v5967_v6, %v990_v12 }
 0x2d8   :  { %7934 = vst [vmem:[#allocation56_spill] sm:$0xff] %v6258_v42 }
 0x2de   :  { %616 = vperm.xlu1 %5263, %v7930_v14   ;;  %v6267_v14 = vpop.permute.xlu1 %733 }
 0x2df   :  { %785 = vperm.xlu2 %5260, %v7933_v7   ;;  %7935 = vst [vmem:[#allocation57_spill] sm:$0xff] %v6267_v14  ;;  %v922_v7 = vadd.f32 %v858_v8, %v6012_v28  ;;  %v861_v14 = vperm.slane %v832_v19, 0  ;;  %v862_v28 = vperm.slane %v833_v16, 0  ;;  %v1319_v16 = vsel %vm1317_vm2, %v1244_v20, 0.0 }
 0x2e0   :  { %v1321_v20 = vsel %vm1317_vm2, %v1246_v23, 0.0 }
 0x2e6   :  { %5266 = vset.pattern.permute.xlu1 %v7839_v46  ;;  %v986_v46 = vand.u32 2147483647, %v922_v7  ;;  %v930_v7 = vadd.f32 %v862_v28, %v6034_v45  ;;  %v6288_v19 = vpop.permute.xlu1 %1163 }
 0x2e7   :  { %1657 = vperm.xlu1 %5266, %v6106_v61   ;;  %5262 = vset.pattern.permute.xlu2 %v7906_v27  ;;  %v6274_v18 = vpop.permute.xlu2 %759  ;;  %v5322_v61 = vld [vmem:[%s7880_s26 + $0x1f] ss:$0 sm:$0xff]  ;;  %s5646_s26 = smov 16  }
 0x2e8   :  { %1235 = vperm.xlu2 %5262, %v5321_v17   ;;  %7936 = vst [vmem:[#allocation58_spill] sm:$0xff] %v6274_v18  ;;  %v834_v17 = vrot.slane %v5884_v34, 5  ;;  %v928_v18 = vadd.f32 %v861_v14, %v6014_v29  ;;  %v1242_v24 = vmul.f32 %v5942_v58, %v986_v46  ;;  %v994_v29 = vand.u32 2147483647, %v930_v7 }
 0x2ea   :  { %v863_v41 = vperm.slane %v834_v17, 0  ;;  %v1318_v40 = vsel %vm1317_vm2, %v1242_v24, 0.0  ;;  %v1250_v12 = vmul.f32 %v5975_v10, %v994_v29 }
 0x2eb   :  { %v1320_v46 = vadd.f32 %v1319_v16, %v1318_v40  ;;  %v998_v16 = vand.u32 2147483647, %v934_v31  ;;  %v927_v31 = vadd.f32 %v860_v50, %v6030_v44  ;;  %v7938_v44 = vperm.slane %v5916_v49, 6 }
 0x2ec   :  { %v932_v45 = vadd.f32 %v863_v41, %v6095_v3  ;;  %v925_v3 = vadd.f32 %v859_v30, %v6022_v38  ;;  %v933_v50 = vadd.f32 %v863_v41, %v6059_v60  ;;  %v848_v60 = vrot.slane %v5890_v36, 5 }
 0x2ed   :  { %v1322_v2 = vadd.f32 %v1321_v20, %v1320_v46  ;;  %v849_v41 = vrot.slane %v5890_v36, 6 }
 0x2ee   :  { %v6306_v24 = vpop.permute.xlu1 %694  ;;  %v996_v7 = vand.u32 2147483647, %v932_v45  ;;  %v989_v30 = vand.u32 2147483647, %v925_v3  ;;  %v1254_v45 = vmul.f32 %v5965_v4, %v998_v16  ;;  %v850_v3 = vrot.slane %v5890_v36, 7 }
 0x2ef   :  { %5268 = vset.pattern.permute.xlu1 %v7937_v15  ;;  %v992_v15 = vand.u32 2147483647, %v928_v18  ;;  %v923_v18 = vadd.f32 %v858_v8, %v6040_v52  ;;  %v874_v16 = vperm.slane %v5890_v36, 0  ;;  %v997_v40 = vand.u32 2147483647, %v933_v50 }
 0x2f0   :  { %1457 = vperm.xlu1 %5268, %v6127_v55   ;;  %1239 = vperm.xlu2 %5262, %v5322_v61   ;;  %v6295_v42 = vpop.permute.xlu2 %1350  ;;  %v836_v61 = vrot.slane %v5884_v34, 7  ;;  %v1252_v38 = vmul.f32 %v5951_v63, %v996_v7  ;;  %v929_v7 = vadd.f32 %v861_v14, %v6056_v57  ;;  %v1329_v57 = vsel %vm1317_vm2, %v1254_v45, 0.0 }
 0x2f1   :  { %v1248_v17 = vmul.f32 %v5945_v59, %v992_v15  ;;  %v1325_v15 = vsel %vm1317_vm2, %v1250_v12, 0.0  ;;  %v987_v8 = vand.u32 2147483647, %v923_v18  ;;  %v6324_v12 = vperm.slane %v840_v54, 0 }
 0x2f2   :  { %v6309_v34 = vperm.slane %v836_v61, 0  ;;  %v845_v54 = vrot.slane %v5890_v36, 2 }
 0x2f3   :  { %v1323_v23 = vsel %vm1317_vm2, %v1248_v17, 0.0  ;;  %v846_v17 = vrot.slane %v5890_v36, 3 }
 0x2f4   :  { %v936_v52 = vadd.f32 %v6309_v34, %v6036_v48  ;;  %v1324_v29 = vadd.f32 %v1323_v23, %v1322_v2  ;;  %v844_v48 = vrot.slane %v5890_v36, 1  ;;  %v1243_v2 = vmul.f32 %v5942_v58, %v987_v8  ;;  %v6344_v8 = vpop.f32.mrf.mxu0 }
 0x2f5   :  { %v931_v23 = vadd.f32 %v862_v28, %v6043_v53  ;;  %v1245_v58 = vmul.f32 %v5953_v0, %v989_v30  ;;  %v991_v53 = vand.u32 2147483647, %v927_v31  ;;  %v847_v28 = vrot.slane %v5890_v36, 4 }
 0x2f6   :  { %v1326_v20 = vadd.f32 %v1325_v15, %v1324_v29  ;;  %v1000_v18 = vand.u32 2147483647, %v936_v52  ;;  %v6336_v15 = vpop.permute.xlu1 %610  ;;  %v1327_v52 = vsel %vm1317_vm2, %v1252_v38, 0.0  ;;  %v993_v38 = vand.u32 2147483647, %v929_v7 }
 0x2f7   :  { %7939 = vst [vmem:[#allocation59_spill] sm:$0xff] %v6336_v15  ;;  %v995_v46 = vand.u32 2147483647, %v931_v23  ;;  %v877_v30 = vperm.slane %v846_v17, 0  ;;  %v875_v31 = vperm.slane %v844_v48, 0  ;;  %v1334_v45 = vsel %vm1317_vm2, %v1245_v58, 0.0 }
 0x2f8   :  { %5265 = vset.pattern.permute.xlu2 %v5913_v47  ;;  %v6321_v61 = vpop.permute.xlu2 %1355  ;;  %v1328_v14 = vadd.f32 %v1327_v52, %v1326_v20  ;;  %v1256_v29 = vmul.f32 %v5973_v9, %v1000_v18  ;;  %v1247_v20 = vmul.f32 %v5967_v6, %v991_v53  ;;  %v935_v52 = vadd.f32 %v6291_v22, %v6068_v1 }
 0x2f9   :  { %v1358_v36 = vperm.slane %v6344_v8, 0  ;;  %v6353_v47 = vperm.slane %v850_v3, 0  ;;  %v954_v18 = vadd.f32 %v874_v16, %v6089_v21  ;;  %v1251_v17 = vmul.f32 %v5975_v10, %v995_v46 }
 0x2fa   :  { %v1330_v0 = vadd.f32 %v1329_v57, %v1328_v14  ;;  %v1331_v23 = vsel %vm1317_vm2, %v1256_v29, 0.0  ;;  %v1249_v48 = vmul.f32 %v5945_v59, %v993_v38  ;;  %v878_v7 = vperm.slane %v847_v28, 0 }
 0x2fb   :  { %v7940_v6 = vperm.slane %v5916_v49, 7  ;;  %v1253_v22 = vmul.f32 %v5951_v63, %v997_v40  ;;  %v956_v1 = vadd.f32 %v875_v31, %v6099_v39  ;;  %v879_v3 = vperm.slane %v848_v60, 0 }
 0x2fc   :  { %v1332_v58 = vadd.f32 %v1331_v23, %v1330_v0  ;;  %v1336_v21 = vsel %vm1317_vm2, %v1247_v20, 0.0  ;;  %v1359_v59 = vadd.f32 %v1358_v36, %v6295_v42  ;;  %v1018_v46 = vand.u32 2147483647, %v954_v18  ;;  %v7946_v23 = vld [vmem:[#allocation47_spill] sm:$0xff] }
 0x2fd   :  { %v957_v49 = vadd.f32 %v875_v31, %v6122_v43  ;;  %v880_v57 = vperm.slane %v849_v41, 0  ;;  %v6374_v63 = vsel %vm1317_vm2, %v1251_v17, 0.0  ;;  %v1338_v39 = vsel %vm1317_vm2, %v1249_v48, 0.0 }
 0x2fe   :  { %v6371_v14 = vpop.permute.xlu1 %805  ;;  %v955_v40 = vadd.f32 %v874_v16, %v6124_v11  ;;  %v7941_v28 = vlaneseq  ;;  %v6382_v60 = vsel %vm1317_vm2, %v1253_v22, 0.0  ;;  %v1020_v42 = vand.u32 2147483647, %v956_v1 }
 0x2ff   :  { %v1363_v41 = vmul.f32 0.4, %v1332_v58  ;;  %v1361_v0 = vmul.f32 0.6, %v1359_v59  ;;  %v961_v16 = vadd.f32 %v877_v30, %v6188_v26  ;;  %v1274_v31 = vmul.f32 %v5981_v13, %v1018_v46 }
 0x300   :  { %811 = vperm.xlu2 %5265, %v7938_v44   ;;  %v1333_v44 = vsel %vm1317_vm2, %v1243_v2, 0.0  ;;  %v876_v2 = vperm.slane %v845_v54, 0  ;;  %v6359_v50 = vpop.permute.xlu2 %1167  ;;  %v999_v54 = vand.u32 2147483647, %v935_v52  ;;  %v1019_v20 = vand.u32 2147483647, %v955_v40 }
 0x301   :  { %v1335_v15 = vadd.f32 %v1334_v45, %v1333_v44  ;;  %v960_v44 = vadd.f32 %v877_v30, %v6113_v51  ;;  %v1021_v45 = vand.u32 2147483647, %v957_v49  ;;  %v962_v52 = vadd.f32 %v878_v7, %v6110_v32  ;;  %v7945_v32 = vld [vmem:[#allocation27_spill] sm:$0xff]  ;;  %v7951_v49 = vld [vmem:[#allocation33_spill] sm:$0xff] }
 0x302   :  { %v958_v53 = vadd.f32 %v876_v2, %v6097_v56  ;;  %v6379_v56 = vand.u32 127, %v7941_v28  ;;  %v959_v43 = vadd.f32 %v876_v2, %v6138_v25  ;;  %v6388_v29 = vmul.f32 %v5965_v4, %v999_v54  ;;  %v7944_v4 = vld [vmem:[#allocation18_spill] sm:$0xff] }
 0x303   :  { %v1337_v10 = vadd.f32 %v1336_v21, %v1335_v15  ;;  %v6384_v15 = vpop.permute.xlu0 %720  ;;  %v7943_v18 = vmov 3   ;;  %v6400_v51 = vadd.f32 %v6309_v34, %v6066_v62  ;;  %v1276_v26 = vmul.f32 %v7944_v4, %v1020_v42  ;;  %v7948_v34 = vld [vmem:[#allocation49_spill] sm:$0xff] }
 0x304   :  { %7942 = vst [vmem:[#allocation60_spill] sm:$0xff] %v6379_v56  ;;  %v1022_v38 = vand.u32 2147483647, %v958_v53  ;;  %vm1313_vm4 = vcmp.eq.s32.totalorder %v5879_v33, %v6379_v56  ;;  %v1023_v30 = vand.u32 2147483647, %v959_v43  ;;  %v6407_v17 = vadd.f32 %v7946_v23, %v7945_v32  ;;  %v7952_v43 = vld [vmem:[#allocation19_spill] sm:$0xff] }
 0x305   :  { %v1339_v11 = vadd.f32 %v1338_v39, %v1337_v10  ;;  %v1024_v48 = vand.u32 2147483647, %v960_v44  ;;  %v1365_v1 = vadd.f32 %v1363_v41, %v1361_v0  ;;  %v1524_v58 = vsel %vm1317_vm2, %v1274_v31, 0.0  ;;  %vm6418_vm5 = vmor %vm1311_vm3, %vm1313_vm4 }
 0x306   :  { %v1277_v62 = vmul.f32 %v7944_v4, %v1021_v45  ;;  %v963_v21 = vadd.f32 %v878_v7, %v7948_v34  ;;  %v1025_v59 = vand.u32 2147483647, %v961_v16  ;;  %v1275_v10 = vmul.f32 %v5981_v13, %v1019_v20  ;;  %v7954_v4 = vld [vmem:[#allocation37_spill] sm:$0xff] }
 0x307   :  { %v1026_v46 = vand.u32 2147483647, %v962_v52  ;;  %v964_v39 = vadd.f32 %v879_v3, %v7951_v49  ;;  %v1525_v40 = vsel %vm1317_vm2, %v1276_v26, 0.0  ;;  %v965_v28 = vadd.f32 %v879_v3, %v6306_v24  ;;  %v7953_v3 = vld [vmem:[#allocation21_spill] sm:$0xff] }
 0x308   :  { %824 = vperm.xlu2 %5265, %v7940_v6   ;;  %v7947_v6 = vld [vmem:[#allocation20_spill] sm:$0xff]  ;;  %v1280_v5 = vmul.f32 %v7952_v43, %v1024_v48  ;;  %v1526_v41 = vadd.f32 %v1525_v40, %v1524_v58  ;;  %v1540_v0 = vsel %vm1317_vm2, %v1277_v62, 0.0  ;;  %v1027_v16 = vand.u32 2147483647, %v963_v21  ;;  %v7956_v58 = vld [vmem:[#allocation42_spill] sm:$0xff] }
 0x309   :  { %v1278_v22 = vmul.f32 %v7947_v6, %v1022_v38  ;;  %v1279_v7 = vmul.f32 %v7947_v6, %v1023_v30  ;;  %v6432_v38 = vsel %vm6418_vm5, %v1365_v1, -1e+30  ;;  %v1539_v24 = vsel %vm1317_vm2, %v1275_v10, 0.0  ;;  %v7955_v1 = vld [vmem:[#allocation43_spill] sm:$0xff] }
 0x30a   :  { %v1282_v20 = vmul.f32 %v7953_v3, %v1026_v46  ;;  %v1028_v52 = vand.u32 2147483647, %v964_v39  ;;  %v966_v26 = vadd.f32 %v880_v57, %v7954_v4  ;;  %v1369_v32 = vsel %vm1317_vm2, %v6432_v38, -inf }
 0x30b   :  { %v1527_v44 = vsel %vm1317_vm2, %v1278_v22, 0.0  ;;  %v6434_v13 = vpop.permute.xlu0 %603  ;;  %v1542_v30 = vsel %vm1317_vm2, %v1279_v7, 0.0  ;;  %v1341_v23 = vadd.f32 %v6374_v63, %v1339_v11  ;;  %v1281_v48 = vmul.f32 %v7952_v43, %v1025_v59  ;;  %v7959_v63 = vld [vmem:[#allocation28_spill] sm:$0xff]  ;;  %v7960_v11 = vld [vmem:[#allocation51_spill] sm:$0xff] }
 0x30c   :  { %v1528_v6 = vadd.f32 %v1527_v44, %v1526_v41  ;;  %v1541_v22 = vadd.f32 %v1540_v0, %v1539_v24  ;;  %v1283_v62 = vmul.f32 %v7953_v3, %v1027_v16  ;;  %v1001_v21 = vand.u32 2147483647, %v6400_v51 }
 0x30d   :  { %v942_v59 = vadd.f32 %v7960_v11, %v7959_v63  ;;  %v1529_v49 = vsel %vm1317_vm2, %v1280_v5, 0.0  ;;  %v1531_v39 = vsel %vm1317_vm2, %v1282_v20, 0.0  ;;  %v1030_v40 = vand.u32 2147483647, %v966_v26  ;;  %v7968_v11 = vld [vmem:[#allocation23_spill] sm:$0xff] }
 0x30e   :  { %v708_v54 = vpop.permute.xlu1 %707  ;;  %v1543_v46 = vadd.f32 %v1542_v30, %v1541_v22  ;;  %v1544_v51 = vsel %vm1317_vm2, %v1281_v48, 0.0  ;;  %v969_v43 = vadd.f32 %v6353_v47, %v6384_v15  ;;  %v1530_v41 = vadd.f32 %v1529_v49, %v1528_v6  ;;  %v7962_v15 = vld [vmem:[#allocation56_spill] sm:$0xff] }
 0x30f   :  { %v967_v31 = vadd.f32 %v880_v57, %v708_v54  ;;  %v968_v57 = vadd.f32 %v6353_v47, %v7956_v58  ;;  %v7957_v54 = vld [vmem:[#allocation26_spill] sm:$0xff]  ;;  %v1546_v5 = vsel %vm1317_vm2, %v1283_v62, 0.0  ;;  %v1006_v4 = vand.u32 2147483647, %v942_v59 }
 0x310   :  { %5269 = vset.pattern.permute.xlu2 %v7943_v18  ;;  %v578_v25 = vpop.permute.xlu2 %577  ;;  %v1532_v3 = vadd.f32 %v1531_v39, %v1530_v41  ;;  %v1545_v20 = vadd.f32 %v1544_v51, %v1543_v46  ;;  %v1257_v48 = vmul.f32 %v5973_v9, %v1001_v21  ;;  %v7966_v62 = vld [vmem:[#allocation50_spill] sm:$0xff]  ;;  %vm1882_vm12 = vcmp.lt.s32.totalorder %v5879_v33, %v6379_v56 }
 0x311   :  { %v947_v2 = vadd.f32 %v6324_v12, %v578_v25  ;;  %1661 = vperm.xlu2 %5269, %v6127_v55   ;;  %v1031_v34 = vand.u32 2147483647, %v967_v31  ;;  %v1032_v0 = vand.u32 2147483647, %v968_v57  ;;  %v7961_v31 = vld [vmem:[#allocation38_spill] sm:$0xff]  ;;  %v7965_v57 = vld [vmem:[#allocation29_spill] sm:$0xff]  ;;  %v1262_v59 = vmul.f32 %v7968_v11, %v1006_v4 }
 0x312   :  { %v1286_v47 = vmul.f32 %v7961_v31, %v1030_v40  ;;  %v1547_v22 = vadd.f32 %v1546_v5, %v1545_v20  ;;  %v1346_v46 = vsel %vm1317_vm2, %v1257_v48, 0.0  ;;  %v7969_v40 = vld [vmem:[#allocation31_spill] sm:$0xff] }
 0x313   :  { %v1011_v53 = vand.u32 2147483647, %v947_v2  ;;  %v1029_v2 = vand.u32 2147483647, %v965_v28  ;;  %v6471_v16 = vpop.permute.xlu0 %1453  ;;  %v1288_v26 = vmul.f32 %v7962_v15, %v1032_v0 }
 0x314   :  { %v1535_v9 = vsel %vm1317_vm2, %v1286_v47, 0.0 }
 0x315   :  { %v1267_v42 = vmul.f32 %v6288_v19, %v1011_v53  ;;  %v7958_v53 = vperm.slane %v5888_v35, 0  ;;  %v1285_v7 = vmul.f32 %v7955_v1, %v1029_v2  ;;  %v7963_v2 = vrot.slane %v5888_v35, 5 }
 0x316   :  { %v6463_v28 = vpop.permute.xlu1 %772 }
 0x317   :  { %v1444_v45 = vsel %vm1317_vm2, %v1267_v42, 0.0  ;;  %v938_v10 = vadd.f32 %v7958_v53, %v7957_v54  ;;  %v1004_v42 = vand.u32 2147483647, %v6407_v17  ;;  %v1343_v17 = vadd.f32 %v6382_v60, %v1341_v23  ;;  %v7967_v54 = vld [vmem:[#allocation22_spill] sm:$0xff] }
 0x318   :  { %v6441_v25 = vadd.f32 %v1444_v45, %v6233_v37  ;;  %v1284_v37 = vmul.f32 %v7955_v1, %v1028_v52  ;;  %v1287_v45 = vmul.f32 %v7961_v31, %v1031_v34  ;;  %v1548_v30 = vsel %vm1317_vm2, %v1285_v7, 0.0 }
 0x319   :  { %5270 = vset.pattern.permute.xlu2 %v7906_v27  ;;  %v1002_v24 = vand.u32 2147483647, %v938_v10  ;;  %v1344_v1 = vsel %vm1317_vm2, %v6388_v29, 0.0  ;;  %v1033_v60 = vand.u32 2147483647, %v969_v43  ;;  %v944_v34 = vadd.f32 %v7966_v62, %v7965_v57 }
 0x31a   :  { %1370 = vmax.xlane.f32.xlu1 %v1369_v32  ;;  %v1533_v44 = vsel %vm1317_vm2, %v1284_v37, 0.0  ;;  %v871_v32 = vperm.slane %v7963_v2, 0  ;;  %v7964_v37 = vld [vmem:[#allocation35_spill] sm:$0xff]  ;;  %v1550_v23 = vsel %vm1317_vm2, %v1287_v45, 0.0  ;;  %v1549_v10 = vadd.f32 %v1548_v30, %v1547_v22 }
 0x31b   :  { %v1534_v6 = vadd.f32 %v1533_v44, %v1532_v3  ;;  %v1260_v58 = vmul.f32 %v7964_v37, %v1004_v42  ;;  %v1258_v53 = vmul.f32 %v7967_v54, %v1002_v24  ;;  %v1345_v63 = vadd.f32 %v1344_v1, %v1343_v17  ;;  %v7970_v42 = vld [vmem:[#allocation30_spill] sm:$0xff]  ;;  %v1560_v17 = vpop.permute.xlu0 %1559  ;;  %v7973_v1 = vld [vmem:[#allocation52_spill] sm:$0xff] }
 0x31c   :  { %v1289_v21 = vmul.f32 %v7962_v15, %v1033_v60  ;;  %v1537_v29 = vsel %vm1317_vm2, %v1288_v26, 0.0  ;;  %v1551_v49 = vadd.f32 %v1550_v23, %v1549_v10  ;;  %v948_v7 = vadd.f32 %v871_v32, %v7969_v40 }
 0x31d   :  { %v1536_v39 = vadd.f32 %v1535_v9, %v1534_v6  ;;  %v946_v51 = vadd.f32 %v6324_v12, %v7970_v42  ;;  %v7971_v43 = vrot.slane %v5888_v35, 6  ;;  %v1423_v0 = vsel %vm1317_vm2, %v1260_v58, 0.0  ;;  %v7972_v6 = vld [vmem:[#allocation46_spill] sm:$0xff] }
 0x31e   :  { %v1422_v5 = vsel %vm1317_vm2, %v1258_v53, 0.0  ;;  %v1562_v31 = vperm.slane %v6344_v8, 2  ;;  %v1008_v24 = vand.u32 2147483647, %v944_v34  ;;  %v1425_v3 = vsel %vm1317_vm2, %v1262_v59, 0.0 }
 0x31f   :  { %v872_v41 = vperm.slane %v7971_v43, 0  ;;  %v6500_v44 = vpop.permute.xlu1 %1231  ;;  %v1538_v45 = vadd.f32 %v1537_v29, %v1536_v39  ;;  %v1552_v20 = vsel %vm1317_vm2, %v1289_v21, 0.0  ;;  %v1347_v12 = vadd.f32 %v1346_v46, %v1345_v63  ;;  %v7974_v21 = vld [vmem:[#allocation55_spill] sm:$0xff] }
 0x320   :  { %v6474_v52 = vpop.permute.xlu2 %818  ;;  %v1360_v15 = vadd.f32 %v1358_v36, %v6321_v61  ;;  %v1553_v30 = vadd.f32 %v1552_v20, %v1551_v49  ;;  %v1010_v2 = vand.u32 2147483647, %v946_v51  ;;  %v1424_v48 = vadd.f32 %v1423_v0, %v1422_v5  ;;  %v7977_v0 = vld [vmem:[#allocation59_spill] sm:$0xff] }
 0x321   :  { %v951_v47 = vadd.f32 %v872_v41, %v6434_v13  ;;  %v1264_v22 = vmul.f32 %v7972_v6, %v1008_v24  ;;  %v950_v37 = vadd.f32 %v872_v41, %v7973_v1  ;;  %v843_v58 = vrot.slane %v5888_v35, 7  ;;  %v7980_v24 = vld [vmem:[#allocation44_spill] sm:$0xff] }
 0x322   :  { %v1564_v60 = vadd.f32 %v1562_v31, %v1560_v17  ;;  %v1567_v57 = vmul.f32 0.4, %v1538_v45  ;;  %v1012_v62 = vand.u32 2147483647, %v948_v7  ;;  %v1426_v34 = vadd.f32 %v1425_v3, %v1424_v48 }
 0x323   :  { %v1266_v13 = vmul.f32 %v6288_v19, %v1010_v2  ;;  %v1364_v54 = vmul.f32 0.4, %v1347_v12  ;;  %v1015_v53 = vand.u32 2147483647, %v951_v47  ;;  %v1362_v61 = vmul.f32 0.6, %v1360_v15 }
 0x324   :  { %v1568_v10 = vmul.f32 0.4, %v1553_v30  ;;  %v1427_v63 = vsel %vm1317_vm2, %v1264_v22, 0.0  ;;  %v1014_v11 = vand.u32 2147483647, %v950_v37  ;;  %v1268_v59 = vmul.f32 %v6359_v50, %v1012_v62  ;;  %v7975_v19 = vld [vmem:[#allocation17_spill] sm:$0xff] }
 0x325   :  { %vm1312_vm6 = vcmp.gt.f32.partialorder %v7974_v21, 0.0  ;;  %v1566_v35 = vmul.f32 0.6, %v1564_v60  ;;  %vm1314_vm7 = vcmp.eq.s32.totalorder %v7975_v19, %v6379_v56  ;;  %v1429_v49 = vsel %vm1317_vm2, %v1266_v13, 0.0 }
 0x326   :  { %v6525_v39 = vperm.slane %v843_v58, 0  ;;  %v1428_v7 = vadd.f32 %v1427_v63, %v1426_v34  ;;  %v1366_v51 = vadd.f32 %v1364_v54, %v1362_v61  ;;  %vm6535_vm8 = vmor %vm1312_vm6, %vm1314_vm7  ;;  %v1271_v3 = vmul.f32 %v7980_v24, %v1015_v53  ;;  %v7981_v53 = vld [vmem:[#allocation36_spill] sm:$0xff] }
 0x327   :  { %v1570_v43 = vadd.f32 %v1568_v10, %v1566_v35  ;;  %v1270_v20 = vmul.f32 %v7980_v24, %v1014_v11  ;;  %v1460_v12 = vperm.slane %v6344_v8, 1  ;;  %v7982_v63 = vld [vmem:[#allocation40_spill] sm:$0xff] }
 0x328   :  { %v952_v5 = vadd.f32 %v6525_v39, %v7977_v0  ;;  %v1430_v17 = vadd.f32 %v1429_v49, %v1428_v7  ;;  %v1448_v6 = vsel %vm1317_vm2, %v1271_v3, 0.0  ;;  %v7983_v49 = vld [vmem:[#allocation39_spill] sm:$0xff] }
 0x329   :  { %v1556_v4 = vpop.permute.xlu2 %1555  ;;  %v6550_v30 = vsel %vm6535_vm8, %v1570_v43, -1e+30  ;;  %v1433_v1 = vsel %vm1317_vm2, %v1270_v20, 0.0 }
 0x32a   :  { %v1563_v26 = vadd.f32 %v1562_v31, %v1556_v4  ;;  %v1431_v31 = vsel %vm1317_vm2, %v1268_v59, 0.0  ;;  %v1016_v2 = vand.u32 2147483647, %v952_v5 }
 0x32b   :  { %v1432_v47 = vadd.f32 %v1431_v31, %v1430_v17  ;;  %v7985_v31 = vld [vmem:[#allocation25_spill] sm:$0xff] }
 0x32c   :  { %v1565_v23 = vmul.f32 0.6, %v1563_v26  ;;  %v6546_v26 = vsel %vm6535_vm8, %v1366_v51, -1e+30 }
 0x32d   :  { %v1372_v60 = vsel %vm1317_vm2, %v6546_v26, -inf  ;;  %v1434_v34 = vadd.f32 %v1433_v1, %v1432_v47 }
 0x32e   :  { %v1569_v36 = vadd.f32 %v1567_v57, %v1565_v23  ;;  %v1576_v23 = vsel %vm1317_vm2, %v6550_v30, -inf }
 0x32f   :  { %v591_v9 = vpop.permute.xlu1 %590 }
 0x330   :  { %v949_v29 = vadd.f32 %v871_v32, %v591_v9  ;;  %v6520_v46 = vsel %vm6418_vm5, %v1569_v36, -1e+30  ;;  %v7976_v32 = vld [vmem:[#allocation16_spill] sm:$0xff] }
 0x331   :  { %v1573_v40 = vsel %vm1317_vm2, %v6520_v46, -inf  ;;  %v851_v41 = vrot.slane %v7976_v32, 1  ;;  %v853_v13 = vrot.slane %v7976_v32, 3  ;;  %v882_v54 = vperm.slane %v7976_v32, 0 }
 0x332   :  { %v1013_v42 = vand.u32 2147483647, %v949_v29  ;;  %1574 = vmax.xlane.f32.xlu0 %v1573_v40  ;;  %v855_v43 = vrot.slane %v7976_v32, 5  ;;  %v856_v20 = vrot.slane %v7976_v32, 6 }
 0x333   :  { %v6554_v22 = vperm.slane %v851_v41, 0  ;;  %v970_v11 = vadd.f32 %v882_v54, %v7982_v63  ;;  %v885_v35 = vperm.slane %v853_v13, 0  ;;  %v7990_v13 = vld [vmem:[#allocation54_spill] sm:$0xff] }
 0x334   :  { %v1269_v4 = vmul.f32 %v6359_v50, %v1013_v42  ;;  %v852_v50 = vrot.slane %v7976_v32, 2  ;;  %v7984_v42 = vld [vmem:[#allocation32_spill] sm:$0xff] }
 0x335   :  { %v972_v61 = vadd.f32 %v6554_v22, %v7981_v53  ;;  %v976_v51 = vadd.f32 %v885_v35, %v7984_v42  ;;  %v1034_v41 = vand.u32 2147483647, %v970_v11 }
 0x336   :  { %v1446_v15 = vsel %vm1317_vm2, %v1269_v4, 0.0  ;;  %v884_v59 = vperm.slane %v852_v50, 0  ;;  %v7986_v4 = vld [vmem:[#allocation45_spill] sm:$0xff]  ;;  %v7987_v50 = vld [vmem:[#allocation24_spill] sm:$0xff] }
 0x337   :  { %v1447_v48 = vadd.f32 %v1446_v15, %v6441_v25  ;;  %v1461_v25 = vadd.f32 %v1460_v12, %v6471_v16  ;;  %v854_v16 = vrot.slane %v7976_v32, 4  ;;  %v1036_v29 = vand.u32 2147483647, %v972_v61 }
 0x338   :  { %v6558_v37 = vpop.permute.xlu1 %1175  ;;  %v974_v40 = vadd.f32 %v884_v59, %v7983_v49  ;;  %v857_v15 = vrot.slane %v7976_v32, 7  ;;  %v1290_v1 = vmul.f32 %v7987_v50, %v1034_v41  ;;  %v888_v61 = vperm.slane %v856_v20, 0 }
 0x339   :  { %v1272_v58 = vmul.f32 %v6558_v37, %v1016_v2  ;;  %v6565_v57 = vadd.f32 %v1448_v6, %v1447_v48  ;;  %v6570_v62 = vpop.permute.xlu2 %785  ;;  %v1463_v9 = vmul.f32 0.6, %v1461_v25  ;;  %v886_v0 = vperm.slane %v854_v16, 0 }
 0x33a   :  { %1373 = vmax.xlane.f32.xlu2 %v1372_v60  ;;  %1577 = vmax.xlane.f32.xlu0 %v1576_v23  ;;  %v1292_v24 = vmul.f32 %v7985_v31, %v1036_v29  ;;  %v1038_v3 = vand.u32 2147483647, %v974_v40  ;;  %v1040_v48 = vand.u32 2147483647, %v976_v51  ;;  %v887_v6 = vperm.slane %v855_v43, 0  ;;  %v7989_v23 = vld [vmem:[#allocation34_spill] sm:$0xff] }
 0x33b   :  { %v1435_v36 = vsel %vm1317_vm2, %v1272_v58, 0.0  ;;  %v978_v47 = vadd.f32 %v886_v0, %v7986_v4  ;;  %v7988_v58 = vld [vmem:[#allocation48_spill] sm:$0xff]  ;;  %v1626_v32 = vsel %vm1317_vm2, %v1290_v1, 0.0  ;;  %v982_v11 = vadd.f32 %v888_v61, %v6371_v14  ;;  %v7991_v40 = vld [vmem:[#allocation41_spill] sm:$0xff] }
 0x33c   :  { %v1436_v10 = vadd.f32 %v1435_v36, %v1434_v34  ;;  %v1294_v60 = vmul.f32 %v7988_v58, %v1038_v3  ;;  %v980_v25 = vadd.f32 %v887_v6, %v7989_v23  ;;  %v1627_v34 = vsel %vm1317_vm2, %v1292_v24, 0.0  ;;  %v7992_v3 = vld [vmem:[#allocation57_spill] sm:$0xff] }
 0x33d   :  { %v1296_v53 = vmul.f32 %v7990_v13, %v1040_v48  ;;  %v1042_v36 = vand.u32 2147483647, %v978_v47  ;;  %v6602_v16 = vperm.slane %v857_v15, 0  ;;  %v1046_v51 = vand.u32 2147483647, %v982_v11  ;;  %v7993_v47 = vld [vmem:[#allocation53_spill] sm:$0xff] }
 0x33e   :  { %v1465_v21 = vmul.f32 0.4, %v1436_v10  ;;  %v1629_v63 = vsel %vm1317_vm2, %v1294_v60, 0.0  ;;  %v971_v14 = vadd.f32 %v882_v54, %v7992_v3  ;;  %v973_v15 = vadd.f32 %v6554_v22, %v7993_v47  ;;  %v7994_v48 = vld [vmem:[#allocation58_spill] sm:$0xff] }
 0x33f   :  { %v1631_v29 = vsel %vm1317_vm2, %v1296_v53, 0.0  ;;  %v984_v49 = vadd.f32 %v6602_v16, %v6474_v52  ;;  %v975_v1 = vadd.f32 %v884_v59, %v7994_v48  ;;  %v977_v54 = vadd.f32 %v885_v35, %v6463_v28 }
 0x340   :  { %v1467_v7 = vadd.f32 %v1465_v21, %v1463_v9  ;;  %v1628_v9 = vadd.f32 %v1627_v34, %v1626_v32  ;;  %v1044_v21 = vand.u32 2147483647, %v980_v25  ;;  %v1035_v53 = vand.u32 2147483647, %v971_v14 }
 0x341   :  { %v1048_v20 = vand.u32 2147483647, %v984_v49  ;;  %v979_v22 = vadd.f32 %v886_v0, %v6570_v62  ;;  %v1664_v28 = vperm.slane %v6344_v8, 3 }
 0x342   :  { %v6584_v5 = vsel %vm6418_vm5, %v1467_v7, -1e+30  ;;  %v6592_v2 = vpop.permute.xlu2 %1235  ;;  %v1298_v7 = vmul.f32 %v7991_v40, %v1042_v36  ;;  %v1630_v42 = vadd.f32 %v1629_v63, %v1628_v9  ;;  %v1300_v43 = vmul.f32 %v6500_v44, %v1044_v21 }
 0x343   :  { %v1471_v17 = vsel %vm1317_vm2, %v6584_v5, -inf  ;;  %v1037_v63 = vand.u32 2147483647, %v973_v15  ;;  %v1039_v9 = vand.u32 2147483647, %v975_v1  ;;  %v1291_v49 = vmul.f32 %v7987_v50, %v1035_v53 }
 0x344   :  { %1472 = vmax.xlane.f32.xlu2 %v1471_v17  ;;  %v1632_v41 = vadd.f32 %v1631_v29, %v1630_v42  ;;  %v1302_v17 = vmul.f32 %v6592_v2, %v1046_v51  ;;  %v1633_v4 = vsel %vm1317_vm2, %v1298_v7, 0.0  ;;  %v1635_v60 = vsel %vm1317_vm2, %v1300_v43, 0.0 }
 0x345   :  { %v1293_v43 = vmul.f32 %v7985_v31, %v1037_v63  ;;  %v1295_v62 = vmul.f32 %v7988_v58, %v1039_v9  ;;  %v1043_v0 = vand.u32 2147483647, %v979_v22  ;;  %v1641_v14 = vsel %vm1317_vm2, %v1291_v49, 0.0 }
 0x346   :  { %v1634_v34 = vadd.f32 %v1633_v4, %v1632_v41  ;;  %v1637_v36 = vsel %vm1317_vm2, %v1302_v17, 0.0 }
 0x347   :  { %v1642_v4 = vsel %vm1317_vm2, %v1293_v43, 0.0  ;;  %v1299_v31 = vmul.f32 %v7991_v40, %v1043_v0 }
 0x348   :  { %v799_v10 = vpop.permute.xlu1 %798  ;;  %v1636_v11 = vadd.f32 %v1635_v60, %v1634_v34  ;;  %v1643_v58 = vadd.f32 %v1642_v4, %v1641_v14 }
 0x349   :  { %v981_v7 = vadd.f32 %v887_v6, %v799_v10 }
 0x34a   :  { %v6609_v24 = vpop.permute.xlu2 %1239  ;;  %v1638_v29 = vadd.f32 %v1637_v36, %v1636_v11 }
 0x34b   :  { %v1304_v23 = vmul.f32 %v6609_v24, %v1048_v20  ;;  %v1045_v6 = vand.u32 2147483647, %v981_v7 }
 0x34d   :  { %v1639_v59 = vsel %vm1317_vm2, %v1304_v23, 0.0  ;;  %v1301_v48 = vmul.f32 %v6500_v44, %v1045_v6 }
 0x34e   :  { %v1640_v35 = vadd.f32 %v1639_v59, %v1638_v29 }
 0x34f   :  { %v1650_v53 = vsel %vm1317_vm2, %v1301_v48, 0.0 }
 0x350   :  { %v617_v52 = vpop.permute.xlu1 %616  ;;  %v1669_v17 = vmul.f32 0.4, %v1640_v35 }
 0x351   :  { %v953_v25 = vadd.f32 %v6525_v39, %v617_v52  ;;  %v1041_v39 = vand.u32 2147483647, %v977_v54 }
 0x353   :  { %v1017_v32 = vand.u32 2147483647, %v953_v25  ;;  %v1297_v50 = vmul.f32 %v7990_v13, %v1041_v39 }
 0x355   :  { %v1273_v21 = vmul.f32 %v6558_v37, %v1017_v32  ;;  %v1646_v52 = vsel %vm1317_vm2, %v1297_v50, 0.0 }
 0x357   :  { %v1450_v42 = vsel %vm1317_vm2, %v1273_v21, 0.0 }
 0x358   :  { %v1451_v51 = vadd.f32 %v1450_v42, %v6565_v57  ;;  %v1644_v57 = vsel %vm1317_vm2, %v1295_v62, 0.0 }
 0x359   :  { %v1658_v41 = vpop.permute.xlu1 %1657  ;;  %v1645_v1 = vadd.f32 %v1644_v57, %v1643_v58 }
 0x35a   :  { %v1665_v3 = vadd.f32 %v1664_v28, %v1658_v41  ;;  %v812_v37 = vpop.permute.xlu2 %811  ;;  %v1466_v36 = vmul.f32 0.4, %v1451_v51 }
 0x35b   :  { %v983_v10 = vadd.f32 %v888_v61, %v812_v37  ;;  %v1648_v61 = vsel %vm1317_vm2, %v1299_v31, 0.0  ;;  %v1647_v40 = vadd.f32 %v1646_v52, %v1645_v1 }
 0x35c   :  { %v1667_v20 = vmul.f32 0.6, %v1665_v3 }
 0x35d   :  { %v1047_v47 = vand.u32 2147483647, %v983_v10  ;;  %v1649_v54 = vadd.f32 %v1648_v61, %v1647_v40 }
 0x35e   :  { %v1671_v15 = vadd.f32 %v1669_v17, %v1667_v20 }
 0x35f   :  { %v1303_v60 = vmul.f32 %v6592_v2, %v1047_v47  ;;  %v1651_v11 = vadd.f32 %v1650_v53, %v1649_v54 }
 0x360   :  { %v6640_v13 = vsel %vm6418_vm5, %v1671_v15, -1e+30  ;;  %vm1883_vm5 = vcmp.lt.s32.totalorder %v7975_v19, %v6379_v56 }
 0x361   :  { %v1675_v23 = vsel %vm1317_vm2, %v6640_v13, -inf  ;;  %v1652_v32 = vsel %vm1317_vm2, %v1303_v60, 0.0 }
 0x362   :  { %v1458_v25 = vpop.permute.xlu1 %1457  ;;  %1676 = vmax.xlane.f32.xlu1 %v1675_v23  ;;  %v825_v34 = vpop.permute.xlu2 %824  ;;  %v1653_v59 = vadd.f32 %v1652_v32, %v1651_v11 }
 0x363   :  { %v1462_v44 = vadd.f32 %v1460_v12, %v1458_v25  ;;  %v985_v55 = vadd.f32 %v6602_v16, %v825_v34 }
 0x365   :  { %v1464_v63 = vmul.f32 0.6, %v1462_v44  ;;  %v1049_v2 = vand.u32 2147483647, %v985_v55 }
 0x367   :  { %v1305_v9 = vmul.f32 %v6609_v24, %v1049_v2  ;;  %v1468_v22 = vadd.f32 %v1466_v36, %v1464_v63 }
 0x369   :  { %v1654_v21 = vsel %vm1317_vm2, %v1305_v9, 0.0  ;;  %v1470_v29 = vsel %vm6535_vm8, %v1468_v22, -1e+30 }
 0x36a   :  { %v1474_v8 = vsel %vm1317_vm2, %v1470_v29, -inf  ;;  %v1655_v12 = vadd.f32 %v1654_v21, %v1653_v59 }
 0x36b   :  { %1475 = vmax.xlane.f32.xlu2 %v1474_v8  ;;  %v1662_v16 = vpop.permute.xlu2 %1661 }
 0x36c   :  { %v1666_v49 = vadd.f32 %v1664_v28, %v1662_v16  ;;  %v1670_v7 = vmul.f32 0.4, %v1655_v12 }
 0x36e   :  { %v1668_v39 = vmul.f32 0.6, %v1666_v49 }
 0x370   :  { %v1672_v42 = vadd.f32 %v1670_v7, %v1668_v39 }
 0x372   :  { %v1674_v35 = vsel %vm6535_vm8, %v1672_v42, -1e+30 }
 0x373   :  { %v1678_v24 = vsel %vm1317_vm2, %v1674_v35, -inf }
 0x374   :  { %1679 = vmax.xlane.f32.xlu1 %v1678_v24 }
 0x38d   :  { %v1371_v51 = vpop.xlane.xlu1 %1370 }
 0x38e   :  { %v1375_v43 = vsub.f32 %v6432_v38, %v1371_v51 }
 0x390   :  { %v1377_v62 = vmul.f32 1.442695, %v1375_v43 }
 0x392   :  { %5390 = vpow2.f32 %v1377_v62 }
 0x398   :  { %v5391_v0 = vpop.eup %5390 }
 0x399   :  { %v1381_v41 = vsel %vm1317_vm2, %v5391_v0, 0.0 }
 0x39a   :  { %1382 = vadd.xlane.f32.xlu0 %v1381_v41 }
 0x3a5   :  { %v1575_v3 = vpop.xlane.xlu0 %1574 }
 0x3a6   :  { %v1579_v28 = vsub.f32 %v6520_v46, %v1575_v3 }
 0x3a8   :  { %v1581_v37 = vmul.f32 1.442695, %v1579_v28 }
 0x3aa   :  { %5392 = vpow2.f32 %v1581_v37 }
 0x3ad   :  { %v1578_v14 = vpop.xlane.xlu0 %1577  ;;  %v1374_v45 = vpop.xlane.xlu2 %1373 }
 0x3ae   :  { %v1580_v50 = vsub.f32 %v6550_v30, %v1578_v14  ;;  %v1376_v6 = vsub.f32 %v6546_v26, %v1374_v45 }
 0x3b0   :  { %v5393_v10 = vpop.eup %5392  ;;  %v1583_v20 = vmul.f32 1.442695, %v1580_v50  ;;  %v1379_v38 = vmul.f32 1.442695, %v1376_v6 }
 0x3b1   :  { %v1585_v17 = vsel %vm1317_vm2, %v5393_v10, 0.0 }
 0x3b2   :  { %5394 = vpow2.f32 %v1583_v20  ;;  %1586 = vadd.xlane.f32.xlu1 %v1585_v17  ;;  %v5506_v20 = vld [vmem:[%s7931_s4] sm:$0xff] }
 0x3b3   :  { %5396 = vpow2.f32 %v1379_v38  ;;  %v1766_v38 = vsel %vm1317_vm2, %v5506_v20, 0.0 }
 0x3b7   :  { %v1473_v4 = vpop.xlane.xlu2 %1472 }
 0x3b8   :  { %v5395_v57 = vpop.eup %5394  ;;  %v1477_v46 = vsub.f32 %v6584_v5, %v1473_v4  ;;  %v5507_v4 = vld [vmem:[%s7931_s4 + $0x8] sm:$0xff] }
 0x3b9   :  { %v5397_v31 = vpop.eup %5396  ;;  %v1588_v47 = vsel %vm1317_vm2, %v5395_v57, 0.0 }
 0x3ba   :  { %v1479_v58 = vmul.f32 1.442695, %v1477_v46  ;;  %1589 = vadd.xlane.f32.xlu1 %v1588_v47  ;;  %v1384_v30 = vsel %vm1317_vm2, %v5397_v31, 0.0 }
 0x3bb   :  { %1385 = vadd.xlane.f32.xlu2 %v1384_v30 }
 0x3bc   :  { %5398 = vpow2.f32 %v1479_v58 }
 0x3c2   :  { %v5399_v26 = vpop.eup %5398 }
 0x3c3   :  { %v1483_v15 = vsel %vm1317_vm2, %v5399_v26, 0.0 }
 0x3c4   :  { %1484 = vadd.xlane.f32.xlu0 %v1483_v15 }
 0x3d5   :  { %v1677_v52 = vpop.xlane.xlu1 %1676 }
 0x3d6   :  { %v1681_v48 = vsub.f32 %v6640_v13, %v1677_v52  ;;  %v5323_v52 = vld [vmem:[%s7995_s3] ss:$0 sm:$0xff]  ;;  %s5064_s3 = sshll.u32 %s5652_s0, 4  ;;  %s5065_s3 = int_to_ptr.vmem [resolvable:$true] %s5064_s3 }
 0x3d8   :  { %v1683_v1 = vmul.f32 1.442695, %v1681_v48 }
 0x3da   :  { %5400 = vpow2.f32 %v1683_v1 }
 0x3de   :  { %v1476_v61 = vpop.xlane.xlu2 %1475 }
 0x3df   :  { %v1478_v5 = vsub.f32 %v1470_v29, %v1476_v61 }
 0x3e0   :  { %v5401_v60 = vpop.eup %5400 }
 0x3e1   :  { %v1481_v23 = vmul.f32 1.442695, %v1478_v5  ;;  %v1687_v40 = vsel %vm1317_vm2, %v5401_v60, 0.0 }
 0x3e2   :  { %1688 = vadd.xlane.f32.xlu2 %v1687_v40 }
 0x3e3   :  { %5402 = vpow2.f32 %v1481_v23 }
 0x3e7   :  { %v1680_v25 = vpop.xlane.xlu1 %1679 }
 0x3e8   :  { %v1682_v34 = vsub.f32 %v1674_v35, %v1680_v25 }
 0x3e9   :  { %v5403_v53 = vpop.eup %5402 }
 0x3ea   :  { %v1685_v44 = vmul.f32 1.442695, %v1682_v34  ;;  %v1486_v55 = vsel %vm1317_vm2, %v5403_v53, 0.0 }
 0x3eb   :  { %1487 = vadd.xlane.f32.xlu0 %v1486_v55 }
 0x3ec   :  { %5404 = vpow2.f32 %v1685_v44 }
 0x3f2   :  { %v5405_v54 = vpop.eup %5404 }
 0x3f3   :  { %v1690_v13 = vsel %vm1317_vm2, %v5405_v54, 0.0 }
 0x3f4   :  { %1691 = vadd.xlane.f32.xlu2 %v1690_v13 }
 0x40d   :  { %v1383_v36 = vpop.xlane.xlu0 %1382 }
 0x40e   :  { %5406 = vrcp.f32 %v1383_v36 }
 0x414   :  { %v5407_v32 = vpop.eup %5406 }
 0x415   :  { %v1389_v63 = vmul.f32 %v5407_v32, %v5391_v0 }
 0x417   :  { %5097 = vmatmul.msk.f32.vlgmr.msrb.gmra.mxu3 %vm1317_vm2, %v1389_v63 }
 0x425   :  { %v1587_v11 = vpop.xlane.xlu1 %1586 }
 0x42d   :  { %v1590_v21 = vpop.xlane.xlu1 %1589 }
 0x42e   :  { %v1386_v2 = vpop.xlane.xlu2 %1385 }
 0x42f   :  { %5408 = vrcp.f32 %v1386_v2 }
 0x430   :  { %5410 = vrcp.f32 %v1587_v11 }
 0x435   :  { %v5409_v9 = vpop.eup %5408 }
 0x436   :  { %v1390_v22 = vmul.f32 %v5409_v9, %v5397_v31  ;;  %v5411_v29 = vpop.eup %5410 }
 0x437   :  { %v1485_v59 = vpop.xlane.xlu0 %1484  ;;  %v1593_v12 = vmul.f32 %v5411_v29, %v5393_v10 }
 0x438   :  { %5412 = vrcp.f32 %v1485_v59  ;;  %5098 = vmatmul.msk.f32.gmra.mxu3 %vm1317_vm2, %v1390_v22 }
 0x439   :  { %5414 = vrcp.f32 %v1590_v21 }
 0x43e   :  { %v5413_v8 = vpop.eup %5412 }
 0x43f   :  { %v1491_v16 = vmul.f32 %v5413_v8, %v5399_v26  ;;  %v5415_v49 = vpop.eup %5414  ;;  %v7852_v8 = vmov 1.0  }
 0x440   :  { %5103 = vmatmul.msk.f32.vlgmr.msra.gmra.mxu3 %vm1317_vm2, %v1593_v12  ;;  %v1594_v39 = vmul.f32 %v5415_v49, %v5395_v57  ;;  %v1769_v57 = vsel %vm1317_vm2, %v5507_v4, 0.0 }
 0x441   :  { %5100 = vmatmul.msk.f32.vlgmr.msra.gmra.mxu0 %vm1317_vm2, %v1491_v16 }
 0x448   :  { %5104 = vmatmul.msk.f32.gmra.mxu3 %vm1317_vm2, %v1594_v39  ;;  %v5324_v39 = vld [vmem:[%s7784_s10] ss:$0 sm:$0xff] }
 0x455   :  { %v1689_v7 = vpop.xlane.xlu2 %1688 }
 0x456   :  { %5416 = vrcp.f32 %v1689_v7  ;;  %v5325_v7 = vld [vmem:[%s7784_s10 + $0x1] ss:$0 sm:$0xff] }
 0x45c   :  { %v5417_v42 = vpop.eup %5416 }
 0x45d   :  { %v1695_v35 = vmul.f32 %v5417_v42, %v5401_v60  ;;  %v5326_v42 = vld [vmem:[%s7784_s10 + $0x2] ss:$0 sm:$0xff] }
 0x45e   :  { %v1488_v24 = vpop.xlane.xlu0 %1487 }
 0x45f   :  { %5418 = vrcp.f32 %v1488_v24  ;;  %5106 = vmatmul.msk.f32.vlgmr.msrb.gmra.mxu1 %vm1317_vm2, %v1695_v35  ;;  %v5327_v35 = vld [vmem:[%s7784_s10 + $0x3] ss:$0 sm:$0xff]  ;;  %v5328_v24 = vld [vmem:[%s7784_s10 + $0x4] ss:$0 sm:$0xff] }
 0x465   :  { %v5419_v51 = vpop.eup %5418 }
 0x466   :  { %v1492_v43 = vmul.f32 %v5419_v51, %v5403_v53  ;;  %v5329_v51 = vld [vmem:[%s7784_s10 + $0x9] ss:$0 sm:$0xff] }
 0x467   :  { %v1692_v62 = vpop.xlane.xlu2 %1691 }
 0x468   :  { %5420 = vrcp.f32 %v1692_v62  ;;  %5101 = vmatmul.msk.f32.gmra.mxu0 %vm1317_vm2, %v1492_v43  ;;  %v5330_v43 = vld [vmem:[%s7784_s10 + $0x5] ss:$0 sm:$0xff] }
 0x469   :  { %v2051_v62 = vld [vmem:[%s7996_s25] sm:$0xff] }
 0x46e   :  { %v5421_v0 = vpop.eup %5420 }
 0x46f   :  { %v1696_v41 = vmul.f32 %v5421_v0, %v5405_v54  ;;  %v2052_v0 = vld [vmem:[%s7996_s25 + $0x8] sm:$0xff] }
 0x471   :  { %5107 = vmatmul.msk.f32.gmra.mxu1 %vm1317_vm2, %v1696_v41 }
 0x49a   :  { %v1416_v3 = vpop.f32.mrf.mxu3 }
 0x4bb   :  { %v1419_v28 = vpop.f32.mrf.mxu3 }
 0x4be   :  { %v1518_v37 = vpop.f32.mrf.mxu0 }
 0x4bf   :  { %1730 = vrot.lane.b32.xlu2 %v1518_v37, %s5638_s30 }
 0x4c3   :  { %v1620_v14 = vpop.f32.mrf.mxu3 }
 0x4cb   :  { %v1623_v45 = vpop.f32.mrf.mxu3 }
 0x4cc   :  { %1740 = vrot.lane.b32.xlu0 %v1623_v45, %s5646_s26  ;;  %v7850_v45 = vmov 0.0  }
 0x4d4   :  { %1738 = vrot.lane.b32.xlu0 %v1620_v14, %s5646_s26  ;;  %v2054_v14 = vld [vmem:[%s7996_s25 + $0x18] sm:$0xff] }
 0x4d5   :  { %2105 = vmatpush.msrb.mxu1 %v2054_v14 }
 0x4dc   :  { %v1722_v50 = vpop.f32.mrf.mxu1 }
 0x4dd   :  { %1746 = vrot.lane.b32.xlu2 %v1722_v50, %s5647_s27 }
 0x4e5   :  { %v1521_v6 = vpop.f32.mrf.mxu0 }
 0x4e6   :  { %1732 = vrot.lane.b32.xlu1 %v1521_v6, %s5638_s30 }
 0x4ee   :  { %v1725_v10 = vpop.f32.mrf.mxu1 }
 0x4ef   :  { %1748 = vrot.lane.b32.xlu1 %v1725_v10, %s5647_s27 }
 0x4fe   :  { %1767 = vadd.xlane.f32.xlu0 %v1766_v38 }
 0x519   :  { %1770 = vadd.xlane.f32.xlu1 %v1769_v57  ;;  %v1731_v46 = vpop.permute.xlu2 %1730 }
 0x51a   :  { %v1752_v58 = vsel %vm181_vm0, %v1416_v3, %v1731_v46 }
 0x527   :  { %2113 = vxpose.xlu0.b32.start [1/4] (short) (narrow) %v2051_v62, 32 }
 0x52f   :  { %2114 = vxpose.xlu0.b32.cont [2/4] (short) (narrow) %v2052_v0, 32 }
 0x537   :  { %v1747_v15 = vpop.permute.xlu2 %1746 }
 0x53e   :  { %v1741_v17 = vpop.permute.xlu0 %1740 }
 0x546   :  { %v1739_v47 = vpop.permute.xlu0 %1738 }
 0x547   :  { %v1754_v30 = vsel %vm1317_vm2, %v1752_v58, %v1739_v47 }
 0x548   :  { %v1757_v48 = vsel %vm1756_vm9, %v1754_v30, %v1747_v15  ;;  %v5331_v15 = vld [vmem:[%s7784_s10 + $0x10] ss:$0 sm:$0xff] }
 0x549   :  { %v1762_v23 = vadd.f32 %v5323_v52, %v1757_v48  ;;  %v2055_v48 = vld [vmem:[%s7998_s29] sm:$0xff] }
 0x54b   :  { %v1764_v25 = vmax.f32 %v1762_v23, 0.0  ;;  %v2057_v23 = vld [vmem:[%s7998_s29 + $0x10] sm:$0xff] }
 0x553   :  { %2186 = vxpose.xlu1.b32.start [1/4] (short) (narrow) %v2055_v48, 32  ;;  %v5353_v48 = vld [vmem:[%s7784_s10 + $0x1d] ss:$0 sm:$0xff] }
 0x558   :  { %v1733_v31 = vpop.permute.xlu1 %1732 }
 0x559   :  { %v1753_v26 = vsel %vm181_vm0, %v1419_v28, %v1733_v31  ;;  %v2053_v28 = vld [vmem:[%s7996_s25 + $0x10] sm:$0xff]  ;;  %v6761_v31 = vcvt.s32.f32 %v5879_v33 }
 0x55a   :  { %v1755_v1 = vsel %vm1317_vm2, %v1753_v26, %v1741_v17  ;;  %2115 = vxpose.xlu0.b32.cont [3/4] (short) (narrow) %v2053_v28, 32  ;;  %2106 = vmatpush.msrb.mxu1 %v2053_v28  ;;  %v5342_v28 = vld [vmem:[%s7784_s10 + $0x8] ss:$0 sm:$0xff] }
 0x55b   :  { %7997 = vst [vmem:[#allocation18_spill] sm:$0xff] %v6761_v31 }
 0x55c   :  { %2107 = vmatpush.msrb.mxu1 %v2052_v0 }
 0x55e   :  { %2108 = vmatpush.msrb.mxu1 %v2051_v62 }
 0x561   :  { %v1749_v61 = vpop.permute.xlu1 %1748 }
 0x562   :  { %v1758_v5 = vsel %vm1756_vm9, %v1755_v1, %v1749_v61  ;;  %2116 = vxpose.xlu0.b32.end [4/4] (short) (narrow) %v2054_v14, 32  ;;  %v5333_v1 = vld [vmem:[%s7784_s10 + $0xb] ss:$0 sm:$0xff] }
 0x563   :  { %v1763_v60 = vadd.f32 %v5323_v52, %v1758_v5  ;;  %v5332_v52 = vld [vmem:[%s7784_s10 + $0x12] ss:$0 sm:$0xff]  ;;  %v2056_v61 = vld [vmem:[%s7998_s29 + $0x8] sm:$0xff]  ;;  %v5334_v5 = vld [vmem:[%s7784_s10 + $0x13] ss:$0 sm:$0xff] }
 0x564   :  { %2187 = vxpose.xlu1.b32.cont [2/4] (short) (narrow) %v2056_v61, 32 }
 0x565   :  { %v1765_v40 = vmax.f32 %v1763_v60, 0.0 }
 0x567   :  { %1800 = vmatpush.msrb.mxu2 %v1765_v40  ;;  %1922 = vmatpush.msrb.mxu3 %v1765_v40 }
 0x569   :  { %1801 = vmatpush.msrb.mxu2 %v1764_v25  ;;  %1923 = vmatpush.msrb.mxu3 %v1764_v25 }
 0x56a   :  { %5108 = vmatmul.msk.f32.vlgmr.msrb.gmra.mxu2 %vm1317_vm2, %v5506_v20 }
 0x56c   :  { %2188 = vxpose.xlu1.b32.cont [3/4] (short) (narrow) %v2057_v23, 32 }
 0x571   :  { %v1768_v34 = vpop.xlane.xlu0 %1767 }
 0x572   :  { %5109 = vmatmul.msk.f32.gmra.mxu2 %vm1317_vm2, %v5507_v4  ;;  %v1774_v44 = vmax.f32 %v1768_v34, 1.0  ;;  %vm1772_vm10 = vcmp.gt.f32.partialorder %v1768_v34, 0.0 }
 0x574   :  { %5422 = vrcp.f32 %v1774_v44 }
 0x57a   :  { %v5423_v13 = vpop.eup %5422 }
 0x57b   :  { %v1778_v32 = vsel %vm1772_vm10, %v5423_v13, 0.0 }
 0x58c   :  { %v1771_v53 = vpop.xlane.xlu1 %1770 }
 0x58d   :  { %v1775_v55 = vmax.f32 %v1771_v53, 1.0  ;;  %vm1773_vm11 = vcmp.gt.f32.partialorder %v1771_v53, 0.0  ;;  %v5336_v53 = vld [vmem:[%s7784_s10 + $0x19] ss:$0 sm:$0xff] }
 0x58f   :  { %5424 = vrcp.f32 %v1775_v55  ;;  %v5337_v55 = vld [vmem:[%s7784_s10 + $0xe] ss:$0 sm:$0xff] }
 0x595   :  { %v5425_v36 = vpop.eup %5424 }
 0x596   :  { %v1779_v63 = vsel %vm1773_vm11, %v5425_v36, 0.0  ;;  %v5339_v36 = vld [vmem:[%s7784_s10 + $0x1b] ss:$0 sm:$0xff] }
 0x5c9   :  { %5271 = vset.pattern.permute.xlu0 %v7906_v27 }
 0x5d0   :  { %2786 = vperm.xlu0 %5271, %v5342_v28   ;;  %v8000_v28 = vmov 1  }
 0x5ed   :  { %v1803_v54 = vpop.f32.mrf.mxu2 }
 0x5ee   :  { %v1809_v11 = vmul.f32 %v1803_v54, %v1778_v32  ;;  %v5338_v54 = vld [vmem:[%s7784_s10 + $0x16] ss:$0 sm:$0xff]  ;;  %v2129_v62 = vpop.trf.xlu0 }
 0x5f0   :  { %v1811_v59 = vsub.f32 %v1764_v25, %v1809_v11  ;;  %v2058_v25 = vld [vmem:[%s7998_s29 + $0x18] sm:$0xff] }
 0x5f1   :  { %2189 = vxpose.xlu1.b32.end [4/4] (short) (narrow) %v2058_v25, 32 }
 0x5f2   :  { %v1813_v29 = vand.u32 2147483647, %v1811_v59 }
 0x5f5   :  { %v1806_v2 = vpop.f32.mrf.mxu2 }
 0x5f6   :  { %v1810_v9 = vmul.f32 %v1806_v2, %v1779_v63 }
 0x5f8   :  { %v1812_v22 = vsub.f32 %v1765_v40, %v1810_v9  ;;  %v5335_v40 = vld [vmem:[%s7784_s10 + $0x14] ss:$0 sm:$0xff] }
 0x5fa   :  { %v1814_v21 = vand.u32 2147483647, %v1812_v22 }
 0x5fc   :  { %5110 = vmatpush.xpose.msk.msrb.mxu0 %vm357_vm1, %v1814_v21 }
 0x600   :  { %5111 = vmatpush.xpose.msk.msrb.mxu0 %vm357_vm1, %v1813_v29 }
 0x603   :  { %5112 = vmatmul.msk.f32.vlgmr.msrb.gmra.mxu0 %vm357_vm1, %v7852_v8 }
 0x604   :  { %1856 = vmatpush.msra.mxu0 %v7852_v8 }
 0x606   :  { %1857 = vmatpush.msra.mxu0 %v7852_v8 }
 0x608   :  { %1858 = vmatpush.msra.mxu0 %v7852_v8 }
 0x60a   :  { %1859 = vmatpush.msra.mxu0 %v7852_v8 }
 0x60b   :  { %5113 = vmatmul.msk.f32.vlgmr.msra.gmra.mxu0 %vm357_vm1, %v1813_v29 }
 0x613   :  { %5114 = vmatmul.msk.f32.gmra.mxu0 %vm357_vm1, %v1814_v21 }
 0x644   :  { %5272 = vset.pattern.permute.xlu1 %v7906_v27 }
 0x680   :  { %v1841_v12 = vpop.f32.mrf.mxu0 }
 0x681   :  { %v1877_v41 = vperm.slane %v1841_v12, 0 }
 0x688   :  { %v1861_v16 = vpop.f32.mrf.mxu0 }
 0x689   :  { %1869 = vperm.xlu2 %5270, %v1861_v16  }
 0x690   :  { %v1864_v49 = vpop.f32.mrf.mxu0 }
 0x691   :  { %1874 = vperm.xlu2 %5270, %v1864_v49  }
 0x699   :  { %2754 = vperm.xlu2 %5270, %v5324_v39  }
 0x6a1   :  { %2758 = vperm.xlu2 %5270, %v5325_v7  }
 0x6a9   :  { %2762 = vperm.xlu2 %5270, %v5326_v42  }
 0x6b1   :  { %2766 = vperm.xlu2 %5270, %v5327_v35  }
 0x6b9   :  { %2770 = vperm.xlu2 %5270, %v5328_v24  }
 0x6c1   :  { %2790 = vperm.xlu2 %5270, %v5329_v51  }
 0x6c9   :  { %2774 = vperm.xlu2 %5270, %v5330_v43  }
 0x6e3   :  { %v1870_v3 = vpop.permute.xlu2 %1869 }
 0x6e4   :  { %vm1880_vm13 = vcmp.eq.f32.partialorder %v1870_v3, %v1877_v41  ;;  %vm1878_vm14 = vcmp.gt.f32.partialorder %v1870_v3, %v1877_v41  ;;  %v5340_v3 = vld [vmem:[%s7784_s10 + $0xa] ss:$0 sm:$0xff] }
 0x6e5   :  { %vm1884_vm15 = vmand %vm1880_vm13, %vm1882_vm12  ;;  %2794 = vperm.xlu1 %5272, %v5340_v3  }
 0x6e6   :  { %vm1886_vm3 = vmor %vm1878_vm14, %vm1884_vm15 }
 0x6e7   :  { %v5115_v50 = vsel %vm1886_vm3, 1.0, %v7850_v45 }
 0x6e8   :  { %v1892_v10 = vsel %vm1317_vm2, %v5115_v50, 0.0  ;;  %v5344_v50 = vld [vmem:[%s7784_s10 + $0x11] ss:$0 sm:$0xff] }
 0x6e9   :  { %2822 = vperm.xlu0 %5271, %v5344_v50  }
 0x6eb   :  { %v1875_v37 = vpop.permute.xlu2 %1874 }
 0x6ec   :  { %vm1879_vm6 = vcmp.gt.f32.partialorder %v1875_v37, %v1877_v41  ;;  %vm1881_vm7 = vcmp.eq.f32.partialorder %v1875_v37, %v1877_v41  ;;  %v5341_v37 = vld [vmem:[%s7784_s10 + $0xc] ss:$0 sm:$0xff] }
 0x6ed   :  { %vm1885_vm8 = vmand %vm1881_vm7, %vm1883_vm5  ;;  %2802 = vperm.xlu1 %5272, %v5341_v37  }
 0x6ee   :  { %vm1887_vm10 = vmor %vm1879_vm6, %vm1885_vm8 }
 0x6ef   :  { %v5116_v6 = vsel %vm1887_vm10, 1.0, %v7850_v45 }
 0x6f0   :  { %v1893_v19 = vsel %vm1317_vm2, %v5116_v6, 0.0  ;;  %v5343_v6 = vld [vmem:[%s7784_s10 + $0xd] ss:$0 sm:$0xff] }
 0x6f1   :  { %v1894_v20 = vadd.f32 %v1893_v19, %v1892_v10  ;;  %v5346_v19 = vld [vmem:[%s7784_s10 + $0x6] ss:$0 sm:$0xff] }
 0x6f2   :  { %2778 = vperm.xlu0 %5271, %v5346_v19  }
 0x6f3   :  { %v1895_v38 = vrot.slane %v1894_v20, 4  ;;  %v6787_v60 = vpop.permute.xlu2 %2754 }
 0x6f5   :  { %v1896_v17 = vadd.f32 %v1895_v38, %v1894_v20  ;;  %2806 = vperm.xlu1 %5272, %v5343_v6   ;;  %v5345_v20 = vld [vmem:[%s7784_s10 + $0x15] ss:$0 sm:$0xff]  ;;  %v5348_v38 = vld [vmem:[%s7784_s10 + $0x7] ss:$0 sm:$0xff] }
 0x6f7   :  { %v1897_v4 = vrot.slane %v1896_v17, 2 }
 0x6f9   :  { %v1898_v57 = vadd.f32 %v1897_v4, %v1896_v17  ;;  %v5347_v17 = vld [vmem:[%s7784_s10 + $0x1a] ss:$0 sm:$0xff]  ;;  %v5349_v4 = vld [vmem:[%s7784_s10 + $0x17] ss:$0 sm:$0xff] }
 0x6fa   :  { %2782 = vperm.xlu0 %5271, %v5348_v38  }
 0x6fb   :  { %v1899_v46 = vrot.slane %v1898_v57, 1  ;;  %v6798_v34 = vpop.permute.xlu2 %2758 }
 0x6fd   :  { %v1900_v47 = vadd.f32 %v1899_v46, %v1898_v57  ;;  %2838 = vperm.xlu1 %5272, %v5345_v20   ;;  %v2202_v57 = vpop.trf.xlu1 }
 0x6ff   :  { %vm1902_vm11 = vcmp.eq.f32.partialorder %v1900_v47, %v6761_v31 }
 0x700   :  { %v5117_v58 = vsel %vm1902_vm11, 1.0, %v7850_v45 }
 0x701   :  { %5118 = vmatmul.msk.f32.vlgmr.msrb.gmra.mxu3 %vm1317_vm2, %v5117_v58  ;;  %5120 = vmatmul.msk.f32.vlgmr.msra.gmra.mxu1 %vm1317_vm2, %v5117_v58  ;;  %v1928_v30 = vmul.f32 %v5117_v58, %v1877_v41  ;;  %v2130_v41 = vpop.trf.xlu0 }
 0x702   :  { %5121 = vmatpush.xpose.msk.msra.mxu2 %vm1317_vm2, %v5117_v58 }
 0x703   :  { %v1929_v26 = vsel %vm1317_vm2, %v1928_v30, 0.0  ;;  %v6803_v44 = vpop.permute.xlu2 %2762  ;;  %v5350_v30 = vld [vmem:[%s7784_s10 + $0x18] ss:$0 sm:$0xff] }
 0x704   :  { %1930 = vadd.xlane.f32.xlu2 %v1929_v26  ;;  %v5351_v26 = vld [vmem:[%s7784_s10 + $0x1c] ss:$0 sm:$0xff]  ;;  %2850 = vperm.xlu0 %5271, %v5350_v30  }
 0x705   :  { %2858 = vperm.xlu1 %5272, %v5347_v17   ;;  %v2203_v46 = vpop.trf.xlu1 }
 0x709   :  { %v2131_v14 = vpop.trf.xlu0 }
 0x70b   :  { %v6811_v13 = vpop.permute.xlu2 %2766 }
 0x70d   :  { %2846 = vperm.xlu1 %5272, %v5349_v4   ;;  %v2204_v47 = vpop.trf.xlu1 }
 0x711   :  { %v2132_v10 = vpop.trf.xlu0 }
 0x713   :  { %v6817_v32 = vpop.permute.xlu2 %2770 }
 0x715   :  { %v2205_v58 = vpop.trf.xlu1  ;;  %2866 = vperm.xlu1 %5272, %v5351_v26  }
 0x71b   :  { %v6820_v63 = vpop.permute.xlu2 %2790 }
 0x71c   :  { %2818 = vperm.xlu2 %5270, %v5331_v15   ;;  %v6889_v15 = vld [vmem:[%s7783_s9] sm:$0xf] }
 0x71d   :  { %2870 = vperm.xlu1 %5272, %v5353_v48  }
 0x723   :  { %v6822_v2 = vpop.permute.xlu2 %2774 }
 0x724   :  { %2826 = vperm.xlu2 %5270, %v5332_v52   ;;  %v5352_v52 = vld [vmem:[%s7784_s10 + $0xf] ss:$0 sm:$0xff] }
 0x725   :  { %2814 = vperm.xlu0 %5271, %v5352_v52   ;;  %5275 = vset.pattern.permute.xlu1 %v5879_v33 }
 0x72c   :  { %2798 = vperm.xlu2 %5270, %v5333_v1  }
 0x72d   :  { %5274 = vset.pattern.permute.xlu0 %v5879_v33 }
 0x734   :  { %2830 = vperm.xlu2 %5270, %v5334_v5  }
 0x73c   :  { %2834 = vperm.xlu2 %5270, %v5335_v40  }
 0x744   :  { %2854 = vperm.xlu2 %5270, %v5336_v53  }
 0x74c   :  { %2810 = vperm.xlu2 %5270, %v5337_v55  }
 0x754   :  { %2842 = vperm.xlu2 %5270, %v5338_v54  }
 0x75c   :  { %2862 = vperm.xlu2 %5270, %v5339_v36  }
 0x764   :  { %5273 = vset.pattern.permute.xlu2 %v5879_v33 }
 0x777   :  { %v1931_v11 = vpop.xlane.xlu2 %1930 }
 0x778   :  { %v5119_v9 = vmul.f32 -1.442695, %v1931_v11 }
 0x77a   :  { %5426 = vpow2.f32 %v5119_v9 }
 0x77e   :  { %v1969_v22 = vpop.f32.mrf.mxu1 }
 0x77f   :  { %5122 = vmatmul.msk.f32.vlgmr.msra.gmra.mxu2 %vm1317_vm2, %v1969_v22  ;;  %v6904_v53 = vpop.permute.xlu2 %2818 }
 0x780   :  { %v5427_v59 = vpop.eup %5426 }
 0x781   :  { %v1935_v21 = vadd.f32 1.0, %v5427_v59 }
 0x783   :  { %5428 = vrcp.f32 %v1935_v21  ;;  %v1947_v49 = vand.u32 2147483648, %v1935_v21  ;;  %v1945_v7 = vand.u32 2147483647, %v1935_v21  ;;  %vm1941_vm14 = vweird.f32 %v1935_v21 }
 0x784   :  { %v1925_v51 = vpop.f32.mrf.mxu3 }
 0x785   :  { %v1948_v35 = vor.u32 1.1754944e-38, %v1947_v49  ;;  %vm1946_vm3 = vcmp.eq.f32.partialorder %v1945_v7, 8.507059e+37 }
 0x787   :  { %v6911_v22 = vpop.permute.xlu2 %2826 }
 0x789   :  { %v5429_v29 = vpop.eup %5428 }
 0x78a   :  { %v1937_v12 = vmul.f32 %v5429_v29, %v1935_v21  ;;  %vm1942_vm13 = vweird.f32 %v5429_v29 }
 0x78b   :  { %vm1943_vm15 = vmor %vm1941_vm14, %vm1942_vm13 }
 0x78c   :  { %v1938_v16 = vsub.f32 1.0, %v1937_v12 }
 0x78e   :  { %v1939_v39 = vmul.f32 %v5429_v29, %v1938_v16 }
 0x78f   :  { %v6918_v49 = vpop.permute.xlu2 %2798 }
 0x790   :  { %v1940_v42 = vadd.f32 %v5429_v29, %v1939_v39 }
 0x792   :  { %v1944_v24 = vsel %vm1943_vm15, %v5429_v29, %v1940_v42  ;;  %vm3302_vm15 = vcmask 60416  }
 0x793   :  { %v1949_v43 = vsel %vm1946_vm3, %v1948_v35, %v1944_v24 }
 0x794   :  { %v6826_v0 = vmul.f32 %v1949_v43, %v1925_v51  ;;  %v6926_v43 = vpop.permute.xlu1 %2794 }
 0x796   :  { %7999 = vst [vmem:[#allocation27_spill] sm:$0xff] %v6826_v0  ;;  %5123 = vmatpush.xpose.msk.msra.mxu3 %vm357_vm1, %v6826_v0  ;;  %5125 = vmatmul.msk.f32.vlgmr.msrb.gmra.mxu1 %vm357_vm1, %v6826_v0 }
 0x797   :  { %5126 = vmatpush.xpose.msk.msrb.mxu2 %vm357_vm1, %v6826_v0  ;;  %5131 = vmatpush.xpose.msk.msrb.mxu0 %vm357_vm1, %v6826_v0  ;;  %v6924_v51 = vpop.permute.xlu2 %2830 }
 0x799   :  { %5124 = vmatmul.msk.f32.vlgmr.msra.gmra.mxu3 %vm357_vm1, %v6826_v0 }
 0x79a   :  { %5127 = vmatmul.msk.f32.vlgmr.msrb.gmra.mxu2 %vm357_vm1, %v2129_v62  ;;  %5132 = vmatmul.msk.f32.vlgmr.msrb.gmra.mxu0 %vm357_vm1, %v2202_v57 }
 0x79b   :  { %3248 = vmatpush.msra.mxu2 %v7852_v8  ;;  %5136 = vmatpush.xpose.msk.msrb.mxu3 %vm357_vm1, %v6889_v15 }
 0x79d   :  { %3249 = vmatpush.msra.mxu2 %v7852_v8 }
 0x79f   :  { %3250 = vmatpush.msra.mxu2 %v7852_v8  ;;  %v6934_v37 = vpop.permute.xlu2 %2834 }
 0x7a1   :  { %3251 = vmatpush.msra.mxu2 %v7852_v8 }
 0x7a2   :  { %5128 = vmatmul.msk.f32.gmra.mxu2 %vm357_vm1, %v2130_v41  ;;  %5133 = vmatmul.msk.f32.gmra.mxu0 %vm357_vm1, %v2203_v46 }
 0x7a7   :  { %v6941_v6 = vpop.permute.xlu2 %2854 }
 0x7aa   :  { %5129 = vmatmul.msk.f32.gmra.mxu2 %vm357_vm1, %v2131_v14  ;;  %5134 = vmatmul.msk.f32.gmra.mxu0 %vm357_vm1, %v2204_v47  ;;  %v6936_v14 = vpop.permute.xlu1 %2802 }
 0x7af   :  { %v6951_v38 = vpop.permute.xlu2 %2810 }
 0x7b2   :  { %5130 = vmatmul.msk.f32.gmra.mxu2 %vm357_vm1, %v2132_v10  ;;  %5135 = vmatmul.msk.f32.gmra.mxu0 %vm357_vm1, %v2205_v58  ;;  %v6943_v10 = vpop.permute.xlu0 %2786  ;;  %v6945_v19 = vpop.permute.xlu1 %2806 }
 0x7b7   :  { %v6961_v46 = vpop.permute.xlu2 %2842 }
 0x7ba   :  { %v6953_v17 = vpop.permute.xlu0 %2822  ;;  %v6955_v4 = vpop.permute.xlu1 %2838 }
 0x7bf   :  { %v6979_v48 = vpop.permute.xlu2 %2862 }
 0x7c0   :  { %8001 = vst [vmem:[#allocation47_spill] sm:$0xff] %v6979_v48 }
 0x7c2   :  { %v6963_v58 = vpop.permute.xlu0 %2778  ;;  %v6965_v30 = vpop.permute.xlu1 %2858 }
 0x802   :  { %v6902_v61 = vpop.f32.mrf.mxu2 }
 0x813   :  { %v2110_v1 = vpop.f32.mrf.mxu1 }
 0x814   :  { %5137 = vmatmul.msk.f32.vlgmr.msrb.gmra.mxu3 %vm357_vm1, %v2110_v1  ;;  %v6981_v1 = vpop.permute.xlu0 %2782 }
 0x817   :  { %v6929_v3 = vpop.f32.mrf.mxu0 }
 0x818   :  { %5139 = vmatpush.xpose.msk.msra.mxu3 %vm181_vm0, %v6929_v3  ;;  %v2538_v31 = vrot.slane %v6929_v3, 6 }
 0x81c   :  { %v2015_v47 = vpop.f32.mrf.mxu3 }
 0x81d   :  { %v2174_v5 = vpop.f32.mrf.mxu2  ;;  %v6969_v26 = vmul.f32 0.17677669, %v2015_v47 }
 0x81e   :  { %v2333_v23 = vperm.slane %v2174_v5, 4  ;;  %v2326_v40 = vperm.slane %v2174_v5, 3  ;;  %v2305_v25 = vperm.slane %v2174_v5, 0  ;;  %v2312_v11 = vperm.slane %v2174_v5, 1 }
 0x81f   :  { %v2319_v29 = vperm.slane %v2174_v5, 2  ;;  %v2340_v39 = vperm.slane %v2174_v5, 5  ;;  %v2347_v24 = vperm.slane %v2174_v5, 6  ;;  %v2354_v41 = vperm.slane %v2174_v5, 7  ;;  %v6939_v50 = vpop.f32.mrf.mxu0  ;;  %v6983_v5 = vpop.permute.xlu1 %2846 }
 0x820   :  { %2338 = vperm.xlu1 %5275, %v2333_v23   ;;  %2331 = vperm.xlu0 %5274, %v2326_v40   ;;  %v2019_v52 = vsel %vm181_vm0, %v6969_v26, -inf  ;;  %v6985_v40 = vpop.permute.xlu0 %2850 }
 0x821   :  { %2310 = vperm.xlu2 %5273, %v2305_v25   ;;  %v2533_v25 = vrot.slane %v6929_v3, 1 }
 0x825   :  { %v6906_v55 = vpop.f32.mrf.mxu2 }
 0x826   :  { %v2403_v54 = vperm.slane %v6906_v55, 6  ;;  %v2396_v36 = vperm.slane %v6906_v55, 5  ;;  %v2410_v9 = vperm.slane %v6906_v55, 7 }
 0x827   :  { %v6947_v20 = vpop.f32.mrf.mxu0 }
 0x828   :  { %2408 = vperm.xlu1 %5275, %v2403_v54   ;;  %2401 = vperm.xlu0 %5274, %v2396_v36   ;;  %v2562_v54 = vperm.slane %v2533_v25, 0 }
 0x829   :  { %2317 = vperm.xlu2 %5273, %v2312_v11   ;;  %5143 = vmatpush.xpose.msk.msrb.mxu3 %vm181_vm0, %v6947_v20  ;;  %v2534_v11 = vrot.slane %v6929_v3, 2 }
 0x82d   :  { %v6913_v59 = vpop.f32.mrf.mxu2 }
 0x82e   :  { %v2438_v21 = vperm.slane %v6913_v59, 3  ;;  %v2452_v12 = vperm.slane %v6913_v59, 5  ;;  %v2459_v16 = vperm.slane %v6913_v59, 6 }
 0x82f   :  { %v6957_v57 = vpop.f32.mrf.mxu0 }
 0x830   :  { %2415 = vperm.xlu1 %5275, %v2410_v9   ;;  %2443 = vperm.xlu0 %5274, %v2438_v21   ;;  %v2561_v9 = vperm.slane %v6929_v3, 0  ;;  %v2361_v21 = vperm.slane %v6906_v55, 0 }
 0x831   :  { %2324 = vperm.xlu2 %5273, %v2319_v29   ;;  %2297 = vmatpush.msra.mxu1 %v6957_v57 }
 0x833   :  { %2298 = vmatpush.msra.mxu1 %v6947_v20 }
 0x835   :  { %v6920_v7 = vpop.f32.mrf.mxu2  ;;  %2299 = vmatpush.msra.mxu1 %v6939_v50 }
 0x836   :  { %v2480_v42 = vperm.slane %v6920_v7, 1  ;;  %v2501_v35 = vperm.slane %v6920_v7, 4  ;;  %v2508_v62 = vperm.slane %v6920_v7, 5 }
 0x837   :  { %2300 = vmatpush.msra.mxu1 %v6929_v3 }
 0x838   :  { %2457 = vperm.xlu1 %5275, %v2452_v12   ;;  %2464 = vperm.xlu0 %5274, %v2459_v16   ;;  %v6993_v12 = vpop.permute.xlu0 %2814 }
 0x839   :  { %2345 = vperm.xlu2 %5273, %v2340_v39   ;;  %5138 = vmatmul.msk.f32.vlgmr.msra.gmra.mxu1 %vm357_vm1, %v6889_v15  ;;  %v6987_v15 = vpop.permute.xlu1 %2866  ;;  %v2563_v39 = vperm.slane %v2534_v11, 0 }
 0x83a   :  { %5141 = vmatpush.xpose.msk.msrb.mxu1 %vm181_vm0, %v6939_v50  ;;  %8002 = vst [vmem:[#allocation20_spill] sm:$0xff] %v6987_v15  ;;  %v2550_v15 = vrot.slane %v6947_v20, 4 }
 0x83e   :  { %5145 = vmatpush.xpose.msk.msra.mxu1 %vm181_vm0, %v6957_v57 }
 0x840   :  { %2485 = vperm.xlu1 %5275, %v2480_v42   ;;  %2506 = vperm.xlu0 %5274, %v2501_v35  }
 0x841   :  { %2352 = vperm.xlu2 %5273, %v2347_v24   ;;  %v6995_v16 = vpop.permute.xlu1 %2870 }
 0x842   :  { %8003 = vst [vmem:[#allocation49_spill] sm:$0xff] %v6995_v16 }
 0x848   :  { %2513 = vperm.xlu1 %5275, %v2508_v62   ;;  %5277 = vset.pattern.permute.xlu0 %v8000_v28  ;;  %v2536_v62 = vrot.slane %v6929_v3, 4 }
 0x849   :  { %2359 = vperm.xlu2 %5273, %v2354_v41   ;;  %v2535_v41 = vrot.slane %v6929_v3, 3 }
 0x84a   :  { %v2565_v8 = vperm.slane %v2536_v62, 0 }
 0x84b   :  { %v2564_v0 = vperm.slane %v2535_v41, 0 }
 0x850   :  { %5276 = vset.pattern.permute.xlu1 %v7906_v27 }
 0x872   :  { %2020 = vmax.xlane.f32.xlu2 %v2019_v52  ;;  %v2537_v52 = vrot.slane %v6929_v3, 5 }
 0x874   :  { %v2566_v11 = vperm.slane %v2537_v52, 0 }
 0x87b   :  { %v2311_v23 = vpop.permute.xlu2 %2310 }
 0x87c   :  { %v2625_v42 = vadd.f32 %v2561_v9, %v2311_v23 }
 0x87e   :  { %v2657_v25 = vand.u32 2147483647, %v2625_v42 }
 0x880   :  { %v2881_v23 = vmul.f32 %v6787_v60, %v2657_v25 }
 0x883   :  { %v2318_v36 = vpop.permute.xlu2 %2317 }
 0x884   :  { %v2626_v29 = vadd.f32 %v2562_v54, %v2318_v36  ;;  %v2368_v54 = vperm.slane %v6906_v55, 1 }
 0x886   :  { %v2658_v35 = vand.u32 2147483647, %v2626_v29 }
 0x888   :  { %v2882_v36 = vmul.f32 %v6798_v34, %v2658_v35  ;;  %v2915_v34 = vsel %vm181_vm0, %v2881_v23, 0.0 }
 0x88a   :  { %2366 = vperm.xlu2 %5273, %v2361_v21  }
 0x88b   :  { %v2325_v24 = vpop.permute.xlu2 %2324 }
 0x88c   :  { %v2627_v47 = vadd.f32 %v2563_v39, %v2325_v24  ;;  %v2916_v39 = vsel %vm181_vm0, %v2882_v36, 0.0 }
 0x88d   :  { %v2917_v60 = vadd.f32 %v2916_v39, %v2915_v34 }
 0x88e   :  { %v2659_v45 = vand.u32 2147483647, %v2627_v47 }
 0x890   :  { %v2883_v9 = vmul.f32 %v6803_v44, %v2659_v45  ;;  %v2375_v45 = vperm.slane %v6906_v55, 2 }
 0x892   :  { %2373 = vperm.xlu2 %5273, %v2368_v54   ;;  %v2339_v21 = vpop.permute.xlu1 %2338  ;;  %v2332_v29 = vpop.permute.xlu0 %2331  ;;  %v2918_v35 = vsel %vm181_vm0, %v2883_v9, 0.0  ;;  %v2567_v54 = vperm.slane %v2538_v31, 0  ;;  %v2382_v31 = vperm.slane %v6906_v55, 3 }
 0x893   :  { %v2629_v24 = vadd.f32 %v2565_v8, %v2339_v21  ;;  %v2628_v28 = vadd.f32 %v2564_v0, %v2332_v29  ;;  %v2346_v42 = vpop.permute.xlu2 %2345  ;;  %v2919_v25 = vadd.f32 %v2918_v35, %v2917_v60  ;;  %v2539_v21 = vrot.slane %v6929_v3, 7 }
 0x894   :  { %v2630_v47 = vadd.f32 %v2566_v11, %v2346_v42  ;;  %v2389_v60 = vperm.slane %v6906_v55, 4  ;;  %v5354_v55 = vld [vmem:[%s7784_s10 + $0x1f] ss:$0 sm:$0xff] }
 0x895   :  { %v2661_v62 = vand.u32 2147483647, %v2629_v24  ;;  %v2660_v41 = vand.u32 2147483647, %v2628_v28  ;;  %v2568_v42 = vperm.slane %v2539_v21, 0 }
 0x896   :  { %v2662_v0 = vand.u32 2147483647, %v2630_v47 }
 0x897   :  { %v2884_v44 = vmul.f32 %v6811_v13, %v2660_v41  ;;  %v7010_v52 = vpop.f32.mrf.mxu3  ;;  %v2885_v8 = vmul.f32 %v6817_v32, %v2661_v62 }
 0x898   :  { %2993 = vperm.xlu0 %5277, %v7010_v52   ;;  %2932 = vperm.xlu1 %5276, %v7010_v52   ;;  %v2886_v13 = vmul.f32 %v6822_v2, %v2662_v0  ;;  %v2445_v0 = vperm.slane %v6913_v59, 4 }
 0x899   :  { %v2920_v36 = vsel %vm181_vm0, %v2884_v44, 0.0  ;;  %v2922_v23 = vsel %vm181_vm0, %v2885_v8, 0.0  ;;  %v2417_v44 = vperm.slane %v6913_v59, 0  ;;  %v2431_v8 = vperm.slane %v6913_v59, 2 }
 0x89a   :  { %v2921_v11 = vadd.f32 %v2920_v36, %v2919_v25  ;;  %2380 = vperm.xlu2 %5273, %v2375_v45   ;;  %v2924_v39 = vsel %vm181_vm0, %v2886_v13, 0.0  ;;  %v2424_v25 = vperm.slane %v6913_v59, 1  ;;  %v2487_v36 = vperm.slane %v6920_v7, 2 }
 0x89b   :  { %v2353_v28 = vpop.permute.xlu2 %2352  ;;  %v2494_v13 = vperm.slane %v6920_v7, 3 }
 0x89c   :  { %v2631_v9 = vadd.f32 %v2567_v54, %v2353_v28  ;;  %v2923_v29 = vadd.f32 %v2922_v23, %v2921_v11  ;;  %v2473_v54 = vperm.slane %v6920_v7, 0 }
 0x89e   :  { %v2663_v32 = vand.u32 2147483647, %v2631_v9  ;;  %v2925_v47 = vadd.f32 %v2924_v39, %v2923_v29  ;;  %v2522_v39 = vperm.slane %v6920_v7, 7 }
 0x8a0   :  { %v2887_v24 = vmul.f32 %v6963_v58, %v2663_v32  ;;  %5279 = vset.pattern.permute.xlu0 %v7906_v27 }
 0x8a1   :  { %2878 = vperm.xlu0 %5279, %v5354_v55  }
 0x8a2   :  { %v2926_v34 = vsel %vm181_vm0, %v2887_v24, 0.0  ;;  %2387 = vperm.xlu2 %5273, %v2382_v31   ;;  %v8004_v24 = vmov 2  }
 0x8a3   :  { %v2927_v35 = vadd.f32 %v2926_v34, %v2925_v47  ;;  %v2360_v2 = vpop.permute.xlu2 %2359 }
 0x8a4   :  { %v2632_v62 = vadd.f32 %v2568_v42, %v2360_v2  ;;  %v5355_v42 = vld [vmem:[%s7784_s10 + $0x1e] ss:$0 sm:$0xff] }
 0x8a6   :  { %v2664_v41 = vand.u32 2147483647, %v2632_v62  ;;  %v7055_v62 = vpop.permute.xlu1 %2408 }
 0x8a8   :  { %v2888_v3 = vmul.f32 %v6981_v1, %v2664_v41  ;;  %v2466_v1 = vperm.slane %v6913_v59, 7  ;;  %v2515_v59 = vperm.slane %v6920_v7, 6 }
 0x8aa   :  { %v2928_v45 = vsel %vm181_vm0, %v2888_v3, 0.0  ;;  %2394 = vperm.xlu2 %5273, %v2389_v60  }
 0x8ab   :  { %v7027_v58 = vadd.f32 %v2928_v45, %v2927_v35  ;;  %v2540_v45 = vrot.slane %v6939_v50, 1 }
 0x8ae   :  { %v7059_v3 = vpop.permute.xlu1 %2415 }
 0x8b2   :  { %2422 = vperm.xlu2 %5273, %v2417_v44  }
 0x8b6   :  { %v7064_v44 = vpop.permute.xlu1 %2457 }
 0x8ba   :  { %2429 = vperm.xlu2 %5273, %v2424_v25   ;;  %v2541_v25 = vrot.slane %v6939_v50, 2 }
 0x8c2   :  { %2436 = vperm.xlu2 %5273, %v2431_v8   ;;  %v2547_v8 = vrot.slane %v6947_v20, 1 }
 0x8ca   :  { %2450 = vperm.xlu2 %5273, %v2445_v0   ;;  %v2542_v0 = vrot.slane %v6939_v50, 3 }
 0x8d2   :  { %2471 = vperm.xlu2 %5273, %v2466_v1   ;;  %v2570_v1 = vperm.slane %v2540_v45, 0  ;;  %v2544_v45 = vrot.slane %v6939_v50, 5 }
 0x8da   :  { %2478 = vperm.xlu2 %5273, %v2473_v54   ;;  %v2548_v54 = vrot.slane %v6947_v20, 2 }
 0x8e2   :  { %2492 = vperm.xlu2 %5273, %v2487_v36   ;;  %v2569_v36 = vperm.slane %v6939_v50, 0 }
 0x8e5   :  { %v2021_v11 = vpop.xlane.xlu2 %2020 }
 0x8e6   :  { %v2022_v28 = vsub.f32 %v6969_v26, %v2021_v11  ;;  %v2543_v11 = vrot.slane %v6939_v50, 4 }
 0x8e8   :  { %v2023_v23 = vmul.f32 1.442695, %v2022_v28  ;;  %v2573_v16 = vperm.slane %v2543_v11, 0  ;;  %v2546_v11 = vrot.slane %v6939_v50, 7 }
 0x8ea   :  { %5430 = vpow2.f32 %v2023_v23  ;;  %2499 = vperm.xlu2 %5273, %v2494_v13   ;;  %v2571_v23 = vperm.slane %v2541_v25, 0  ;;  %v2578_v13 = vperm.slane %v2547_v8, 0  ;;  %v2545_v25 = vrot.slane %v6939_v50, 6 }
 0x8eb   :  { %v2576_v50 = vperm.slane %v2546_v11, 0 }
 0x8ed   :  { %v2367_v9 = vpop.permute.xlu2 %2366  ;;  %v2640_v11 = vadd.f32 %v2576_v50, %v7059_v3 }
 0x8ef   :  { %v2672_v50 = vand.u32 2147483647, %v2640_v11 }
 0x8f0   :  { %v7041_v21 = vpop.eup %5430 }
 0x8f1   :  { %v2025_v29 = vsel %vm181_vm0, %v7041_v21, 0.0 }
 0x8f2   :  { %2520 = vperm.xlu2 %5273, %v2515_v59   ;;  %2026 = vadd.xlane.f32.xlu1 %v2025_v29  ;;  %v2549_v59 = vrot.slane %v6947_v20, 3  ;;  %v2633_v29 = vadd.f32 %v2569_v36, %v2367_v9 }
 0x8f4   :  { %v2580_v8 = vperm.slane %v2549_v59, 0  ;;  %v2665_v9 = vand.u32 2147483647, %v2633_v29 }
 0x8f5   :  { %v2374_v32 = vpop.permute.xlu2 %2373 }
 0x8f6   :  { %v2634_v28 = vadd.f32 %v2570_v1, %v2374_v32  ;;  %v7079_v1 = vpop.permute.xlu1 %2485  ;;  %v2889_v29 = vmul.f32 %v6943_v10, %v2665_v9 }
 0x8f8   :  { %v2666_v56 = vand.u32 2147483647, %v2634_v28  ;;  %v2551_v28 = vrot.slane %v6947_v20, 5 }
 0x8fa   :  { %2527 = vperm.xlu2 %5273, %v2522_v39   ;;  %v2572_v39 = vperm.slane %v2542_v0, 0 }
 0x8fd   :  { %v2381_v26 = vpop.permute.xlu2 %2380 }
 0x902   :  { %5278 = vset.pattern.permute.xlu2 %v8004_v24 }
 0x903   :  { %3054 = vperm.xlu2 %5278, %v7010_v52  }
 0x905   :  { %v2388_v31 = vpop.permute.xlu2 %2387 }
 0x906   :  { %v2636_v33 = vadd.f32 %v2572_v39, %v2388_v31  ;;  %v2581_v31 = vperm.slane %v2550_v15, 0  ;;  %v2552_v15 = vrot.slane %v6947_v20, 6 }
 0x908   :  { %v2583_v9 = vperm.slane %v2552_v15, 0 }
 0x90b   :  { %5280 = vset.pattern.permute.xlu2 %v7943_v18  ;;  %2874 = vperm.xlu1 %5276, %v5355_v42   ;;  %v2635_v42 = vadd.f32 %v2571_v23, %v2381_v26  ;;  %v2577_v18 = vperm.slane %v6947_v20, 0  ;;  %v2574_v23 = vperm.slane %v2544_v45, 0  ;;  %v2582_v45 = vperm.slane %v2551_v28, 0 }
 0x90c   :  { %3115 = vperm.xlu2 %5280, %v7010_v52   ;;  %v2402_v52 = vpop.permute.xlu0 %2401 }
 0x90d   :  { %v2395_v47 = vpop.permute.xlu2 %2394 }
 0x914   :  { %5281 = vset.pattern.permute.xlu2 %v7906_v27  ;;  %v2579_v27 = vperm.slane %v2548_v54, 0  ;;  %v2444_v0 = vpop.permute.xlu0 %2443  ;;  %v2637_v54 = vadd.f32 %v2573_v16, %v2395_v47  ;;  %v2638_v47 = vadd.f32 %v2574_v23, %v2402_v52 }
 0x915   :  { %v2423_v7 = vpop.permute.xlu2 %2422  ;;  %v2644_v59 = vadd.f32 %v2580_v8, %v2444_v0 }
 0x916   :  { %v2641_v48 = vadd.f32 %v2577_v18, %v2423_v7  ;;  %v2668_v18 = vand.u32 2147483647, %v2636_v33  ;;  %v2670_v0 = vand.u32 2147483647, %v2638_v47 }
 0x918   :  { %v2673_v7 = vand.u32 2147483647, %v2641_v48  ;;  %v2892_v33 = vmul.f32 %v6918_v49, %v2668_v18 }
 0x91d   :  { %v2430_v34 = vpop.permute.xlu2 %2429 }
 0x91e   :  { %v2642_v24 = vadd.f32 %v2578_v13, %v2430_v34  ;;  %v2667_v34 = vand.u32 2147483647, %v2635_v42  ;;  %v2575_v13 = vperm.slane %v2545_v25, 0  ;;  %v2669_v42 = vand.u32 2147483647, %v2637_v54 }
 0x91f   :  { %v2982_v54 = vsel %vm181_vm0, %v2892_v33, 0.0 }
 0x920   :  { %v2674_v36 = vand.u32 2147483647, %v2642_v24  ;;  %v2891_v39 = vmul.f32 %v6926_v43, %v2667_v34  ;;  %v2639_v10 = vadd.f32 %v2575_v13, %v7055_v62  ;;  %v2676_v43 = vand.u32 2147483647, %v2644_v59  ;;  %v2465_v34 = vpop.permute.xlu0 %2464 }
 0x921   :  { %v2893_v8 = vmul.f32 %v6936_v14, %v2669_v42 }
 0x922   :  { %v2898_v16 = vmul.f32 %v6953_v17, %v2674_v36  ;;  %v2977_v17 = vsel %vm181_vm0, %v2889_v29, 0.0  ;;  %v2980_v25 = vsel %vm181_vm0, %v2891_v39, 0.0  ;;  %v2671_v23 = vand.u32 2147483647, %v2639_v10 }
 0x923   :  { %v2894_v29 = vmul.f32 %v6945_v19, %v2670_v0  ;;  %v2554_v39 = vrot.slane %v6957_v57, 1 }
 0x924   :  { %v3039_v49 = vsel %vm181_vm0, %v2898_v16, 0.0 }
 0x925   :  { %v2437_v35 = vpop.permute.xlu2 %2436  ;;  %v2986_v19 = vsel %vm181_vm0, %v2894_v29, 0.0  ;;  %v2586_v33 = vperm.slane %v2554_v39, 0 }
 0x926   :  { %v2643_v32 = vadd.f32 %v2579_v27, %v2437_v35  ;;  %v2890_v27 = vmul.f32 %v6820_v63, %v2666_v56  ;;  %v2897_v63 = vmul.f32 %v6904_v53, %v2673_v7 }
 0x928   :  { %v2675_v35 = vand.u32 2147483647, %v2643_v32  ;;  %v2978_v56 = vsel %vm181_vm0, %v2890_v27, 0.0  ;;  %v7095_v32 = vpop.permute.xlu1 %2513  ;;  %v3038_v36 = vsel %vm181_vm0, %v2897_v63, 0.0  ;;  %v2984_v27 = vsel %vm181_vm0, %v2893_v8, 0.0  ;;  %v2507_v63 = vpop.permute.xlu0 %2506 }
 0x929   :  { %v2979_v62 = vadd.f32 %v2978_v56, %v2977_v17  ;;  %v3040_v14 = vadd.f32 %v3039_v49, %v3038_v36  ;;  %v7124_v17 = vpop.f32.mrf.mxu1  ;;  %v2896_v8 = vmul.f32 %v6993_v12, %v2672_v50 }
 0x92a   :  { %v2899_v48 = vmul.f32 %v6911_v22, %v2675_v35  ;;  %v2646_v22 = vadd.f32 %v2582_v45, %v7064_v44  ;;  %v2647_v35 = vadd.f32 %v2583_v9, %v2465_v34  ;;  %v2935_v34 = vperm.slane %v7124_v17, 0 }
 0x92b   :  { %v2981_v28 = vadd.f32 %v2980_v25, %v2979_v62  ;;  %v2556_v25 = vrot.slane %v6957_v57, 3 }
 0x92c   :  { %v2678_v7 = vand.u32 2147483647, %v2646_v22  ;;  %v2679_v15 = vand.u32 2147483647, %v2647_v35  ;;  %v2650_v22 = vadd.f32 %v2586_v33, %v7079_v1  ;;  %v2560_v33 = vrot.slane %v6957_v57, 7 }
 0x92d   :  { %v2451_v2 = vpop.permute.xlu2 %2450  ;;  %v2983_v13 = vadd.f32 %v2982_v54, %v2981_v28  ;;  %v2588_v11 = vperm.slane %v2556_v25, 0 }
 0x92e   :  { %v2645_v24 = vadd.f32 %v2581_v31, %v2451_v2  ;;  %v2553_v2 = vrot.slane %v6947_v20, 7  ;;  %v3041_v20 = vsel %vm181_vm0, %v2899_v48, 0.0  ;;  %v2900_v31 = vmul.f32 %v6924_v51, %v2676_v43 }
 0x92f   :  { %v3042_v59 = vadd.f32 %v3041_v20, %v3040_v14  ;;  %v2985_v16 = vadd.f32 %v2984_v27, %v2983_v13  ;;  %v2895_v51 = vmul.f32 %v6951_v38, %v2671_v23  ;;  %v2902_v45 = vmul.f32 %v6955_v4, %v2678_v7 }
 0x930   :  { %v2677_v53 = vand.u32 2147483647, %v2645_v24  ;;  %v2584_v18 = vperm.slane %v2553_v2, 0  ;;  %v2933_v3 = vpop.permute.xlu1 %2932  ;;  %v3043_v47 = vsel %vm181_vm0, %v2900_v31, 0.0  ;;  %v2555_v48 = vrot.slane %v6957_v57, 2  ;;  %v2994_v31 = vpop.permute.xlu0 %2993 }
 0x931   :  { %v3044_v56 = vadd.f32 %v3043_v47, %v3042_v59  ;;  %v2987_v10 = vadd.f32 %v2986_v19, %v2985_v16  ;;  %v2557_v38 = vrot.slane %v6957_v57, 4  ;;  %v2585_v2 = vperm.slane %v6957_v57, 0 }
 0x932   :  { %v2901_v44 = vmul.f32 %v6934_v37, %v2677_v53  ;;  %v2988_v4 = vsel %vm181_vm0, %v2895_v51, 0.0  ;;  %v3047_v49 = vsel %vm181_vm0, %v2902_v45, 0.0  ;;  %v2903_v53 = vmul.f32 %v6961_v46, %v2679_v15 }
 0x933   :  { %v2587_v0 = vperm.slane %v2555_v48, 0  ;;  %v3057_v20 = vperm.slane %v7124_v17, 2  ;;  %v2989_v23 = vadd.f32 %v2988_v4, %v2987_v10  ;;  %v2990_v46 = vsel %vm181_vm0, %v2896_v8, 0.0 }
 0x934   :  { %v3045_v37 = vsel %vm181_vm0, %v2901_v44, 0.0  ;;  %v3049_v1 = vsel %vm181_vm0, %v2903_v53, 0.0  ;;  %v2682_v14 = vand.u32 2147483647, %v2650_v22  ;;  %v2936_v7 = vadd.f32 %v2935_v34, %v2933_v3 }
 0x935   :  { %v7057_v41 = vpop.permute.xlu2 %2471  ;;  %v3046_v43 = vadd.f32 %v3045_v37, %v3044_v56  ;;  %v2558_v59 = vrot.slane %v6957_v57, 5  ;;  %v2938_v48 = vmul.f32 0.4, %v7027_v58  ;;  %v2592_v8 = vperm.slane %v2560_v33, 0 }
 0x936   :  { %v2648_v42 = vadd.f32 %v2584_v18, %v7057_v41  ;;  %v2906_v51 = vmul.f32 %v6941_v6, %v2682_v14  ;;  %v2937_v45 = vmul.f32 0.6, %v2936_v7  ;;  %v8011_v14 = vld [vmem:[#allocation49_spill] sm:$0xff] }
 0x937   :  { %v3048_v54 = vadd.f32 %v3047_v49, %v3046_v43  ;;  %v2590_v56 = vperm.slane %v2558_v59, 0  ;;  %v8006_v49 = vld [vmem:[#allocation15_spill] sm:$0xff] }
 0x938   :  { %v2680_v41 = vand.u32 2147483647, %v2648_v42 }
 0x939   :  { %v3050_v13 = vadd.f32 %v3049_v1, %v3048_v54  ;;  %v2654_v4 = vadd.f32 %v2590_v56, %v7095_v32 }
 0x93a   :  { %v2904_v9 = vmul.f32 %v6983_v5, %v2680_v41  ;;  %v2589_v5 = vperm.slane %v2557_v38, 0 }
 0x93c   :  { %v3051_v27 = vsel %vm181_vm0, %v2904_v9, 0.0  ;;  %v2653_v47 = vadd.f32 %v2589_v5, %v2507_v63 }
 0x93d   :  { %v7061_v60 = vpop.permute.xlu2 %2478  ;;  %v3052_v42 = vadd.f32 %v3051_v27, %v3050_v13 }
 0x93e   :  { %v2649_v62 = vadd.f32 %v2585_v2, %v7061_v60  ;;  %v2996_v60 = vperm.slane %v7124_v17, 1  ;;  %v2685_v63 = vand.u32 2147483647, %v2653_v47  ;;  %v2939_v2 = vadd.f32 %v2938_v48, %v2937_v45 }
 0x93f   :  { %v3060_v6 = vmul.f32 0.4, %v3052_v42 }
 0x940   :  { %v2681_v44 = vand.u32 2147483647, %v2649_v62  ;;  %v2997_v39 = vadd.f32 %v2996_v60, %v2994_v31 }
 0x942   :  { %v2905_v37 = vmul.f32 %v6985_v40, %v2681_v44  ;;  %v2998_v41 = vmul.f32 0.6, %v2997_v39  ;;  %v3100_v40 = vsel %vm181_vm0, %v2906_v51, 0.0  ;;  %v2879_v44 = vpop.permute.xlu0 %2878 }
 0x944   :  { %v3099_v43 = vsel %vm181_vm0, %v2905_v37, 0.0 }
 0x945   :  { %v7069_v55 = vpop.permute.xlu2 %2492  ;;  %v3101_v9 = vadd.f32 %v3100_v40, %v3099_v43 }
 0x946   :  { %v2651_v12 = vadd.f32 %v2587_v0, %v7069_v55  ;;  %v2991_v55 = vadd.f32 %v2990_v46, %v2989_v23  ;;  %v8010_v23 = vld [vmem:[#allocation20_spill] sm:$0xff] }
 0x948   :  { %v2683_v29 = vand.u32 2147483647, %v2651_v12  ;;  %v2999_v3 = vmul.f32 0.4, %v2991_v55  ;;  %v2909_v12 = vmul.f32 %v8010_v23, %v2685_v63 }
 0x94a   :  { %v2907_v19 = vmul.f32 %v6965_v30, %v2683_v29  ;;  %v3000_v30 = vadd.f32 %v2999_v3, %v2998_v41  ;;  %v3106_v60 = vsel %vm181_vm0, %v2909_v12, 0.0 }
 0x94c   :  { %v3102_v58 = vsel %vm181_vm0, %v2907_v19, 0.0 }
 0x94d   :  { %v7081_v26 = vpop.permute.xlu2 %2499 }
 0x94e   :  { %v2652_v18 = vadd.f32 %v2588_v11, %v7081_v26  ;;  %v2686_v11 = vand.u32 2147483647, %v2654_v4 }
 0x950   :  { %v2684_v50 = vand.u32 2147483647, %v2652_v18  ;;  %v2910_v31 = vmul.f32 %v8011_v14, %v2686_v11  ;;  %v3428_v14 = vld [vmem:[#allocation2 + $0x8] sm:$0xff] }
 0x952   :  { %v3108_v13 = vsel %vm181_vm0, %v2910_v31, 0.0  ;;  %v3429_v31 = vld [vmem:[#allocation2 + $0x10] sm:$0xff] }
 0x955   :  { %v7099_v52 = vpop.permute.xlu2 %2520 }
 0x95d   :  { %v7115_v24 = vpop.permute.xlu2 %2527 }
 0x95e   :  { %v2656_v46 = vadd.f32 %v2592_v8, %v7115_v24 }
 0x960   :  { %v2688_v27 = vand.u32 2147483647, %v2656_v46 }
 0x962   :  { %v2912_v59 = vmul.f32 %v2879_v44, %v2688_v27  ;;  %v3430_v27 = vld [vmem:[#allocation2 + $0x18] sm:$0xff] }
 0x964   :  { %v3112_v51 = vsel %vm181_vm0, %v2912_v59, 0.0 }
 0x965   :  { %v2027_v36 = vpop.xlane.xlu1 %2026  ;;  %v3055_v28 = vpop.permute.xlu2 %3054 }
 0x966   :  { %5432 = vrcp.f32 %v2027_v36  ;;  %v3058_v35 = vadd.f32 %v3057_v20, %v3055_v28  ;;  %v3103_v20 = vadd.f32 %v3102_v58, %v3101_v9 }
 0x968   :  { %v3059_v26 = vmul.f32 0.6, %v3058_v35  ;;  %v3118_v35 = vperm.slane %v7124_v17, 3 }
 0x96a   :  { %v3061_v25 = vadd.f32 %v3060_v6, %v3059_v26 }
 0x96c   :  { %v5433_v16 = vpop.eup %5432 }
 0x96d   :  { %v2029_v15 = vmul.f32 %v5433_v16, %v7041_v21  ;;  %v8005_v21 = vld [vmem:[#allocation47_spill] sm:$0xff]  ;;  %v3116_v29 = vpop.permute.xlu2 %3115 }
 0x96e   :  { %v2908_v38 = vmul.f32 %v8005_v21, %v2684_v50 }
 0x96f   :  { %v7151_v10 = vadd.f32 %v2029_v15, %v6902_v61  ;;  %v2559_v61 = vrot.slane %v6957_v57, 6 }
 0x970   :  { %v3104_v57 = vsel %vm181_vm0, %v2908_v38, 0.0 }
 0x971   :  { %vm2913_vm5 = vcmp.gt.f32.partialorder %v7151_v10, 0.0  ;;  %v2591_v28 = vperm.slane %v2559_v61, 0  ;;  %v3105_v1 = vadd.f32 %v3104_v57, %v3103_v20 }
 0x972   :  { %vm7163_vm6 = vmor %vm2913_vm5, %vm1313_vm4 }
 0x973   :  { %v2940_v62 = vsel %vm7163_vm6, %v2939_v2, -1e+30  ;;  %v3001_v0 = vsel %vm7163_vm6, %v3000_v30, -1e+30  ;;  %v3062_v32 = vsel %vm7163_vm6, %v3061_v25, -1e+30  ;;  %v2655_v5 = vadd.f32 %v2591_v28, %v7099_v52 }
 0x974   :  { %v2941_v34 = vsel %vm181_vm0, %v2940_v62, -inf  ;;  %v3002_v54 = vsel %vm181_vm0, %v3001_v0, -inf  ;;  %v3063_v36 = vsel %vm181_vm0, %v3062_v32, -inf  ;;  %v3107_v18 = vadd.f32 %v3106_v60, %v3105_v1  ;;  %v3427_v60 = vld [vmem:[#allocation2] sm:$0xff] }
 0x975   :  { %2942 = vmax.xlane.f32.xlu1 %v2941_v34  ;;  %3003 = vmax.xlane.f32.xlu2 %v3002_v54  ;;  %v2687_v7 = vand.u32 2147483647, %v2655_v5  ;;  %v3119_v52 = vadd.f32 %v3118_v35, %v3116_v29  ;;  %v3180_v5 = vsel %vm181_vm0, %v7151_v10, 0.0 }
 0x976   :  { %3064 = vmax.xlane.f32.xlu0 %v3063_v36  ;;  %v3109_v39 = vadd.f32 %v3108_v13, %v3107_v18  ;;  %v5356_v18 = vld [vmem:[%s7785_s11] ss:$0 sm:$0xff] }
 0x977   :  { %v3120_v37 = vmul.f32 0.6, %v3119_v52  ;;  %v5359_v52 = vld [vmem:[%s7789_s15 + $0x6] ss:$0 sm:$0xff] }
 0x97d   :  { %v2875_v55 = vpop.permute.xlu1 %2874 }
 0x97e   :  { %v2911_v24 = vmul.f32 %v2875_v55, %v2687_v7 }
 0x980   :  { %v3110_v42 = vsel %vm181_vm0, %v2911_v24, 0.0 }
 0x981   :  { %v3111_v16 = vadd.f32 %v3110_v42, %v3109_v39  ;;  %v5357_v39 = vld [vmem:[%s7789_s15 + $0x5] ss:$0 sm:$0xff]  ;;  %v5358_v42 = vld [vmem:[%s7789_s15 + $0xa] ss:$0 sm:$0xff] }
 0x983   :  { %v3113_v47 = vadd.f32 %v3112_v51, %v3111_v16 }
 0x985   :  { %v3121_v50 = vmul.f32 0.4, %v3113_v47  ;;  %v5361_v47 = vld [vmem:[%s7789_s15 + $0x14] ss:$0 sm:$0xff] }
 0x987   :  { %v3122_v45 = vadd.f32 %v3121_v50, %v3120_v37 }
 0x989   :  { %v3123_v17 = vsel %vm7163_vm6, %v3122_v45, -1e+30 }
 0x98a   :  { %v3124_v15 = vsel %vm181_vm0, %v3123_v17, -inf }
 0x98b   :  { %3125 = vmax.xlane.f32.xlu1 %v3124_v15 }
 0x9e8   :  { %v2943_v26 = vpop.xlane.xlu1 %2942  ;;  %v3004_v3 = vpop.xlane.xlu2 %3003 }
 0x9e9   :  { %v2944_v56 = vsub.f32 %v2940_v62, %v2943_v26  ;;  %v3065_v19 = vpop.xlane.xlu0 %3064  ;;  %v3005_v33 = vsub.f32 %v3001_v0, %v3004_v3 }
 0x9ea   :  { %v3066_v41 = vsub.f32 %v3062_v32, %v3065_v19  ;;  %v8012_v19 = vmov 1.0  }
 0x9eb   :  { %v2945_v48 = vmul.f32 1.442695, %v2944_v56  ;;  %v3006_v6 = vmul.f32 1.442695, %v3005_v33  ;;  %v5363_v56 = vld [vmem:[%s7789_s15 + $0xf] ss:$0 sm:$0xff] }
 0x9ec   :  { %v3067_v40 = vmul.f32 1.442695, %v3066_v41  ;;  %v5364_v41 = vld [vmem:[%s7789_s15] ss:$0 sm:$0xff] }
 0x9ed   :  { %5434 = vpow2.f32 %v2945_v48  ;;  %v5365_v48 = vld [vmem:[%s7789_s15 + $0x1] ss:$0 sm:$0xff] }
 0x9ee   :  { %5436 = vpow2.f32 %v3067_v40  ;;  %v5367_v40 = vld [vmem:[%s7789_s15 + $0x3] ss:$0 sm:$0xff] }
 0x9ef   :  { %5438 = vpow2.f32 %v3006_v6  ;;  %v5366_v6 = vld [vmem:[%s7789_s15 + $0x2] ss:$0 sm:$0xff] }
 0x9f3   :  { %v5435_v63 = vpop.eup %5434 }
 0x9f4   :  { %v5437_v43 = vpop.eup %5436  ;;  %v2947_v21 = vsel %vm181_vm0, %v5435_v63, 0.0 }
 0x9f5   :  { %v5439_v38 = vpop.eup %5438  ;;  %2948 = vadd.xlane.f32.xlu2 %v2947_v21  ;;  %v3069_v2 = vsel %vm181_vm0, %v5437_v43, 0.0  ;;  %v3432_v21 = vld [vmem:[#allocation5 + $0x8] sm:$0xff] }
 0x9f6   :  { %3070 = vadd.xlane.f32.xlu0 %v3069_v2  ;;  %v3008_v30 = vsel %vm181_vm0, %v5439_v38, 0.0  ;;  %v3434_v2 = vld [vmem:[#allocation5 + $0x18] sm:$0xff] }
 0x9f7   :  { %3009 = vadd.xlane.f32.xlu1 %v3008_v30 }
 0x9fe   :  { %v3126_v25 = vpop.xlane.xlu1 %3125 }
 0x9ff   :  { %v3127_v4 = vsub.f32 %v3123_v17, %v3126_v25  ;;  %v5362_v17 = vld [vmem:[%s7789_s15 + $0xd] ss:$0 sm:$0xff] }
 0xa01   :  { %v3128_v58 = vmul.f32 1.442695, %v3127_v4 }
 0xa03   :  { %5440 = vpow2.f32 %v3128_v58  ;;  %v8013_v58 = vmov 0.0  }
 0xa09   :  { %v5441_v61 = vpop.eup %5440 }
 0xa0a   :  { %v3130_v8 = vsel %vm181_vm0, %v5441_v61, 0.0 }
 0xa0b   :  { %3131 = vadd.xlane.f32.xlu2 %v3130_v8 }
 0xa68   :  { %v2949_v22 = vpop.xlane.xlu2 %2948 }
 0xa69   :  { %5442 = vrcp.f32 %v2949_v22  ;;  %v3071_v62 = vpop.xlane.xlu0 %3070 }
 0xa6a   :  { %v3010_v9 = vpop.xlane.xlu1 %3009 }
 0xa6b   :  { %5444 = vrcp.f32 %v3010_v9 }
 0xa6c   :  { %5446 = vrcp.f32 %v3071_v62 }
 0xa6f   :  { %v5443_v0 = vpop.eup %5442 }
 0xa70   :  { %v2951_v32 = vmul.f32 %v5443_v0, %v5435_v63  ;;  %v5368_v63 = vld [vmem:[%s7789_s15 + $0x4] ss:$0 sm:$0xff] }
 0xa71   :  { %v5445_v57 = vpop.eup %5444 }
 0xa72   :  { %v3012_v34 = vmul.f32 %v5445_v57, %v5439_v38  ;;  %5140 = vmatmul.msk.f32.vlgmr.msra.gmra.mxu3 %vm181_vm0, %v2951_v32  ;;  %v5447_v54 = vpop.eup %5446  ;;  %v3433_v38 = vld [vmem:[#allocation5 + $0x10] sm:$0xff] }
 0xa73   :  { %v3073_v36 = vmul.f32 %v5447_v54, %v5437_v43  ;;  %v3431_v43 = vld [vmem:[#allocation5] sm:$0xff] }
 0xa74   :  { %5142 = vmatmul.msk.f32.vlgmr.msrb.gmra.mxu1 %vm181_vm0, %v3012_v34  ;;  %v8014_v34 = vld [vmem:[#allocation18_spill] sm:$0xff] }
 0xa7a   :  { %5144 = vmatmul.msk.f32.vlgmr.msrb.gmra.mxu3 %vm181_vm0, %v3073_v36 }
 0xa7e   :  { %v3132_v20 = vpop.xlane.xlu2 %3131 }
 0xa7f   :  { %5448 = vrcp.f32 %v3132_v20 }
 0xa85   :  { %v5449_v23 = vpop.eup %5448 }
 0xa86   :  { %v3134_v12 = vmul.f32 %v5449_v23, %v5441_v61  ;;  %v5369_v23 = vld [vmem:[%s7789_s15 + $0x8] ss:$0 sm:$0xff] }
 0xa88   :  { %5146 = vmatmul.msk.f32.vlgmr.msra.gmra.mxu1 %vm181_vm0, %v3134_v12  ;;  %v5370_v12 = vld [vmem:[%s7789_s15 + $0x11] ss:$0 sm:$0xff] }
 0xaf1   :  { %v3035_v11 = vpop.f32.mrf.mxu1 }
 0xaf2   :  { %3161 = vrot.lane.b32.xlu1 %v3035_v11, %s5638_s30  ;;  %v5371_v11 = vld [vmem:[%s7789_s15 + $0x9] ss:$0 sm:$0xff] }
 0xaf5   :  { %v2974_v28 = vpop.f32.mrf.mxu3 }
 0xafd   :  { %v3096_v46 = vpop.f32.mrf.mxu3 }
 0xafe   :  { %3165 = vrot.lane.b32.xlu0 %v3096_v46, %s5646_s26  ;;  %v5373_v46 = vld [vmem:[%s7789_s15 + $0x10] ss:$0 sm:$0xff] }
 0xb05   :  { %v3157_v1 = vpop.f32.mrf.mxu1 }
 0xb06   :  { %3169 = vrot.lane.b32.xlu2 %v3157_v1, %s5647_s27  ;;  %v5374_v1 = vld [vmem:[%s7789_s15 + $0x7] ss:$0 sm:$0xff] }
 0xb0e   :  { %4130 = vperm.xlu2 %5281, %v5364_v41  }
 0xb16   :  { %4134 = vperm.xlu2 %5281, %v5365_v48  }
 0xb1e   :  { %4138 = vperm.xlu2 %5281, %v5366_v6  }
 0xb26   :  { %4142 = vperm.xlu2 %5281, %v5367_v40  }
 0xb28   :  { %3181 = vadd.xlane.f32.xlu0 %v3180_v5  ;;  %v5375_v5 = vld [vmem:[%s7789_s15 + $0x12] ss:$0 sm:$0xff] }
 0xb2e   :  { %4146 = vperm.xlu2 %5281, %v5368_v63  }
 0xb51   :  { %3489 = vxpose.xlu0.b32.start [1/4] (short) (narrow) %v3427_v60, 32 }
 0xb59   :  { %3490 = vxpose.xlu0.b32.cont [2/4] (short) (narrow) %v3428_v14, 32 }
 0xb60   :  { %v3170_v55 = vpop.permute.xlu2 %3169 }
 0xb61   :  { %3491 = vxpose.xlu0.b32.cont [3/4] (short) (narrow) %v3429_v31, 32 }
 0xb64   :  { %v3162_v44 = vpop.permute.xlu1 %3161 }
 0xb65   :  { %v3172_v7 = vsel %vm181_vm0, %v2974_v28, %v3162_v44  ;;  %v5372_v28 = vld [vmem:[%s7789_s15 + $0xb] ss:$0 sm:$0xff]  ;;  %v5380_v44 = vld [vmem:[%s7789_s15 + $0x1a] ss:$0 sm:$0xff] }
 0xb69   :  { %3492 = vxpose.xlu0.b32.end [4/4] (short) (narrow) %v3430_v27, 32 }
 0xb70   :  { %v3166_v35 = vpop.permute.xlu0 %3165 }
 0xb71   :  { %v3173_v13 = vsel %vm1317_vm2, %v3172_v7, %v3166_v35  ;;  %v5381_v7 = vld [vmem:[%s7789_s15 + $0xe] ss:$0 sm:$0xff]  ;;  %v5382_v35 = vld [vmem:[%s7789_s15 + $0x17] ss:$0 sm:$0xff] }
 0xb72   :  { %v3174_v59 = vsel %vm1756_vm9, %v3173_v13, %v3170_v55  ;;  %v5383_v55 = vld [vmem:[%s7789_s15 + $0x16] ss:$0 sm:$0xff] }
 0xb73   :  { %v3178_v29 = vadd.f32 %v5356_v18, %v3174_v59  ;;  %v7298_v18 = vpop.permute.xlu2 %4130  ;;  %v5384_v59 = vld [vmem:[%s7789_s15 + $0x1c] ss:$0 sm:$0xff] }
 0xb75   :  { %v3179_v24 = vmax.f32 %v3178_v29, 0.0  ;;  %v5385_v29 = vld [vmem:[%s7789_s15 + $0x1b] ss:$0 sm:$0xff] }
 0xb77   :  { %3205 = vmatpush.msra.mxu3 %v3179_v24  ;;  %3296 = vmatpush.msra.mxu0 %v3179_v24 }
 0xb78   :  { %5147 = vmatmul.msk.f32.vlgmr.msra.gmra.mxu3 %vm181_vm0, %v7151_v10 }
 0xb79   :  { %3481 = vmatpush.msrb.mxu0 %v3430_v27  ;;  %3341 = vmatpush.msrb.mxu3 %v7151_v10  ;;  %v5360_v10 = vld [vmem:[%s7789_s15 + $0x13] ss:$0 sm:$0xff]  ;;  %v5379_v27 = vld [vmem:[%s7789_s15 + $0x18] ss:$0 sm:$0xff] }
 0xb7b   :  { %3482 = vmatpush.msrb.mxu0 %v3429_v31  ;;  %v5378_v31 = vld [vmem:[%s7789_s15 + $0x15] ss:$0 sm:$0xff]  ;;  %v7309_v13 = vpop.permute.xlu2 %4134 }
 0xb7d   :  { %3483 = vmatpush.msrb.mxu0 %v3428_v14  ;;  %v5377_v14 = vld [vmem:[%s7789_s15 + $0xc] ss:$0 sm:$0xff] }
 0xb7f   :  { %3484 = vmatpush.msrb.mxu0 %v3427_v60  ;;  %v5376_v60 = vld [vmem:[%s7789_s15 + $0x19] ss:$0 sm:$0xff] }
 0xb9b   :  { %v3182_v16 = vpop.xlane.xlu0 %3181 }
 0xb9c   :  { %v3184_v51 = vmax.f32 %v3182_v16, 1.0  ;;  %vm3183_vm7 = vcmp.gt.f32.partialorder %v3182_v16, 0.0 }
 0xb9e   :  { %5450 = vrcp.f32 %v3184_v51 }
 0xba4   :  { %v5451_v37 = vpop.eup %5450 }
 0xba5   :  { %v3186_v50 = vsel %vm3183_vm7, %v5451_v37, 0.0 }
 0xbd7   :  { %4150 = vperm.xlu0 %5279, %v5357_v39   ;;  %v5386_v39 = vld [vmem:[%s7789_s15 + $0x1d] ss:$0 sm:$0xff] }
 0xbdf   :  { %4170 = vperm.xlu0 %5279, %v5358_v42  }
 0xbe7   :  { %4154 = vperm.xlu0 %5279, %v5359_v52  }
 0xbef   :  { %4206 = vperm.xlu0 %5279, %v5360_v10  }
 0xbf5   :  { %v3505_v41 = vpop.trf.xlu0 }
 0xbf7   :  { %4210 = vperm.xlu0 %5279, %v5361_v47  }
 0xbfb   :  { %v3207_v45 = vpop.f32.mrf.mxu3 }
 0xbfc   :  { %v3210_v15 = vmul.f32 %v3207_v45, %v3186_v50 }
 0xbfe   :  { %v3211_v26 = vsub.f32 %v3179_v24, %v3210_v15  ;;  %v7317_v24 = vpop.permute.xlu2 %4138 }
 0xbff   :  { %4182 = vperm.xlu0 %5279, %v5362_v17  }
 0xc00   :  { %v3212_v3 = vand.u32 2147483647, %v3211_v26 }
 0xc02   :  { %5148 = vmatpush.xpose.msk.msrb.mxu1 %vm357_vm1, %v3212_v3  ;;  %5150 = vmatmul.msk.f32.vlgmr.msra.gmra.mxu2 %vm357_vm1, %v3212_v3 }
 0xc05   :  { %5149 = vmatmul.msk.f32.vlgmr.msrb.gmra.mxu1 %vm357_vm1, %v8012_v19 }
 0xc06   :  { %v7323_v42 = vpop.permute.xlu2 %4142 }
 0xc07   :  { %4190 = vperm.xlu0 %5279, %v5363_v56  }
 0xc0e   :  { %v7326_v52 = vpop.permute.xlu2 %4146 }
 0xc0f   :  { %5284 = vset.pattern.permute.xlu0 %v8006_v49 }
 0xc82   :  { %v3233_v30 = vpop.f32.mrf.mxu1 }
 0xc83   :  { %v3261_v25 = vperm.slane %v3233_v30, 0 }
 0xc85   :  { %v3253_v33 = vpop.f32.mrf.mxu2 }
 0xc86   :  { %3258 = vperm.xlu1 %5276, %v3253_v33  }
 0xcbb   :  { %3562 = vxpose.xlu1.b32.start [1/4] (short) (narrow) %v3431_v43, 32 }
 0xcc3   :  { %3563 = vxpose.xlu1.b32.cont [2/4] (short) (narrow) %v3432_v21, 32 }
 0xccb   :  { %3564 = vxpose.xlu1.b32.cont [3/4] (short) (narrow) %v3433_v38, 32  ;;  %v3506_v38 = vpop.trf.xlu0 }
 0xcd3   :  { %3565 = vxpose.xlu1.b32.end [4/4] (short) (narrow) %v3434_v2, 32  ;;  %v3507_v30 = vpop.trf.xlu0 }
 0xcf8   :  { %v3259_v4 = vpop.permute.xlu1 %3258 }
 0xcf9   :  { %vm3262_vm8 = vcmp.gt.f32.partialorder %v3259_v4, %v3261_v25  ;;  %vm3263_vm10 = vcmp.eq.f32.partialorder %v3259_v4, %v3261_v25  ;;  %v3508_v4 = vpop.trf.xlu0 }
 0xcfa   :  { %vm3264_vm11 = vmand %vm3263_vm10, %vm1882_vm12  ;;  %vm3393_vm10 = vcmask 27648  }
 0xcfb   :  { %vm3265_vm13 = vmor %vm3262_vm8, %vm3264_vm11  ;;  %vm3406_vm8 = vcmask 257024   ;;  %vm4328_vm11 = vcmask 31744  }
 0xcfc   :  { %v5151_v61 = vsel %vm3265_vm13, 1.0, %v8013_v58 }
 0xcfd   :  { %v3268_v8 = vsel %vm181_vm0, %v5151_v61, 0.0 }
 0xcfe   :  { %v3269_v22 = vrot.slane %v3268_v8, 4 }
 0xd00   :  { %v3270_v9 = vadd.f32 %v3269_v22, %v3268_v8  ;;  %v7360_v8 = vld [vmem:[%s7788_s14] sm:$0xf] }
 0xd02   :  { %v3271_v62 = vrot.slane %v3270_v9, 2 }
 0xd04   :  { %v3272_v0 = vadd.f32 %v3271_v62, %v3270_v9 }
 0xd06   :  { %v3273_v32 = vrot.slane %v3272_v0, 1 }
 0xd08   :  { %v3274_v57 = vadd.f32 %v3273_v32, %v3272_v0 }
 0xd0a   :  { %vm3275_vm14 = vcmp.eq.f32.partialorder %v3274_v57, %v8014_v34 }
 0xd0b   :  { %v5152_v54 = vsel %vm3275_vm14, 1.0, %v8013_v58 }
 0xd0c   :  { %5153 = vmatmul.msk.f32.vlgmr.msra.gmra.mxu0 %vm181_vm0, %v5152_v54  ;;  %5155 = vmatmul.msk.f32.vlgmr.msrb.gmra.mxu3 %vm181_vm0, %v5152_v54  ;;  %v3301_v36 = vmul.f32 %v5152_v54, %v3261_v25 }
 0xd0d   :  { %5156 = vmatpush.xpose.msk.msra.mxu1 %vm181_vm0, %v5152_v54 }
 0xd0e   :  { %v3303_v20 = vsel %vm3302_vm15, %v3301_v36, 0.0 }
 0xd0f   :  { %3304 = vadd.xlane.f32.xlu2 %v3303_v20 }
 0xd27   :  { %4162 = vperm.xlu2 %5281, %v5369_v23  }
 0xd2d   :  { %4198 = vperm.xlu1 %5276, %v5370_v12  }
 0xd2f   :  { %4166 = vperm.xlu2 %5281, %v5371_v11  }
 0xd35   :  { %4174 = vperm.xlu1 %5276, %v5372_v28  }
 0xd37   :  { %4194 = vperm.xlu2 %5281, %v5373_v46  }
 0xd3d   :  { %4158 = vperm.xlu1 %5276, %v5374_v1  }
 0xd3f   :  { %4202 = vperm.xlu2 %5281, %v5375_v5  }
 0xd45   :  { %4230 = vperm.xlu1 %5276, %v5376_v60  }
 0xd47   :  { %4178 = vperm.xlu2 %5281, %v5377_v14  }
 0xd4d   :  { %4214 = vperm.xlu1 %5276, %v5378_v31  }
 0xd4f   :  { %4226 = vperm.xlu2 %5281, %v5379_v27  }
 0xd55   :  { %4234 = vperm.xlu1 %5276, %v5380_v44  }
 0xd57   :  { %4186 = vperm.xlu2 %5281, %v5381_v7  }
 0xd5d   :  { %4222 = vperm.xlu1 %5276, %v5382_v35  }
 0xd5f   :  { %4218 = vperm.xlu2 %5281, %v5383_v55   ;;  %v3578_v6 = vpop.trf.xlu1 }
 0xd65   :  { %4242 = vperm.xlu1 %5276, %v5384_v59  }
 0xd67   :  { %4238 = vperm.xlu2 %5281, %v5385_v29   ;;  %v3579_v2 = vpop.trf.xlu1 }
 0xd6d   :  { %4246 = vperm.xlu1 %5276, %v5386_v39  }
 0xd6f   :  { %5282 = vset.pattern.permute.xlu2 %v8006_v49  ;;  %v3580_v25 = vpop.trf.xlu1 }
 0xd75   :  { %5283 = vset.pattern.permute.xlu1 %v8006_v49  ;;  %v8028_v49 = vld [vmem:[#allocation18_spill] sm:$0xff] }
 0xd77   :  { %v3581_v61 = vpop.trf.xlu1 }
 0xd82   :  { %v3305_v16 = vpop.xlane.xlu2 %3304 }
 0xd83   :  { %v5154_v10 = vmul.f32 -1.442695, %v3305_v16  ;;  %v8017_v16 = vmov 0  }
 0xd85   :  { %5452 = vpow2.f32 %v5154_v10 }
 0xd89   :  { %v3298_v40 = vpop.f32.mrf.mxu0 }
 0xd8a   :  { %v7365_v57 = vpop.permute.xlu2 %4162 }
 0xd8b   :  { %v5453_v51 = vpop.eup %5452 }
 0xd8c   :  { %v3309_v47 = vadd.f32 1.0, %v5453_v51 }
 0xd8e   :  { %5454 = vrcp.f32 %v3309_v47  ;;  %v3321_v15 = vand.u32 2147483648, %v3309_v47  ;;  %v3319_v3 = vand.u32 2147483647, %v3309_v47  ;;  %vm3315_vm5 = vweird.f32 %v3309_v47 }
 0xd8f   :  { %v3343_v37 = vpop.f32.mrf.mxu3 }
 0xd90   :  { %5157 = vmatmul.msk.f32.vlgmr.msra.gmra.mxu1 %vm181_vm0, %v3343_v37  ;;  %v3322_v33 = vor.u32 1.1754944e-38, %v3321_v15  ;;  %vm3320_vm7 = vcmp.eq.f32.partialorder %v3319_v3, 8.507059e+37  ;;  %v7398_v37 = vpop.permute.xlu0 %4150 }
 0xd92   :  { %v7370_v12 = vpop.permute.xlu2 %4166 }
 0xd94   :  { %v5455_v50 = vpop.eup %5454 }
 0xd95   :  { %v3311_v45 = vmul.f32 %v5455_v50, %v3309_v47  ;;  %vm3316_vm3 = vweird.f32 %v5455_v50 }
 0xd96   :  { %vm3317_vm6 = vmor %vm3315_vm5, %vm3316_vm3 }
 0xd97   :  { %v3312_v17 = vsub.f32 1.0, %v3311_v45 }
 0xd98   :  { %v7406_v15 = vpop.permute.xlu0 %4170 }
 0xd99   :  { %v3313_v26 = vmul.f32 %v5455_v50, %v3312_v17 }
 0xd9a   :  { %v7379_v14 = vpop.permute.xlu2 %4194 }
 0xd9b   :  { %v3314_v56 = vadd.f32 %v5455_v50, %v3313_v26 }
 0xd9d   :  { %v3318_v48 = vsel %vm3317_vm6, %v5455_v50, %v3314_v56 }
 0xd9e   :  { %v3323_v63 = vsel %vm3320_vm7, %v3322_v33, %v3318_v48 }
 0xd9f   :  { %v7329_v43 = vmul.f32 %v3323_v63, %v3298_v40  ;;  %v7381_v27 = vpop.permute.xlu1 %4198 }
 0xda0   :  { %v7415_v33 = vpop.permute.xlu0 %4154 }
 0xda1   :  { %8015 = vst [vmem:[#allocation33_spill] sm:$0xff] %v7329_v43  ;;  %5158 = vmatpush.xpose.msk.msrb.mxu2 %vm357_vm1, %v7329_v43  ;;  %5160 = vmatmul.msk.f32.vlgmr.msrb.gmra.mxu0 %vm357_vm1, %v7329_v43  ;;  %v7337_v21 = vsel %vm3406_vm8, %v7329_v43, 0.0 }
 0xda2   :  { %8016 = vst [vmem:[#allocation19_spill] sm:$0xff] %v7337_v21  ;;  %5161 = vmatpush.xpose.msk.msra.mxu3 %vm357_vm1, %v7329_v43  ;;  %5166 = vmatpush.xpose.msk.msrb.mxu1 %vm357_vm1, %v7329_v43  ;;  %v7385_v55 = vpop.permute.xlu2 %4202 }
 0xda4   :  { %5159 = vmatmul.msk.f32.vlgmr.msrb.gmra.mxu2 %vm357_vm1, %v7329_v43 }
 0xda5   :  { %5162 = vmatmul.msk.f32.vlgmr.msra.gmra.mxu3 %vm357_vm1, %v3505_v41  ;;  %5167 = vmatmul.msk.f32.vlgmr.msrb.gmra.mxu1 %vm357_vm1, %v3578_v6 }
 0xda6   :  { %4629 = vmatpush.msrb.mxu3 %v8012_v19  ;;  %5171 = vmatpush.xpose.msk.msra.mxu2 %vm357_vm1, %v7360_v8 }
 0xda7   :  { %v7389_v29 = vpop.permute.xlu1 %4174 }
 0xda8   :  { %4630 = vmatpush.msrb.mxu3 %v8012_v19 }
 0xdaa   :  { %4631 = vmatpush.msrb.mxu3 %v8012_v19  ;;  %v7395_v51 = vpop.permute.xlu2 %4178 }
 0xdac   :  { %4632 = vmatpush.msrb.mxu3 %v8012_v19 }
 0xdad   :  { %5163 = vmatmul.msk.f32.gmra.mxu3 %vm357_vm1, %v3506_v38  ;;  %5168 = vmatmul.msk.f32.gmra.mxu1 %vm357_vm1, %v3579_v2  ;;  %v7430_v2 = vpop.permute.xlu0 %4206 }
 0xdaf   :  { %v7400_v50 = vpop.permute.xlu1 %4158 }
 0xdb2   :  { %v7404_v17 = vpop.permute.xlu2 %4226 }
 0xdb5   :  { %5164 = vmatmul.msk.f32.gmra.mxu3 %vm357_vm1, %v3507_v30  ;;  %5169 = vmatmul.msk.f32.gmra.mxu1 %vm357_vm1, %v3580_v25 }
 0xdb7   :  { %v7408_v26 = vpop.permute.xlu1 %4230 }
 0xdba   :  { %v7413_v56 = vpop.permute.xlu2 %4186 }
 0xdbd   :  { %5165 = vmatmul.msk.f32.gmra.mxu3 %vm357_vm1, %v3508_v4  ;;  %5170 = vmatmul.msk.f32.gmra.mxu1 %vm357_vm1, %v3581_v61  ;;  %v7439_v4 = vpop.permute.xlu0 %4210 }
 0xdbf   :  { %v7417_v41 = vpop.permute.xlu1 %4214 }
 0xdc2   :  { %v7425_v63 = vpop.permute.xlu2 %4218 }
 0xdc7   :  { %v7432_v30 = vpop.permute.xlu1 %4234 }
 0xdca   :  { %v7437_v25 = vpop.permute.xlu2 %4238 }
 0xdcf   :  { %v7441_v61 = vpop.permute.xlu1 %4222 }
 0xe0d   :  { %v7387_v59 = vpop.f32.mrf.mxu1 }
 0xe1e   :  { %v3486_v22 = vpop.f32.mrf.mxu0 }
 0xe1f   :  { %5172 = vmatmul.msk.f32.vlgmr.msra.gmra.mxu2 %vm357_vm1, %v3486_v22 }
 0xe22   :  { %v7393_v10 = vpop.f32.mrf.mxu1 }
 0xe23   :  { %v3937_v22 = vperm.slane %v7393_v10, 0  ;;  %5174 = vmatpush.xpose.msk.msrb.mxu2 %vm4328_vm11, %v7393_v10 }
 0xe27   :  { %v3389_v48 = vpop.f32.mrf.mxu2 }
 0xe28   :  { %v3550_v9 = vpop.f32.mrf.mxu3  ;;  %v7419_v6 = vmul.f32 0.17677669, %v3389_v48 }
 0xe29   :  { %v3709_v62 = vperm.slane %v3550_v9, 4  ;;  %v3695_v0 = vperm.slane %v3550_v9, 2  ;;  %v3681_v32 = vperm.slane %v3550_v9, 0  ;;  %v3730_v36 = vperm.slane %v3550_v9, 7 }
 0xe2a   :  { %v3688_v23 = vperm.slane %v3550_v9, 1  ;;  %v3702_v46 = vperm.slane %v3550_v9, 3  ;;  %v3716_v31 = vperm.slane %v3550_v9, 5  ;;  %v3723_v35 = vperm.slane %v3550_v9, 6  ;;  %v7402_v45 = vpop.f32.mrf.mxu1 }
 0xe2b   :  { %3714 = vperm.xlu0 %5284, %v3709_v62   ;;  %3700 = vperm.xlu1 %5283, %v3695_v0   ;;  %v3394_v38 = vsel %vm3393_vm10, %v7419_v6, -inf  ;;  %v3909_v62 = vrot.slane %v7393_v10, 1 }
 0xe2c   :  { %3686 = vperm.xlu2 %5282, %v3681_v32  }
 0xe30   :  { %v7367_v54 = vpop.f32.mrf.mxu3 }
 0xe31   :  { %v3772_v20 = vperm.slane %v7367_v54, 5  ;;  %v3737_v32 = vperm.slane %v7367_v54, 0 }
 0xe32   :  { %v7411_v3 = vpop.f32.mrf.mxu1 }
 0xe33   :  { %3735 = vperm.xlu0 %5284, %v3730_v36   ;;  %3777 = vperm.xlu1 %5283, %v3772_v20   ;;  %v7446_v36 = vpop.permute.xlu0 %4182  ;;  %v7448_v20 = vpop.permute.xlu1 %4242 }
 0xe34   :  { %3693 = vperm.xlu2 %5282, %v3688_v23   ;;  %v3938_v23 = vperm.slane %v3909_v62, 0  ;;  %v3910_v62 = vrot.slane %v7393_v10, 2  ;;  %5178 = vmatpush.xpose.msk.msra.mxu2 %vm4328_vm11, %v7411_v3 }
 0xe38   :  { %v7372_v11 = vpop.f32.mrf.mxu3 }
 0xe39   :  { %v3807_v28 = vperm.slane %v7372_v11, 2  ;;  %v3835_v1 = vperm.slane %v7372_v11, 6 }
 0xe3a   :  { %v7421_v40 = vpop.f32.mrf.mxu1 }
 0xe3b   :  { %3812 = vperm.xlu1 %5283, %v3807_v28   ;;  %3673 = vmatpush.msra.mxu0 %v7421_v40 }
 0xe3c   :  { %3707 = vperm.xlu2 %5282, %v3702_v46  }
 0xe3d   :  { %3674 = vmatpush.msra.mxu0 %v7411_v3 }
 0xe3f   :  { %3675 = vmatpush.msra.mxu0 %v7402_v45 }
 0xe40   :  { %v7376_v5 = vpop.f32.mrf.mxu3 }
 0xe41   :  { %v3849_v60 = vperm.slane %v7376_v5, 0  ;;  %v3863_v44 = vperm.slane %v7376_v5, 2  ;;  %v3877_v7 = vperm.slane %v7376_v5, 4  ;;  %v3870_v39 = vperm.slane %v7376_v5, 3  ;;  %3676 = vmatpush.msra.mxu0 %v7393_v10 }
 0xe42   :  { %v3884_v47 = vperm.slane %v7376_v5, 5  ;;  %5173 = vmatmul.msk.f32.vlgmr.msra.gmra.mxu0 %vm357_vm1, %v7360_v8 }
 0xe43   :  { %3840 = vperm.xlu1 %5283, %v3835_v1   ;;  %3854 = vperm.xlu0 %5284, %v3849_v60  }
 0xe44   :  { %3721 = vperm.xlu2 %5282, %v3716_v31   ;;  %v3744_v31 = vperm.slane %v7367_v54, 1  ;;  %5176 = vmatpush.xpose.msk.msrb.mxu0 %vm4328_vm11, %v7402_v45 }
 0xe48   :  { %5180 = vmatpush.xpose.msk.msra.mxu0 %vm4328_vm11, %v7421_v40 }
 0xe4b   :  { %3868 = vperm.xlu1 %5283, %v3863_v44   ;;  %3882 = vperm.xlu0 %5284, %v3877_v7   ;;  %v3911_v44 = vrot.slane %v7393_v10, 3 }
 0xe4c   :  { %3728 = vperm.xlu2 %5282, %v3723_v35   ;;  %v7454_v35 = vpop.permute.xlu0 %4190 }
 0xe53   :  { %3875 = vperm.xlu1 %5283, %v3870_v39   ;;  %5285 = vset.pattern.permute.xlu0 %v8017_v16  ;;  %v7456_v39 = vpop.permute.xlu1 %4246 }
 0xe5b   :  { %3889 = vperm.xlu1 %5283, %v3884_v47  }
 0xe63   :  { %5288 = vset.pattern.permute.xlu1 %v8017_v16 }
 0xe75   :  { %3395 = vmax.xlane.f32.xlu2 %v3394_v38 }
 0xe86   :  { %v3687_v9 = vpop.permute.xlu2 %3686 }
 0xe87   :  { %v4001_v0 = vadd.f32 %v3937_v22, %v3687_v9  ;;  %v3940_v22 = vperm.slane %v3911_v44, 0 }
 0xe89   :  { %v4033_v8 = vand.u32 2147483647, %v4001_v0  ;;  %v3913_v0 = vrot.slane %v7393_v10, 5 }
 0xe8b   :  { %v4257_v1 = vmul.f32 %v7298_v18, %v4033_v8  ;;  %v3912_v18 = vrot.slane %v7393_v10, 4  ;;  %v3939_v8 = vperm.slane %v3910_v62, 0 }
 0xe8d   :  { %3742 = vperm.xlu2 %5282, %v3737_v32   ;;  %v4291_v47 = vsel %vm3393_vm10, %v4257_v1, 0.0 }
 0xe8e   :  { %v3694_v28 = vpop.permute.xlu2 %3693 }
 0xe8f   :  { %v4002_v46 = vadd.f32 %v3938_v23, %v3694_v28  ;;  %v3941_v23 = vperm.slane %v3912_v18, 0  ;;  %v3942_v28 = vperm.slane %v3913_v0, 0 }
 0xe91   :  { %v4034_v60 = vand.u32 2147483647, %v4002_v46 }
 0xe93   :  { %v4258_v7 = vmul.f32 %v7309_v13, %v4034_v60  ;;  %v3751_v13 = vperm.slane %v7367_v54, 2 }
 0xe95   :  { %v4292_v48 = vsel %vm3393_vm10, %v4258_v7, 0.0  ;;  %3749 = vperm.xlu2 %5282, %v3744_v31  }
 0xe96   :  { %v4293_v38 = vadd.f32 %v4292_v48, %v4291_v47  ;;  %v3708_v9 = vpop.permute.xlu2 %3707 }
 0xe97   :  { %v4004_v32 = vadd.f32 %v3940_v22, %v3708_v9  ;;  %v3758_v22 = vperm.slane %v7367_v54, 3 }
 0xe99   :  { %v4036_v60 = vand.u32 2147483647, %v4004_v32 }
 0xe9b   :  { %v4260_v21 = vmul.f32 %v7323_v42, %v4036_v60 }
 0xe9d   :  { %3756 = vperm.xlu2 %5282, %v3751_v13   ;;  %v3715_v46 = vpop.permute.xlu0 %3714  ;;  %v3701_v1 = vpop.permute.xlu1 %3700  ;;  %v4296_v0 = vsel %vm3393_vm10, %v4260_v21, 0.0  ;;  %v3793_v21 = vperm.slane %v7372_v11, 0 }
 0xe9e   :  { %v4005_v31 = vadd.f32 %v3941_v23, %v3715_v46  ;;  %v4003_v7 = vadd.f32 %v3939_v8, %v3701_v1  ;;  %v3722_v44 = vpop.permute.xlu2 %3721  ;;  %v8018_v8 = vmov 1   ;;  %v3828_v46 = vperm.slane %v7372_v11, 5 }
 0xe9f   :  { %v4006_v47 = vadd.f32 %v3942_v28, %v3722_v44 }
 0xea0   :  { %v4037_v48 = vand.u32 2147483647, %v4005_v31  ;;  %v4035_v34 = vand.u32 2147483647, %v4003_v7  ;;  %v3842_v7 = vperm.slane %v7372_v11, 7 }
 0xea1   :  { %v4038_v19 = vand.u32 2147483647, %v4006_v47  ;;  %v3945_v47 = vperm.slane %v7402_v45, 0 }
 0xea2   :  { %v4259_v43 = vmul.f32 %v7317_v24, %v4035_v34  ;;  %v7466_v58 = vpop.f32.mrf.mxu2  ;;  %v4261_v9 = vmul.f32 %v7326_v52, %v4037_v48  ;;  %v3765_v52 = vperm.slane %v7367_v54, 4 }
 0xea3   :  { %4308 = vperm.xlu0 %5285, %v7466_v58   ;;  %v4262_v13 = vmul.f32 %v7398_v37, %v4038_v19  ;;  %v3786_v19 = vperm.slane %v7367_v54, 7  ;;  %v5387_v37 = vld [vmem:[%s7789_s15 + $0x1f] ss:$0 sm:$0xff] }
 0xea4   :  { %v4294_v18 = vsel %vm3393_vm10, %v4259_v43, 0.0  ;;  %v4298_v34 = vsel %vm3393_vm10, %v4261_v9, 0.0  ;;  %v3779_v43 = vperm.slane %v7367_v54, 6  ;;  %v3814_v54 = vperm.slane %v7372_v11, 3 }
 0xea5   :  { %v4295_v62 = vadd.f32 %v4294_v18, %v4293_v38  ;;  %3763 = vperm.xlu2 %5282, %v3758_v22   ;;  %v4300_v32 = vsel %vm3393_vm10, %v4262_v13, 0.0  ;;  %v3821_v38 = vperm.slane %v7372_v11, 4  ;;  %v3856_v9 = vperm.slane %v7376_v5, 1 }
 0xea6   :  { %v7499_v28 = vpop.permute.xlu2 %3728  ;;  %v3916_v18 = vrot.slane %v7402_v45, 1 }
 0xea7   :  { %v4297_v42 = vadd.f32 %v4296_v0, %v4295_v62 }
 0xea8   :  { %v3946_v0 = vperm.slane %v3916_v18, 0 }
 0xea9   :  { %v4299_v24 = vadd.f32 %v4298_v34, %v4297_v42 }
 0xeab   :  { %v7476_v23 = vadd.f32 %v4300_v32, %v4299_v24  ;;  %5286 = vset.pattern.permute.xlu0 %v8018_v8  ;;  %v3891_v24 = vperm.slane %v7376_v5, 6  ;;  %v3917_v32 = vrot.slane %v7402_v45, 2 }
 0xeac   :  { %4370 = vperm.xlu0 %5286, %v7466_v58  }
 0xead   :  { %3770 = vperm.xlu2 %5282, %v3765_v52  }
 0xeb4   :  { %5289 = vset.pattern.permute.xlu0 %v8017_v16  ;;  %v3800_v16 = vperm.slane %v7372_v11, 1 }
 0xeb5   :  { %3784 = vperm.xlu2 %5282, %v3779_v43   ;;  %4254 = vperm.xlu0 %5289, %v5387_v37  }
 0xebd   :  { %3791 = vperm.xlu2 %5282, %v3786_v19   ;;  %v3947_v19 = vperm.slane %v3917_v32, 0  ;;  %v3921_v32 = vrot.slane %v7402_v45, 6 }
 0xec5   :  { %3798 = vperm.xlu2 %5282, %v3793_v21  }
 0xecd   :  { %3805 = vperm.xlu2 %5282, %v3800_v16  }
 0xed5   :  { %3819 = vperm.xlu2 %5282, %v3814_v54  }
 0xedd   :  { %3826 = vperm.xlu2 %5282, %v3821_v38   ;;  %v3898_v38 = vperm.slane %v7376_v5, 7  ;;  %v3919_v5 = vrot.slane %v7402_v45, 4 }
 0xee5   :  { %3833 = vperm.xlu2 %5282, %v3828_v46  }
 0xee8   :  { %v3396_v1 = vpop.xlane.xlu2 %3395 }
 0xee9   :  { %v3397_v60 = vsub.f32 %v7419_v6, %v3396_v1 }
 0xeeb   :  { %v3398_v31 = vmul.f32 1.442695, %v3397_v60 }
 0xeed   :  { %5456 = vpow2.f32 %v3398_v31  ;;  %3847 = vperm.xlu2 %5282, %v3842_v7   ;;  %v3920_v7 = vrot.slane %v7402_v45, 5 }
 0xef0   :  { %v3743_v44 = vpop.permute.xlu2 %3742 }
 0xef1   :  { %v4009_v22 = vadd.f32 %v3945_v47, %v3743_v44  ;;  %v5388_v47 = vld [vmem:[%s7789_s15 + $0x1e] ss:$0 sm:$0xff]  ;;  %s5650_s15 = smov 32  }
 0xef3   :  { %v7505_v48 = vpop.eup %5456  ;;  %v4041_v6 = vand.u32 2147483647, %v4009_v22 }
 0xef4   :  { %v3400_v62 = vsel %vm3393_vm10, %v7505_v48, 0.0 }
 0xef5   :  { %3861 = vperm.xlu2 %5282, %v3856_v9   ;;  %3401 = vadd.xlane.f32.xlu1 %v3400_v62  ;;  %v4265_v42 = vmul.f32 %v7365_v57, %v4041_v6  ;;  %v3918_v57 = vrot.slane %v7402_v45, 3  ;;  %v3950_v9 = vperm.slane %v3920_v7, 0  ;;  %v3778_v62 = vpop.permute.xlu1 %3777 }
 0xef7   :  { %v4354_v52 = vsel %vm3393_vm10, %v4265_v42, 0.0  ;;  %v4014_v42 = vadd.f32 %v3950_v9, %v3778_v62  ;;  %v3736_v62 = vpop.permute.xlu0 %3735 }
 0xef8   :  { %v3750_v11 = vpop.permute.xlu2 %3749 }
 0xef9   :  { %v4010_v13 = vadd.f32 %v3946_v0, %v3750_v11  ;;  %v3949_v0 = vperm.slane %v3919_v5, 0 }
 0xefb   :  { %v4042_v34 = vand.u32 2147483647, %v4010_v13 }
 0xefd   :  { %v4266_v8 = vmul.f32 %v7370_v12, %v4042_v34  ;;  %3896 = vperm.xlu2 %5282, %v3891_v24   ;;  %v3948_v12 = vperm.slane %v3918_v57, 0  ;;  %v3922_v57 = vrot.slane %v7402_v45, 7  ;;  %v3813_v9 = vpop.permute.xlu1 %3812 }
 0xeff   :  { %v4355_v43 = vsel %vm3393_vm10, %v4266_v8, 0.0  ;;  %v4046_v8 = vand.u32 2147483647, %v4014_v42 }
 0xf00   :  { %v4356_v21 = vadd.f32 %v4355_v43, %v4354_v52  ;;  %v3757_v16 = vpop.permute.xlu2 %3756 }
 0xf01   :  { %v4011_v54 = vadd.f32 %v3947_v19, %v3757_v16  ;;  %v3951_v19 = vperm.slane %v3921_v32, 0 }
 0xf03   :  { %v4043_v37 = vand.u32 2147483647, %v4011_v54  ;;  %v4270_v54 = vmul.f32 %v7446_v36, %v4046_v8  ;;  %v3925_v8 = vrot.slane %v7411_v3, 3 }
 0xf05   :  { %v4267_v46 = vmul.f32 %v7406_v15, %v4043_v37  ;;  %3903 = vperm.xlu2 %5282, %v3898_v38   ;;  %v8019_v15 = vmov 2  }
 0xf07   :  { %v4357_v1 = vsel %vm3393_vm10, %v4267_v46, 0.0  ;;  %v4363_v46 = vsel %vm3393_vm10, %v4270_v54, 0.0  ;;  %v3956_v54 = vperm.slane %v3925_v8, 0 }
 0xf08   :  { %v4358_v60 = vadd.f32 %v4357_v1, %v4356_v21  ;;  %v3764_v31 = vpop.permute.xlu2 %3763 }
 0xf09   :  { %v4012_v44 = vadd.f32 %v3948_v12, %v3764_v31 }
 0xf0b   :  { %v4044_v22 = vand.u32 2147483647, %v4012_v44 }
 0xf0d   :  { %v4268_v18 = vmul.f32 %v7389_v29, %v4044_v22  ;;  %5287 = vset.pattern.permute.xlu2 %v8019_v15  ;;  %v8020_v29 = vmov 3  }
 0xf0e   :  { %4431 = vperm.xlu2 %5287, %v7466_v58   ;;  %4250 = vperm.xlu1 %5288, %v5388_v47  }
 0xf0f   :  { %v4359_v6 = vsel %vm3393_vm10, %v4268_v18, 0.0 }
 0xf10   :  { %v4360_v11 = vadd.f32 %v4359_v6, %v4358_v60  ;;  %v3771_v13 = vpop.permute.xlu2 %3770  ;;  %v3952_v60 = vperm.slane %v3922_v57, 0 }
 0xf11   :  { %v4013_v34 = vadd.f32 %v3949_v0, %v3771_v13  ;;  %v3923_v0 = vrot.slane %v7411_v3, 1  ;;  %v3924_v13 = vrot.slane %v7411_v3, 2 }
 0xf13   :  { %v4045_v24 = vand.u32 2147483647, %v4013_v34  ;;  %v3954_v42 = vperm.slane %v3923_v0, 0  ;;  %v3914_v34 = vrot.slane %v7393_v10, 6 }
 0xf15   :  { %v4269_v52 = vmul.f32 %v7395_v51, %v4045_v24  ;;  %v3953_v24 = vperm.slane %v7411_v3, 0 }
 0xf16   :  { %5290 = vset.pattern.permute.xlu2 %v8020_v29  ;;  %v3955_v29 = vperm.slane %v3924_v13, 0 }
 0xf17   :  { %v4361_v43 = vsel %vm3393_vm10, %v4269_v52, 0.0  ;;  %4492 = vperm.xlu2 %5290, %v7466_v58  }
 0xf18   :  { %v4362_v21 = vadd.f32 %v4361_v43, %v4360_v11  ;;  %v3785_v16 = vpop.permute.xlu2 %3784  ;;  %v4019_v57 = vadd.f32 %v3955_v29, %v3813_v9 }
 0xf19   :  { %v4015_v37 = vadd.f32 %v3951_v19, %v3785_v16  ;;  %v3926_v19 = vrot.slane %v7411_v3, 4 }
 0xf1a   :  { %v4364_v51 = vadd.f32 %v4363_v46, %v4362_v21  ;;  %v3943_v21 = vperm.slane %v3914_v34, 0 }
 0xf1b   :  { %v4047_v38 = vand.u32 2147483647, %v4015_v37  ;;  %v3927_v37 = vrot.slane %v7411_v3, 5 }
 0xf1d   :  { %v4271_v1 = vmul.f32 %v7413_v56, %v4047_v38  ;;  %v3841_v56 = vpop.permute.xlu1 %3840  ;;  %v3915_v38 = vrot.slane %v7393_v10, 7 }
 0xf1f   :  { %v4365_v12 = vsel %vm3393_vm10, %v4271_v1, 0.0 }
 0xf20   :  { %v4366_v31 = vadd.f32 %v4365_v12, %v4364_v51  ;;  %v3792_v7 = vpop.permute.xlu2 %3791  ;;  %v3957_v12 = vperm.slane %v3926_v19, 0 }
 0xf21   :  { %v4016_v58 = vadd.f32 %v3952_v60, %v3792_v7  ;;  %v3928_v60 = vrot.slane %v7411_v3, 6 }
 0xf23   :  { %v4048_v44 = vand.u32 2147483647, %v4016_v58 }
 0xf25   :  { %v4272_v47 = vmul.f32 %v7454_v35, %v4048_v44  ;;  %v7545_v11 = vpop.permute.xlu1 %3868  ;;  %v7548_v35 = vpop.permute.xlu0 %3854  ;;  %v3958_v44 = vperm.slane %v3927_v37, 0 }
 0xf27   :  { %v4367_v36 = vsel %vm3393_vm10, %v4272_v47, 0.0 }
 0xf28   :  { %v7542_v22 = vadd.f32 %v4367_v36, %v4366_v31  ;;  %v3799_v5 = vpop.permute.xlu2 %3798  ;;  %v4007_v31 = vadd.f32 %v3943_v21, %v7499_v28  ;;  %v3944_v36 = vperm.slane %v3915_v38, 0 }
 0xf29   :  { %v4017_v43 = vadd.f32 %v3953_v24, %v3799_v5  ;;  %v4051_v5 = vand.u32 2147483647, %v4019_v57 }
 0xf2a   :  { %v4039_v13 = vand.u32 2147483647, %v4007_v31  ;;  %v4008_v24 = vadd.f32 %v3944_v36, %v3736_v62 }
 0xf2b   :  { %v4049_v1 = vand.u32 2147483647, %v4017_v43 }
 0xf2d   :  { %v7556_v46 = vpop.permute.xlu1 %3875  ;;  %v4273_v10 = vmul.f32 %v7379_v14, %v4049_v1 }
 0xf30   :  { %v3806_v45 = vpop.permute.xlu2 %3805 }
 0xf31   :  { %v4018_v32 = vadd.f32 %v3954_v42, %v3806_v45  ;;  %v7561_v45 = vpop.permute.xlu0 %3882  ;;  %v3959_v42 = vperm.slane %v3928_v60, 0 }
 0xf33   :  { %v4050_v16 = vand.u32 2147483647, %v4018_v32  ;;  %v4415_v32 = vsel %vm3393_vm10, %v4273_v10, 0.0  ;;  %v4023_v19 = vadd.f32 %v3959_v42, %v3841_v56 }
 0xf35   :  { %v4274_v7 = vmul.f32 %v7381_v27, %v4050_v16  ;;  %v4275_v27 = vmul.f32 %v7385_v55, %v4051_v5  ;;  %v7572_v21 = vpop.permute.xlu1 %3889 }
 0xf37   :  { %v4416_v34 = vsel %vm3393_vm10, %v4274_v7, 0.0  ;;  %v4418_v57 = vsel %vm3393_vm10, %v4275_v27, 0.0 }
 0xf38   :  { %v3820_v18 = vpop.permute.xlu2 %3819  ;;  %v4417_v43 = vadd.f32 %v4416_v34, %v4415_v32 }
 0xf39   :  { %v4020_v51 = vadd.f32 %v3956_v54, %v3820_v18  ;;  %v3929_v18 = vrot.slane %v7411_v3, 7  ;;  %v4263_v3 = vmul.f32 %v7415_v33, %v4039_v13  ;;  %v3961_v54 = vperm.slane %v7421_v40, 0  ;;  %v4309_v37 = vpop.permute.xlu0 %4308 }
 0xf3a   :  { %v4419_v56 = vadd.f32 %v4418_v57, %v4417_v43 }
 0xf3b   :  { %v4052_v9 = vand.u32 2147483647, %v4020_v51  ;;  %v3960_v14 = vperm.slane %v3929_v18, 0  ;;  %v4302_v60 = vsel %vm3393_vm10, %v4263_v3, 0.0  ;;  %v4025_v7 = vadd.f32 %v3961_v54, %v7548_v35 }
 0xf3d   :  { %v4276_v8 = vmul.f32 %v7430_v2, %v4052_v9  ;;  %v4040_v2 = vand.u32 2147483647, %v4008_v24 }
 0xf3f   :  { %v4420_v1 = vsel %vm3393_vm10, %v4276_v8, 0.0  ;;  %v4264_v5 = vmul.f32 %v7400_v50, %v4040_v2  ;;  %v4057_v50 = vand.u32 2147483647, %v4025_v7 }
 0xf40   :  { %v3827_v15 = vpop.permute.xlu2 %3826  ;;  %v4421_v36 = vadd.f32 %v4420_v1, %v4419_v56 }
 0xf41   :  { %v4021_v58 = vadd.f32 %v3957_v12, %v3827_v15  ;;  %v3930_v15 = vrot.slane %v7421_v40, 1  ;;  %v4281_v3 = vmul.f32 %v7404_v17, %v4057_v50 }
 0xf43   :  { %v4053_v28 = vand.u32 2147483647, %v4021_v58  ;;  %v3962_v38 = vperm.slane %v3930_v15, 0  ;;  %v3932_v58 = vrot.slane %v7421_v40, 3  ;;  %v4304_v15 = vsel %vm3393_vm10, %v4264_v5, 0.0 }
 0xf45   :  { %v4277_v62 = vmul.f32 %v7439_v4, %v4053_v28  ;;  %v4055_v4 = vand.u32 2147483647, %v4023_v19  ;;  %v3964_v24 = vperm.slane %v3932_v58, 0  ;;  %v3936_v58 = vrot.slane %v7421_v40, 7 }
 0xf47   :  { %v4279_v18 = vmul.f32 %v7425_v63, %v4055_v4  ;;  %v3934_v63 = vrot.slane %v7421_v40, 5  ;;  %v4028_v19 = vadd.f32 %v3964_v24, %v7556_v46  ;;  %v4476_v46 = vsel %vm3393_vm10, %v4281_v3, 0.0 }
 0xf48   :  { %v3834_v6 = vpop.permute.xlu2 %3833 }
 0xf49   :  { %v4022_v0 = vadd.f32 %v3958_v44, %v3834_v6  ;;  %v3931_v6 = vrot.slane %v7421_v40, 2  ;;  %v7585_v44 = vpop.f32.mrf.mxu0  ;;  %v3966_v57 = vperm.slane %v3934_v63, 0 }
 0xf4a   :  { %v4311_v35 = vperm.slane %v7585_v44, 0  ;;  %v4373_v32 = vperm.slane %v7585_v44, 1 }
 0xf4b   :  { %v4054_v29 = vand.u32 2147483647, %v4022_v0  ;;  %v3963_v33 = vperm.slane %v3931_v6, 0 }
 0xf4c   :  { %v4312_v6 = vadd.f32 %v4311_v35, %v4309_v37 }
 0xf4d   :  { %v4278_v51 = vmul.f32 %v7417_v41, %v4054_v29  ;;  %v3933_v41 = vrot.slane %v7421_v40, 4  ;;  %v4027_v13 = vadd.f32 %v3963_v33, %v7545_v11  ;;  %v4371_v11 = vpop.permute.xlu0 %4370  ;;  %v4376_v33 = vmul.f32 0.4, %v7542_v22 }
 0xf4e   :  { %v4313_v37 = vmul.f32 0.6, %v4312_v6 }
 0xf4f   :  { %v4424_v10 = vsel %vm3393_vm10, %v4278_v51, 0.0 }
 0xf50   :  { %v3848_v52 = vpop.permute.xlu2 %3847 }
 0xf51   :  { %v4024_v16 = vadd.f32 %v3960_v14, %v3848_v52  ;;  %v4422_v52 = vsel %vm3393_vm10, %v4277_v62, 0.0  ;;  %v4059_v14 = vand.u32 2147483647, %v4027_v13 }
 0xf52   :  { %v4423_v9 = vadd.f32 %v4422_v52, %v4421_v36 }
 0xf53   :  { %v4056_v31 = vand.u32 2147483647, %v4024_v16  ;;  %v4434_v16 = vperm.slane %v7585_v44, 2  ;;  %v4283_v51 = vmul.f32 %v7432_v30, %v4059_v14  ;;  %v4495_v14 = vperm.slane %v7585_v44, 3 }
 0xf54   :  { %v4425_v27 = vadd.f32 %v4424_v10, %v4423_v9  ;;  %v4030_v10 = vadd.f32 %v3966_v57, %v7572_v21 }
 0xf55   :  { %v4280_v42 = vmul.f32 %v7441_v61, %v4056_v31  ;;  %v4426_v61 = vsel %vm3393_vm10, %v4279_v18, 0.0  ;;  %v4479_v22 = vsel %vm3393_vm10, %v4283_v51, 0.0 }
 0xf56   :  { %v4427_v62 = vadd.f32 %v4426_v61, %v4425_v27  ;;  %v4062_v24 = vand.u32 2147483647, %v4030_v10 }
 0xf57   :  { %v4428_v43 = vsel %vm3393_vm10, %v4280_v42, 0.0 }
 0xf58   :  { %v3862_v47 = vpop.permute.xlu2 %3861  ;;  %v4429_v1 = vadd.f32 %v4428_v43, %v4427_v62 }
 0xf59   :  { %v4026_v12 = vadd.f32 %v3962_v38, %v3862_v47  ;;  %v4303_v47 = vadd.f32 %v4302_v60, %v7476_v23  ;;  %v3965_v23 = vperm.slane %v3933_v41, 0  ;;  %v4374_v38 = vadd.f32 %v4373_v32, %v4371_v11 }
 0xf5a   :  { %v4437_v30 = vmul.f32 0.4, %v4429_v1 }
 0xf5b   :  { %v4058_v0 = vand.u32 2147483647, %v4026_v12  ;;  %v4305_v8 = vadd.f32 %v4304_v15, %v4303_v47  ;;  %v4029_v54 = vadd.f32 %v3965_v23, %v7561_v45  ;;  %v4060_v12 = vand.u32 2147483647, %v4028_v19 }
 0xf5c   :  { %v4375_v52 = vmul.f32 0.6, %v4374_v38  ;;  %v3935_v47 = vrot.slane %v7421_v40, 6 }
 0xf5d   :  { %v4282_v29 = vmul.f32 %v7408_v26, %v4058_v0  ;;  %v4314_v60 = vmul.f32 0.4, %v4305_v8  ;;  %v4061_v45 = vand.u32 2147483647, %v4029_v54  ;;  %v4284_v41 = vmul.f32 %v7437_v25, %v4060_v12 }
 0xf5e   :  { %v3968_v25 = vperm.slane %v3936_v58, 0  ;;  %v3967_v27 = vperm.slane %v3935_v47, 0  ;;  %v4286_v8 = vmul.f32 %v7456_v39, %v4062_v24 }
 0xf5f   :  { %v4477_v26 = vsel %vm3393_vm10, %v4282_v29, 0.0  ;;  %v4315_v5 = vadd.f32 %v4314_v60, %v4313_v37  ;;  %v4285_v42 = vmul.f32 %v7448_v20, %v4061_v45  ;;  %v4481_v50 = vsel %vm3393_vm10, %v4284_v41, 0.0  ;;  %v4255_v20 = vpop.permute.xlu0 %4254 }
 0xf60   :  { %v7575_v55 = vpop.permute.xlu2 %3896  ;;  %v4478_v31 = vadd.f32 %v4477_v26, %v4476_v46  ;;  %v4485_v43 = vsel %vm3393_vm10, %v4286_v8, 0.0 }
 0xf61   :  { %v4031_v32 = vadd.f32 %v3967_v27, %v7575_v55  ;;  %v4483_v63 = vsel %vm3393_vm10, %v4285_v42, 0.0 }
 0xf62   :  { %v4480_v0 = vadd.f32 %v4479_v22, %v4478_v31 }
 0xf63   :  { %v4063_v61 = vand.u32 2147483647, %v4031_v32 }
 0xf64   :  { %v4482_v23 = vadd.f32 %v4481_v50, %v4480_v0  ;;  %v8023_v50 = vld [vmem:[#allocation27_spill] sm:$0xff] }
 0xf65   :  { %v2039_v24 = vsel %vm357_vm1, %v8023_v50, -inf }
 0xf66   :  { %v4484_v29 = vadd.f32 %v4483_v63, %v4482_v23  ;;  %v2040_v27 = vrot.slane %v2039_v24, 4 }
 0xf68   :  { %v3402_v34 = vpop.xlane.xlu1 %3401  ;;  %v7595_v28 = vpop.permute.xlu2 %3903  ;;  %v4486_v62 = vadd.f32 %v4485_v43, %v4484_v29 }
 0xf69   :  { %5458 = vrcp.f32 %v3402_v34  ;;  %v4032_v15 = vadd.f32 %v3968_v25, %v7595_v28 }
 0xf6b   :  { %v4064_v11 = vand.u32 2147483647, %v4032_v15  ;;  %v2041_v15 = vmax.f32 %v2039_v24, %v2040_v27 }
 0xf6d   :  { %v4288_v3 = vmul.f32 %v4255_v20, %v4064_v11  ;;  %v2042_v23 = vrot.slane %v2041_v15, 2 }
 0xf6f   :  { %v5459_v2 = vpop.eup %5458  ;;  %v4489_v38 = vsel %vm3393_vm10, %v4288_v3, 0.0  ;;  %v2043_v32 = vmax.f32 %v2041_v15, %v2042_v23  ;;  %v5389_v3 = vld [vmem:[%s7790_s16] ss:$0 sm:$0xff] }
 0xf70   :  { %v3404_v17 = vmul.f32 %v5459_v2, %v7505_v48  ;;  %v4432_v56 = vpop.permute.xlu2 %4431  ;;  %v4377_v48 = vadd.f32 %v4376_v33, %v4375_v52 }
 0xf71   :  { %v4435_v4 = vadd.f32 %v4434_v16, %v4432_v56  ;;  %v2044_v8 = vrot.slane %v2043_v32, 1 }
 0xf72   :  { %v7613_v7 = vadd.f32 %v3404_v17, %v7387_v59 }
 0xf73   :  { %v4436_v36 = vmul.f32 0.6, %v4435_v4  ;;  %v2045_v20 = vmax.f32 %v2043_v32, %v2044_v8 }
 0xf74   :  { %vm4289_vm13 = vcmp.gt.f32.partialorder %v7613_v7, 0.0 }
 0xf75   :  { %v4438_v9 = vadd.f32 %v4437_v30, %v4436_v36  ;;  %vm7624_vm14 = vmor %vm4289_vm13, %vm1313_vm4  ;;  %vm4567_vm4 = vcmask 1043456  }
 0xf76   :  { %v4316_v18 = vsel %vm7624_vm14, %v4315_v5, -1e+30  ;;  %v4378_v13 = vsel %vm7624_vm14, %v4377_v48, -1e+30 }
 0xf77   :  { %v4317_v21 = vsel %vm3393_vm10, %v4316_v18, -inf  ;;  %v4379_v40 = vsel %vm3393_vm10, %v4378_v13, -inf  ;;  %v4439_v35 = vsel %vm7624_vm14, %v4438_v9, -1e+30 }
 0xf78   :  { %4318 = vmax.xlane.f32.xlu1 %v4317_v21  ;;  %4380 = vmax.xlane.f32.xlu2 %v4379_v40  ;;  %v4440_v34 = vsel %vm3393_vm10, %v4439_v35, -inf  ;;  %v4493_v19 = vpop.permute.xlu2 %4492 }
 0xf79   :  { %4441 = vmax.xlane.f32.xlu0 %v4440_v34  ;;  %v4496_v55 = vadd.f32 %v4495_v14, %v4493_v19  ;;  %v4557_v14 = vsel %vm3393_vm10, %v7613_v7, 0.0 }
 0xf7b   :  { %v4497_v2 = vmul.f32 0.6, %v4496_v55 }
 0xf80   :  { %v4251_v6 = vpop.permute.xlu1 %4250 }
 0xf81   :  { %v4287_v28 = vmul.f32 %v4251_v6, %v4063_v61 }
 0xf83   :  { %v4487_v16 = vsel %vm3393_vm10, %v4287_v28, 0.0 }
 0xf84   :  { %v4488_v54 = vadd.f32 %v4487_v16, %v4486_v62 }
 0xf86   :  { %v4490_v39 = vadd.f32 %v4489_v38, %v4488_v54  ;;  %v4735_v38 = vld [vmem:[%s7791_s17 + $0x38] sm:$0xff] }
 0xf88   :  { %v4498_v57 = vmul.f32 0.4, %v4490_v39  ;;  %v4739_v39 = vld [vmem:[#allocation7 + $0x18] sm:$0xff] }
 0xf89   :  { %4843 = vmatpush.msra.mxu3 %v4739_v39 }
 0xf8a   :  { %v4499_v26 = vadd.f32 %v4498_v57, %v4497_v2  ;;  %v4734_v2 = vld [vmem:[%s7791_s17 + $0x30] sm:$0xff] }
 0xf8b   :  { %v4738_v57 = vld [vmem:[#allocation7 + $0x10] sm:$0xff] }
 0xf8c   :  { %v4500_v44 = vsel %vm7624_vm14, %v4499_v26, -1e+30  ;;  %v4733_v26 = vld [vmem:[%s7791_s17 + $0x28] sm:$0xff]  ;;  %4844 = vmatpush.msra.mxu3 %v4738_v57 }
 0xf8d   :  { %v4501_v1 = vsel %vm3393_vm10, %v4500_v44, -inf }
 0xf8e   :  { %4502 = vmax.xlane.f32.xlu1 %v4501_v1  ;;  %v4736_v1 = vld [vmem:[#allocation7] sm:$0xff] }
 0xfeb   :  { %v4319_v51 = vpop.xlane.xlu1 %4318  ;;  %v4381_v37 = vpop.xlane.xlu2 %4380 }
 0xfec   :  { %v4320_v33 = vsub.f32 %v4316_v18, %v4319_v51  ;;  %v4382_v17 = vsub.f32 %v4378_v13, %v4381_v37  ;;  %v4442_v56 = vpop.xlane.xlu0 %4441  ;;  %v4731_v51 = vld [vmem:[%s7791_s17 + $0x18] sm:$0xff] }
 0xfed   :  { %v4443_v60 = vsub.f32 %v4439_v35, %v4442_v56 }
 0xfee   :  { %v4321_v46 = vmul.f32 1.442695, %v4320_v33  ;;  %v4383_v12 = vmul.f32 1.442695, %v4382_v17  ;;  %v8024_v33 = vmov 0.0   ;;  %v4730_v17 = vld [vmem:[%s7791_s17 + $0x10] sm:$0xff] }
 0xfef   :  { %v4444_v4 = vmul.f32 1.442695, %v4443_v60  ;;  %v2031_v60 = vsel %vm357_vm1, %v8023_v50, 0.0 }
 0xff0   :  { %5460 = vpow2.f32 %v4321_v46  ;;  %v4729_v46 = vld [vmem:[%s7791_s17 + $0x8] sm:$0xff] }
 0xff1   :  { %5462 = vpow2.f32 %v4383_v12  ;;  %v4728_v12 = vld [vmem:[%s7791_s17] sm:$0xff] }
 0xff2   :  { %5464 = vpow2.f32 %v4444_v4  ;;  %v2032_v4 = vrot.slane %v2031_v60, 4 }
 0xff6   :  { %v5461_v45 = vpop.eup %5460 }
 0xff7   :  { %v5463_v52 = vpop.eup %5462  ;;  %v4323_v31 = vsel %vm3393_vm10, %v5461_v45, 0.0 }
 0xff8   :  { %4324 = vadd.xlane.f32.xlu2 %v4323_v31  ;;  %v4385_v58 = vsel %vm3393_vm10, %v5463_v52, 0.0  ;;  %v5465_v30 = vpop.eup %5464 }
 0xff9   :  { %4386 = vadd.xlane.f32.xlu1 %v4385_v58  ;;  %v4446_v36 = vsel %vm3393_vm10, %v5465_v30, 0.0 }
0x1000   :  { %4447 = vadd.xlane.f32.xlu2 %v4446_v36 }
0x1001   :  { %v4503_v22 = vpop.xlane.xlu1 %4502 }
0x1002   :  { %v4504_v5 = vsub.f32 %v4500_v44, %v4503_v22  ;;  %v4732_v44 = vld [vmem:[%s7791_s17 + $0x20] sm:$0xff] }
0x1004   :  { %v4505_v48 = vmul.f32 1.442695, %v4504_v5 }
0x1006   :  { %5466 = vpow2.f32 %v4505_v48 }
0x100c   :  { %v5467_v41 = vpop.eup %5466 }
0x100d   :  { %v4507_v10 = vsel %vm3393_vm10, %v5467_v41, 0.0 }
0x100e   :  { %4508 = vadd.xlane.f32.xlu0 %v4507_v10 }
0x106b   :  { %v4325_v47 = vpop.xlane.xlu2 %4324 }
0x106c   :  { %v4387_v9 = vpop.xlane.xlu1 %4386  ;;  %5468 = vrcp.f32 %v4325_v47 }
0x106d   :  { %5470 = vrcp.f32 %v4387_v9 }
0x1072   :  { %v5469_v59 = vpop.eup %5468 }
0x1073   :  { %v5471_v0 = vpop.eup %5470  ;;  %v4327_v18 = vmul.f32 %v5469_v59, %v5461_v45  ;;  %v4448_v13 = vpop.xlane.xlu2 %4447 }
0x1074   :  { %v4389_v25 = vmul.f32 %v5471_v0, %v5463_v52  ;;  %5472 = vrcp.f32 %v4448_v13  ;;  %v2033_v52 = vadd.f32 %v2032_v4, %v2031_v60 }
0x1075   :  { %5175 = vmatmul.msk.f32.vlgmr.msrb.gmra.mxu2 %vm4328_vm11, %v4327_v18 }
0x1076   :  { %5177 = vmatmul.msk.f32.vlgmr.msrb.gmra.mxu0 %vm4328_vm11, %v4389_v25  ;;  %v2034_v22 = vrot.slane %v2033_v52, 2  ;;  %v7710_v25 = vld [vmem:[%s7793_s19] sm:$0x1] }
0x1078   :  { %v2035_v48 = vadd.f32 %v2034_v22, %v2033_v52 }
0x107a   :  { %v5473_v21 = vpop.eup %5472  ;;  %v2036_v10 = vrot.slane %v2035_v48, 1 }
0x107b   :  { %v4450_v40 = vmul.f32 %v5473_v21, %v5465_v30 }
0x107c   :  { %v2037_v47 = vadd.f32 %v2036_v10, %v2035_v48 }
0x107d   :  { %5179 = vmatmul.msk.f32.vlgmr.msra.gmra.mxu2 %vm4328_vm11, %v4450_v40 }
0x107e   :  { %v2038_v59 = vmul.f32 0.125, %v2037_v47 }
0x1081   :  { %v4509_v35 = vpop.xlane.xlu0 %4508 }
0x1082   :  { %5474 = vrcp.f32 %v4509_v35 }
0x1088   :  { %v5475_v42 = vpop.eup %5474 }
0x1089   :  { %v4511_v34 = vmul.f32 %v5475_v42, %v5467_v41  ;;  %v8025_v41 = vmov 1.0  }
0x108b   :  { %5181 = vmatmul.msk.f32.vlgmr.msra.gmra.mxu0 %vm4328_vm11, %v4511_v34 }
0x10f3   :  { %v4412_v63 = vpop.f32.mrf.mxu0 }
0x10f4   :  { %4538 = vrot.lane.b32.xlu1 %v4412_v63, %s5638_s30 }
0x10f8   :  { %v4351_v11 = vpop.f32.mrf.mxu2 }
0x10fc   :  { %2047 = vrot.lane.b32.xlu1 %v2045_v20, %s5650_s15 }
0x1100   :  { %v4473_v29 = vpop.f32.mrf.mxu2 }
0x1101   :  { %4542 = vrot.lane.b32.xlu2 %v4473_v29, %s5646_s26 }
0x1108   :  { %v4534_v61 = vpop.f32.mrf.mxu0 }
0x1109   :  { %4546 = vrot.lane.b32.xlu0 %v4534_v61, %s5647_s27 }
0x1133   :  { %4558 = vadd.xlane.f32.xlu0 %v4557_v14 }
0x115b   :  { %v4543_v19 = vpop.permute.xlu2 %4542 }
0x1166   :  { %v4539_v6 = vpop.permute.xlu1 %4538 }
0x1167   :  { %v4549_v43 = vsel %vm181_vm0, %v4351_v11, %v4539_v6  ;;  %v8026_v11 = vld [vmem:[#allocation33_spill] sm:$0xff] }
0x1168   :  { %v4550_v62 = vsel %vm1317_vm2, %v4549_v43, %v4543_v19  ;;  %vm4764_vm2 = vcmask 523264   ;;  %v3415_v20 = vsel %vm3406_vm8, %v8026_v11, -inf }
0x1169   :  { %v3416_v14 = vrot.slane %v3415_v20, 4 }
0x116e   :  { %v2048_v9 = vpop.permute.xlu1 %2047 }
0x116f   :  { %v2050_v0 = vsel %vm357_vm1, %v2038_v59, %v2048_v9 }
0x117b   :  { %v4547_v28 = vpop.permute.xlu0 %4546 }
0x117c   :  { %v4551_v16 = vsel %vm1756_vm9, %v4550_v62, %v4547_v28  ;;  %v3417_v28 = vmax.f32 %v3415_v20, %v3416_v14 }
0x117d   :  { %v4555_v55 = vadd.f32 %v5389_v3, %v4551_v16 }
0x117e   :  { %v3418_v62 = vrot.slane %v3417_v28, 2 }
0x117f   :  { %v4556_v54 = vmax.f32 %v4555_v55, 0.0 }
0x1180   :  { %v3419_v16 = vmax.f32 %v3417_v28, %v3418_v62 }
0x1181   :  { %5182 = vmatpush.msk.msrb.mxu2 %vm4567_vm4, %v4556_v54  ;;  %5189 = vmatpush.msk.msra.mxu1 %vm4567_vm4, %v4556_v54 }
0x1182   :  { %5183 = vmatmul.msk.f32.vlgmr.msrb.gmra.mxu2 %vm4328_vm11, %v7613_v7  ;;  %v4737_v7 = vld [vmem:[#allocation7 + $0x8] sm:$0xff] }
0x1183   :  { %4862 = vmatpush.msrb.mxu1 %v4735_v38  ;;  %4756 = vmatpush.msra.mxu2 %v4739_v39 }
0x1184   :  { %4845 = vmatpush.msra.mxu3 %v4737_v7 }
0x1185   :  { %4863 = vmatpush.msrb.mxu1 %v4734_v2  ;;  %4757 = vmatpush.msra.mxu2 %v4738_v57 }
0x1186   :  { %4846 = vmatpush.msra.mxu3 %v4736_v1 }
0x1187   :  { %4864 = vmatpush.msrb.mxu1 %v4733_v26  ;;  %4758 = vmatpush.msra.mxu2 %v4737_v7 }
0x1189   :  { %4865 = vmatpush.msrb.mxu1 %v4732_v44  ;;  %4759 = vmatpush.msra.mxu2 %v4736_v1 }
0x118a   :  { %4760 = vmatmul.f32.vlgmr.msra.gmra.mxu2 %v8024_v33 }
0x118b   :  { %4866 = vmatpush.msrb.mxu1 %v4731_v51  ;;  %4929 = vmatpush.msrb.mxu2 %v4739_v39 }
0x118d   :  { %4867 = vmatpush.msrb.mxu1 %v4730_v17  ;;  %4930 = vmatpush.msrb.mxu2 %v4738_v57 }
0x118f   :  { %4868 = vmatpush.msrb.mxu1 %v4729_v46  ;;  %4931 = vmatpush.msrb.mxu2 %v4737_v7 }
0x1191   :  { %4869 = vmatpush.msrb.mxu1 %v4728_v12  ;;  %4932 = vmatpush.msrb.mxu2 %v4736_v1  ;;  %v8027_v1 = vld [vmem:[#allocation19_spill] sm:$0xff] }
0x11a6   :  { %v4559_v37 = vpop.xlane.xlu0 %4558 }
0x11a7   :  { %v4561_v56 = vmax.f32 %v4559_v37, 1.0  ;;  %vm4560_vm0 = vcmp.gt.f32.partialorder %v4559_v37, 0.0 }
0x11a9   :  { %5476 = vrcp.f32 %v4561_v56 }
0x11af   :  { %v5477_v45 = vpop.eup %5476 }
0x11b0   :  { %v4563_v31 = vsel %vm4560_vm0, %v5477_v45, 0.0 }
0x1205   :  { %v4588_v58 = vpop.f32.mrf.mxu2 }
0x1206   :  { %v4591_v30 = vmul.f32 %v4588_v58, %v4563_v31 }
0x1208   :  { %v4592_v36 = vsub.f32 %v4556_v54, %v4591_v30  ;;  %v3420_v54 = vrot.slane %v3419_v16, 1 }
0x120a   :  { %v4593_v5 = vand.u32 2147483647, %v4592_v36 }
0x120c   :  { %5184 = vmatpush.xpose.msk.msrb.mxu0 %vm357_vm1, %v4593_v5  ;;  %5186 = vmatmul.msk.f32.vlgmr.msrb.gmra.mxu3 %vm357_vm1, %v4593_v5 }
0x120d   :  { %4948 = vmatpush.msrb.mxu3 %v4735_v38  ;;  %v4761_v13 = vpop.f32.mrf.mxu2 }
0x120f   :  { %4949 = vmatpush.msrb.mxu3 %v4734_v2  ;;  %5185 = vmatmul.msk.f32.vlgmr.msrb.gmra.mxu0 %vm357_vm1, %v8025_v41 }
0x1210   :  { %4776 = vmatpush.msra.mxu0 %v4735_v38  ;;  %v3421_v38 = vmax.f32 %v3419_v16, %v3420_v54 }
0x1211   :  { %4950 = vmatpush.msrb.mxu3 %v4733_v26 }
0x1212   :  { %4777 = vmatpush.msra.mxu0 %v4734_v2 }
0x1213   :  { %4951 = vmatpush.msrb.mxu3 %v4732_v44 }
0x1214   :  { %4778 = vmatpush.msra.mxu0 %v4733_v26 }
0x1215   :  { %4952 = vmatpush.msrb.mxu3 %v4731_v51 }
0x1216   :  { %4779 = vmatpush.msra.mxu0 %v4732_v44 }
0x1217   :  { %4953 = vmatpush.msrb.mxu3 %v4730_v17 }
0x1218   :  { %4780 = vmatpush.msra.mxu0 %v4731_v51  ;;  %v3408_v51 = vrot.slane %v8027_v1, 4 }
0x1219   :  { %4954 = vmatpush.msrb.mxu3 %v4729_v46 }
0x121a   :  { %4781 = vmatpush.msra.mxu0 %v4730_v17  ;;  %v3409_v56 = vadd.f32 %v3408_v51, %v8027_v1 }
0x121b   :  { %4955 = vmatpush.msrb.mxu3 %v4728_v12 }
0x121c   :  { %4782 = vmatpush.msra.mxu0 %v4729_v46  ;;  %v3410_v60 = vrot.slane %v3409_v56, 2 }
0x121e   :  { %4783 = vmatpush.msra.mxu0 %v4728_v12  ;;  %v3411_v52 = vadd.f32 %v3410_v60, %v3409_v56 }
0x121f   :  { %5192 = vmatmul.msk.f32.vlgmr.msra.gmra.mxu0 %vm4764_vm2, %v2050_v0 }
0x1220   :  { %v3412_v30 = vrot.slane %v3411_v52, 1 }
0x1222   :  { %v3413_v22 = vadd.f32 %v3412_v30, %v3411_v52 }
0x1224   :  { %v3414_v48 = vmul.f32 0.25, %v3413_v22 }
0x128c   :  { %v4614_v18 = vpop.f32.mrf.mxu0 }
0x128d   :  { %v4642_v26 = vperm.slane %v4614_v18, 0 }
0x128f   :  { %v4634_v55 = vpop.f32.mrf.mxu3 }
0x129c   :  { %v4785_v21 = vpop.f32.mrf.mxu0 }
0x129d   :  { %v4786_v40 = vadd.f32 %v4785_v21, %v4761_v13 }
0x129f   :  { %v4788_v35 = vadd.f32 %v4786_v40, %v7710_v25 }
0x12a1   :  { %5478 = vtanh.f32 %v4788_v35  ;;  %v5193_v34 = vmul.f32 -1.442695, %v4788_v35 }
0x12a3   :  { %5480 = vpow2.f32 %v5193_v34 }
0x12a7   :  { %v5479_v42 = vpop.eup %5478 }
0x12a8   :  { %4811 = vrot.lane.b32.xlu2 %v5479_v42, %s5651_s12 }
0x12a9   :  { %v5481_v50 = vpop.eup %5480 }
0x12aa   :  { %v4792_v24 = vadd.f32 1.0, %v5481_v50 }
0x12ac   :  { %5482 = vrcp.f32 %v4792_v24  ;;  %v4804_v8 = vand.u32 2147483648, %v4792_v24  ;;  %vm4798_vm15 = vweird.f32 %v4792_v24  ;;  %v4802_v29 = vand.u32 2147483647, %v4792_v24 }
0x12ae   :  { %v4805_v6 = vor.u32 1.1754944e-38, %v4804_v8  ;;  %vm4803_vm5 = vcmp.eq.f32.partialorder %v4802_v29, 8.507059e+37 }
0x12b2   :  { %v5483_v27 = vpop.eup %5482 }
0x12b3   :  { %v4794_v15 = vmul.f32 %v5483_v27, %v4792_v24  ;;  %vm4799_vm9 = vweird.f32 %v5483_v27 }
0x12b4   :  { %vm4800_vm3 = vmor %vm4798_vm15, %vm4799_vm9 }
0x12b5   :  { %v4795_v23 = vsub.f32 1.0, %v4794_v15 }
0x12b7   :  { %v4796_v32 = vmul.f32 %v5483_v27, %v4795_v23 }
0x12b9   :  { %v4797_v63 = vadd.f32 %v5483_v27, %v4796_v32 }
0x12bb   :  { %v4801_v61 = vsel %vm4800_vm3, %v5483_v27, %v4797_v63 }
0x12bc   :  { %v4806_v3 = vsel %vm4803_vm5, %v4805_v6, %v4801_v61 }
0x12bd   :  { %v4809_v39 = vmul.f32 0.0, %v4806_v3 }
0x1302   :  { %v4812_v43 = vpop.permute.xlu2 %4811 }
0x1303   :  { %v4814_v19 = vmul.f32 %v4812_v43, %v4806_v3 }
0x1305   :  { %4816 = vrot.lane.b32.xlu1 %v4814_v19, %s5650_s15 }
0x130d   :  { %4639 = vperm.xlu1 %5288, %v4634_v55  }
0x1315   :  { %3423 = vrot.lane.b32.xlu1 %v3421_v38, %s5650_s15 }
0x1377   :  { %v4817_v2 = vpop.permute.xlu1 %4816 }
0x1378   :  { %v7718_v57 = vadd.f32 %v4817_v2, %v4809_v39 }
0x137a   :  { %5484 = vtanh.f32 %v7718_v57 }
0x137f   :  { %v4640_v7 = vpop.permute.xlu1 %4639 }
0x1380   :  { %v5485_v44 = vpop.eup %5484  ;;  %vm4643_vm6 = vcmp.gt.f32.partialorder %v4640_v7, %v4642_v26  ;;  %vm4644_vm7 = vcmp.eq.f32.partialorder %v4640_v7, %v4642_v26 }
0x1381   :  { %vm4645_vm8 = vmand %vm4644_vm7, %vm1882_vm12  ;;  %4822 = vrot.lane.b32.xlu2 %v5485_v44, %s5651_s12 }
0x1382   :  { %vm4646_vm13 = vmor %vm4643_vm6, %vm4645_vm8  ;;  %vm4707_vm6 = vcmask 254976  }
0x1383   :  { %v5187_v37 = vsel %vm4646_vm13, 1.0, %v8024_v33 }
0x1384   :  { %v4649_v17 = vsel %vm3393_vm10, %v5187_v37, 0.0  ;;  %vm4683_vm10 = vcmask 25600  }
0x1385   :  { %v4650_v46 = vrot.slane %v4649_v17, 4 }
0x1387   :  { %v4651_v12 = vadd.f32 %v4650_v46, %v4649_v17  ;;  %v3424_v5 = vpop.permute.xlu1 %3423 }
0x1388   :  { %v3426_v41 = vsel %vm357_vm1, %v3414_v48, %v3424_v5 }
0x1389   :  { %v4652_v4 = vrot.slane %v4651_v12, 2 }
0x138b   :  { %v4653_v45 = vadd.f32 %v4652_v4, %v4651_v12 }
0x138d   :  { %v4654_v31 = vrot.slane %v4653_v45, 1 }
0x138f   :  { %v4655_v58 = vadd.f32 %v4654_v31, %v4653_v45 }
0x1391   :  { %vm4656_vm12 = vcmp.eq.f32.partialorder %v4655_v58, %v8028_v49 }
0x1392   :  { %v5188_v53 = vsel %vm4656_vm12, 1.0, %v8024_v33  ;;  %vm5057_vm12 = vcmask 24576  }
0x1393   :  { %5190 = vmatmul.msk.f32.vlgmr.msra.gmra.mxu1 %vm4328_vm11, %v5188_v53  ;;  %v4682_v36 = vmul.f32 %v5188_v53, %v4642_v26 }
0x1395   :  { %v4684_v40 = vsel %vm4683_vm10, %v4682_v36, 0.0 }
0x139b   :  { %5195 = vmatmul.msk.f32.vlgmr.msrb.gmra.mxu1 %vm4764_vm2, %v3426_v41 }
0x13db   :  { %v4823_v10 = vpop.permute.xlu2 %4822 }
0x13dc   :  { %v4825_v47 = vmul.f32 %v4823_v10, %v4806_v3 }
0x13de   :  { %4827 = vrot.lane.b32.xlu2 %v4825_v47, %s5650_s15 }
0x1410   :  { %v4679_v59 = vpop.f32.mrf.mxu1 }
0x1418   :  { %v4871_v0 = vpop.f32.mrf.mxu1 }
0x1438   :  { %v4828_v9 = vpop.permute.xlu2 %4827 }
0x1439   :  { %5194 = vmatmul.msk.f32.vlgmr.msra.gmra.mxu3 %vm357_vm1, %v4828_v9 }
0x14bc   :  { %v4848_v33 = vpop.f32.mrf.mxu3 }
0x14bd   :  { %v4872_v18 = vadd.f32 %v4871_v0, %v4848_v33 }
0x14bf   :  { %v4874_v13 = vadd.f32 %v4872_v18, %v7710_v25 }
0x14c1   :  { %5486 = vtanh.f32 %v4874_v13  ;;  %v5196_v35 = vmul.f32 -1.442695, %v4874_v13 }
0x14c3   :  { %5488 = vpow2.f32 %v5196_v35 }
0x14c7   :  { %v5487_v21 = vpop.eup %5486 }
0x14c8   :  { %4897 = vrot.lane.b32.xlu2 %v5487_v21, %s5651_s12 }
0x14c9   :  { %v5489_v42 = vpop.eup %5488 }
0x14ca   :  { %v4878_v34 = vadd.f32 1.0, %v5489_v42 }
0x14cc   :  { %5490 = vrcp.f32 %v4878_v34  ;;  %v4890_v32 = vand.u32 2147483648, %v4878_v34  ;;  %vm4884_vm14 = vweird.f32 %v4878_v34  ;;  %v4888_v63 = vand.u32 2147483647, %v4878_v34 }
0x14ce   :  { %v4891_v11 = vor.u32 1.1754944e-38, %v4890_v32  ;;  %vm4889_vm0 = vcmp.eq.f32.partialorder %v4888_v63, 8.507059e+37 }
0x14d2   :  { %v5491_v50 = vpop.eup %5490 }
0x14d3   :  { %v4880_v24 = vmul.f32 %v5491_v50, %v4878_v34  ;;  %vm4885_vm11 = vweird.f32 %v5491_v50 }
0x14d4   :  { %vm4886_vm4 = vmor %vm4884_vm14, %vm4885_vm11 }
0x14d5   :  { %v4881_v27 = vsub.f32 1.0, %v4880_v24 }
0x14d7   :  { %v4882_v15 = vmul.f32 %v5491_v50, %v4881_v27 }
0x14d9   :  { %v4883_v23 = vadd.f32 %v5491_v50, %v4882_v15 }
0x14db   :  { %v4887_v8 = vsel %vm4886_vm4, %v5491_v50, %v4883_v23 }
0x14dc   :  { %v4892_v29 = vsel %vm4889_vm0, %v4891_v11, %v4887_v8 }
0x14dd   :  { %v4895_v60 = vmul.f32 %v4892_v29, %v7718_v57 }
0x14f1   :  { %4685 = vadd.xlane.f32.xlu2 %v4684_v40 }
0x1522   :  { %v4898_v20 = vpop.permute.xlu2 %4897 }
0x1523   :  { %v4900_v61 = vmul.f32 %v4898_v20, %v4892_v29 }
0x1525   :  { %4902 = vrot.lane.b32.xlu1 %v4900_v61, %s5650_s15  ;;  %v5001_v61 = vld [vmem:[#allocation8 + $0x18] sm:$0xff] }
0x1526   :  { %5020 = vmatpush.msra.mxu2 %v5001_v61 }
0x1564   :  { %v4686_v14 = vpop.xlane.xlu2 %4685 }
0x1565   :  { %v5191_v6 = vmul.f32 -1.442695, %v4686_v14  ;;  %v5000_v14 = vld [vmem:[#allocation8 + $0x10] sm:$0xff] }
0x1566   :  { %5021 = vmatpush.msra.mxu2 %v5000_v14 }
0x1567   :  { %5492 = vpow2.f32 %v5191_v6  ;;  %v4999_v6 = vld [vmem:[#allocation8 + $0x8] sm:$0xff] }
0x1568   :  { %5022 = vmatpush.msra.mxu2 %v4999_v6 }
0x156d   :  { %v5493_v43 = vpop.eup %5492 }
0x156e   :  { %v4690_v3 = vadd.f32 1.0, %v5493_v43  ;;  %v4998_v43 = vld [vmem:[#allocation8] sm:$0xff] }
0x156f   :  { %5023 = vmatpush.msra.mxu2 %v4998_v43 }
0x1570   :  { %5494 = vrcp.f32 %v4690_v3  ;;  %v4702_v16 = vand.u32 2147483648, %v4690_v3  ;;  %v4700_v54 = vand.u32 2147483647, %v4690_v3  ;;  %vm4696_vm15 = vweird.f32 %v4690_v3 }
0x1572   :  { %v4703_v39 = vor.u32 1.1754944e-38, %v4702_v16  ;;  %vm4701_vm5 = vcmp.eq.f32.partialorder %v4700_v54, 8.507059e+37  ;;  %v5031_v16 = vld [vmem:[%s7796_s22 + $0x10] sm:$0xff]  ;;  %v5029_v54 = vld [vmem:[%s7796_s22] sm:$0xff] }
0x1576   :  { %v5495_v19 = vpop.eup %5494 }
0x1577   :  { %v4692_v28 = vmul.f32 %v5495_v19, %v4690_v3  ;;  %vm4697_vm9 = vweird.f32 %v5495_v19 }
0x1578   :  { %vm4698_vm3 = vmor %vm4696_vm15, %vm4697_vm9 }
0x1579   :  { %v4693_v62 = vsub.f32 1.0, %v4692_v28  ;;  %v5032_v28 = vld [vmem:[%s7796_s22 + $0x18] sm:$0xff] }
0x157a   :  { %5049 = vmatpush.msrb.mxu0 %v5032_v28 }
0x157b   :  { %v4694_v55 = vmul.f32 %v5495_v19, %v4693_v62 }
0x157c   :  { %5050 = vmatpush.msrb.mxu0 %v5031_v16 }
0x157d   :  { %v4695_v38 = vadd.f32 %v5495_v19, %v4694_v55  ;;  %v5030_v55 = vld [vmem:[%s7796_s22 + $0x8] sm:$0xff]  ;;  %s5066_s22 = sshll.u32 %s7798_s24, 4  ;;  %s5067_s22 = int_to_ptr.hbm [resolvable:$true] %s5066_s22 }
0x157e   :  { %5051 = vmatpush.msrb.mxu0 %v5030_v55 }
0x157f   :  { %v4699_v2 = vsel %vm4698_vm3, %v5495_v19, %v4695_v38  ;;  %v5002_v38 = vld [vmem:[%s7795_s21] sm:$0x1] }
0x1580   :  { %v4704_v26 = vsel %vm4701_vm5, %v4703_v39, %v4699_v2  ;;  %5052 = vmatpush.msrb.mxu0 %v5029_v54 }
0x1581   :  { %v4706_v7 = vmul.f32 %v4704_v26, %v4679_v59 }
0x1583   :  { %v4716_v44 = vsel %vm4707_vm6, %v4706_v7, -inf  ;;  %v4708_v1 = vsel %vm4707_vm6, %v4706_v7, 0.0  ;;  %v5033_v7 = vld [vmem:[%s7797_s23] sm:$0x1] }
0x1584   :  { %v4717_v51 = vrot.slane %v4716_v44, 4  ;;  %v4709_v31 = vrot.slane %v4708_v1, 4 }
0x1586   :  { %v4718_v37 = vmax.f32 %v4716_v44, %v4717_v51  ;;  %v4710_v58 = vadd.f32 %v4709_v31, %v4708_v1 }
0x1588   :  { %v4719_v17 = vrot.slane %v4718_v37, 2  ;;  %v4711_v30 = vrot.slane %v4710_v58, 2 }
0x158a   :  { %v4720_v56 = vmax.f32 %v4718_v37, %v4719_v17  ;;  %v4712_v49 = vadd.f32 %v4711_v30, %v4710_v58 }
0x158c   :  { %v4721_v46 = vrot.slane %v4720_v56, 1  ;;  %v4713_v53 = vrot.slane %v4712_v49, 1 }
0x158e   :  { %v4722_v12 = vmax.f32 %v4720_v56, %v4721_v46  ;;  %v4714_v36 = vadd.f32 %v4713_v53, %v4712_v49 }
0x1590   :  { %4724 = vrot.lane.b32.xlu1 %v4722_v12, %s5650_s15  ;;  %v4715_v22 = vmul.f32 0.5, %v4714_v36 }
0x1597   :  { %v4903_v4 = vpop.permute.xlu1 %4902 }
0x1598   :  { %v4905_v45 = vadd.f32 %v4903_v4, %v4895_v60 }
0x159a   :  { %5496 = vtanh.f32 %v4905_v45 }
0x15a0   :  { %v5497_v52 = vpop.eup %5496 }
0x15a1   :  { %4908 = vrot.lane.b32.xlu0 %v5497_v52, %s5651_s12 }
0x1602   :  { %v4725_v5 = vpop.permute.xlu1 %4724 }
0x1603   :  { %v4727_v48 = vsel %vm357_vm1, %v4715_v22, %v4725_v5 }
0x1604   :  { %5198 = vmatmul.msk.f32.vlgmr.msrb.gmra.mxu3 %vm4764_vm2, %v4727_v48 }
0x1613   :  { %v4909_v41 = vpop.permute.xlu0 %4908 }
0x1614   :  { %v4911_v57 = vmul.f32 %v4909_v41, %v4892_v29 }
0x1616   :  { %4913 = vrot.lane.b32.xlu1 %v4911_v57, %s5650_s15 }
0x1687   :  { %v4957_v47 = vpop.f32.mrf.mxu3 }
0x1688   :  { %v4914_v10 = vpop.permute.xlu1 %4913 }
0x1689   :  { %5197 = vmatmul.msk.f32.vlgmr.msrb.gmra.mxu2 %vm357_vm1, %v4914_v10 }
0x170c   :  { %v4934_v9 = vpop.f32.mrf.mxu2 }
0x170d   :  { %v4958_v59 = vadd.f32 %v4957_v47, %v4934_v9 }
0x170f   :  { %v4960_v0 = vadd.f32 %v4958_v59, %v7710_v25 }
0x1711   :  { %5498 = vtanh.f32 %v4960_v0  ;;  %v5199_v18 = vmul.f32 -1.442695, %v4960_v0 }
0x1713   :  { %5500 = vpow2.f32 %v5199_v18 }
0x1717   :  { %v5499_v33 = vpop.eup %5498 }
0x1718   :  { %4983 = vrot.lane.b32.xlu1 %v5499_v33, %s5651_s12 }
0x1719   :  { %v5501_v13 = vpop.eup %5500 }
0x171a   :  { %v4964_v21 = vadd.f32 1.0, %v5501_v13 }
0x171c   :  { %5502 = vrcp.f32 %v4964_v21  ;;  %v4976_v24 = vand.u32 2147483648, %v4964_v21  ;;  %vm4970_vm7 = vweird.f32 %v4964_v21  ;;  %v4974_v27 = vand.u32 2147483647, %v4964_v21 }
0x171e   :  { %v4977_v15 = vor.u32 1.1754944e-38, %v4976_v24  ;;  %vm4975_vm13 = vcmp.eq.f32.partialorder %v4974_v27, 8.507059e+37 }
0x1722   :  { %v5503_v40 = vpop.eup %5502 }
0x1723   :  { %v4966_v35 = vmul.f32 %v5503_v40, %v4964_v21  ;;  %vm4971_vm2 = vweird.f32 %v5503_v40 }
0x1724   :  { %vm4972_vm8 = vmor %vm4970_vm7, %vm4971_vm2 }
0x1725   :  { %v4967_v42 = vsub.f32 1.0, %v4966_v35 }
0x1727   :  { %v4968_v34 = vmul.f32 %v5503_v40, %v4967_v42 }
0x1729   :  { %v4969_v50 = vadd.f32 %v5503_v40, %v4968_v34 }
0x172b   :  { %v4973_v25 = vsel %vm4972_vm8, %v5503_v40, %v4969_v50 }
0x172c   :  { %v4978_v32 = vsel %vm4975_vm13, %v4977_v15, %v4973_v25 }
0x172d   :  { %v4981_v8 = vmul.f32 %v4978_v32, %v4905_v45 }
0x178a   :  { %v4984_v23 = vpop.permute.xlu1 %4983 }
0x178b   :  { %v4986_v63 = vmul.f32 %v4984_v23, %v4978_v32 }
0x178d   :  { %4988 = vrot.lane.b32.xlu0 %v4986_v63, %s5650_s15 }
0x17ff   :  { %v4989_v11 = vpop.permute.xlu0 %4988 }
0x1800   :  { %v4991_v20 = vadd.f32 %v4989_v11, %v4981_v8 }
0x1802   :  { %5504 = vtanh.f32 %v4991_v20 }
0x1808   :  { %v5505_v29 = vpop.eup %5504 }
0x1809   :  { %4994 = vrot.lane.b32.xlu1 %v5505_v29, %s5651_s12 }
0x187b   :  { %v4995_v3 = vpop.permute.xlu1 %4994 }
0x187c   :  { %v4997_v19 = vmul.f32 %v4995_v3, %v4978_v32 }
0x187e   :  { %5004 = vrot.lane.b32.xlu0 %v4997_v19, %s5650_s15 }
0x18f0   :  { %v5005_v62 = vpop.permute.xlu0 %5004 }
0x18f1   :  { %5200 = vmatmul.msk.f32.vlgmr.msra.gmra.mxu2 %vm357_vm1, %v5005_v62 }
0x1974   :  { %v5025_v39 = vpop.f32.mrf.mxu2 }
0x1975   :  { %v5026_v2 = vadd.f32 %v5025_v39, %v5002_v38 }
0x1977   :  { %v5028_v26 = vmax.f32 %v5026_v2, 0.0 }
0x1979   :  { %5201 = vmatmul.msk.f32.vlgmr.msrb.gmra.mxu0 %vm357_vm1, %v5028_v26 }
0x19f6   :  { %v5054_v44 = vpop.f32.mrf.mxu0 }
0x19f7   :  { %v5055_v1 = vadd.f32 %v5054_v44, %v5033_v7 }
0x19f9   :  { %5058 = vst.msk [vmem:[#allocation10] sm:$0x1] %vm5057_vm12, %v5055_v1 }
0x19fa   :  { %5069 = dma.vmem_to_hbm [thread:$0]  %s5065_s3, 16, %s5067_s22, [#allocation4]  }
0x19fb   :  { %5634 = dma.done.wait [#allocation4], 16  }
0x19fc   :  { %5635 = vsyncadd [#allocation4], 4294967280 }
0x19fd   :  { %5074 = vsyncpa [#allocation3], 1 }
0x19fe   :  { %5075 = vsyncpa [#allocation6], 1 }
0x19ff   :  { %5076 = vsyncpa [#allocation9], 1 }
0x1a00   :  { %5077 = vsyncpa [#allocation4], 1 }

</bundles_post_ra>
